<compile_context>
chip_gen: v5e
topology: v5e:2x2
jax: 0.10.0
libtpu: 0.0.40
codegen_flags: <defaults>
</compile_context>

<pallas_src>
import functools

import jax
import jax.numpy as jnp
from jax.experimental import pallas as pl
from jax.experimental.pallas import tpu as pltpu

TFACTOR = 0.05
BN_EPS = 1e-4
IN_FEATURES = 28 * 28          # 784
IN_PAD = 896                   # 7 * 128, lane-aligned K for layer 1
HIDDEN = 512
VMEM_LIMIT = 32 * 1024 * 1024  # explicit scoped-VMEM budget (safe on v5e..v7x)


def _ternarize(w):
    """tfactor-thresholded ternary quantization (centroid == 0 for M2D == 0)."""
    th = TFACTOR * jnp.max(jnp.abs(w))
    return jnp.where(w >= th, 1.0, jnp.where(w < -th, -1.0, 0.0)).astype(w.dtype)


def _prep_weights(params, num_classes):
    """Ternarize once (plain JAX/XLA), cast to bf16 ({-1,0,+1} exact),
    pre-transpose to (in, out), zero-pad layer-1 K to 896 and the classifier
    output to a 128-lane-aligned width."""
    nc_pad = ((num_classes + 127) // 128) * 128
    w1q = _ternarize(params["fc1"][0]).T.astype(jnp.bfloat16)      # (784, 512)
    w1 = jnp.zeros((IN_PAD, HIDDEN), jnp.bfloat16).at[:IN_FEATURES].set(w1q)
    w2 = _ternarize(params["fc2"][0]).T.astype(jnp.bfloat16)       # (512, 512)
    w3 = _ternarize(params["fc3"][0]).T.astype(jnp.bfloat16)       # (512, 512)
    wc, bc = params["classifier"]
    wc_t = jnp.zeros((HIDDEN, nc_pad), jnp.bfloat16)
    wc_t = wc_t.at[:, :num_classes].set(_ternarize(wc).T.astype(jnp.bfloat16))
    bc_p = jnp.zeros((1, nc_pad), jnp.float32).at[0, :num_classes].set(bc)
    return w1, w2, w3, wc_t, bc_p, nc_pad


def _prep_x(x, batch_pad=None):
    """Reshape to (B, 784), cast to bf16, zero-pad K to 896 and (optionally)
    rows to batch_pad.  Zero pad rows/columns are numerically exact."""
    x = x.reshape(-1, IN_FEATURES).astype(jnp.bfloat16)
    batch = x.shape[0]
    rows = batch if batch_pad is None else batch_pad
    xp = jnp.zeros((rows, IN_PAD), jnp.bfloat16).at[:batch, :IN_FEATURES].set(x)
    return xp, batch


# ---------------------------------------------------------------------------
# Small-batch fast path: one un-gridded call, whole batch resident in VMEM.
# ---------------------------------------------------------------------------
def _fused_kernel(x_ref, w1_ref, w2_ref, w3_ref, wc_ref, vec_ref, bc_ref, o_ref):
    def hidden(h, w_ref, row):
        # bf16 operands on the MXU, f32 accumulation.
        y = jnp.dot(h.astype(jnp.bfloat16), w_ref[...],
                    preferred_element_type=jnp.float32)
        # Training-mode batch stats (biased variance), folded into a single
        # per-feature scale/shift.  The linear bias is omitted: BN's mean
        # subtraction cancels it exactly.
        mean = jnp.mean(y, axis=0, keepdims=True)
        var = jnp.mean(jnp.square(y - mean), axis=0, keepdims=True)
        gamma = vec_ref[row:row + 1, :]
        beta = vec_ref[row + 1:row + 2, :]
        scale = gamma * jax.lax.rsqrt(var + BN_EPS)
        shift = beta - mean * scale
        return jnp.maximum(y * scale + shift, 0.0)

    h = hidden(x_ref[...], w1_ref, 0)
    h = hidden(h, w2_ref, 2)
    h = hidden(h, w3_ref, 4)
    out = jnp.dot(h.astype(jnp.bfloat16), wc_ref[...],
                  preferred_element_type=jnp.float32) + bc_ref[...]
    o_ref[...] = out.astype(o_ref.dtype)


@functools.partial(jax.jit, static_argnames=("num_classes",))
def mlp4_forward_fused(x, params, num_classes):
    xp, batch = _prep_x(x)
    w1, w2, w3, wc, bc_p, nc_pad = _prep_weights(params, num_classes)
    # Pack the six BN per-feature vectors into one (8, 512) array.
    vecs = jnp.zeros((8, HIDDEN), jnp.float32)
    for r, name in zip((0, 2, 4), ("fc1", "fc2", "fc3")):
        _, _, g, be = params[name]
        vecs = vecs.at[r].set(g).at[r + 1].set(be)
    vmem = pl.BlockSpec(memory_space=pltpu.MemorySpace.VMEM)
    flops = 2 * batch * (IN_PAD * HIDDEN + 2 * HIDDEN * HIDDEN + HIDDEN * nc_pad)
    bytes_accessed = (xp.size * 2 + (w1.size + w2.size + w3.size + wc.size) * 2
                      + (vecs.size + bc_p.size) * 4 + batch * nc_pad * 4)
    out = pl.pallas_call(
        _fused_kernel,
        out_shape=jax.ShapeDtypeStruct((batch, nc_pad), jnp.float32),
        in_specs=[vmem] * 7,
        out_specs=vmem,
        compiler_params=pltpu.CompilerParams(vmem_limit_bytes=VMEM_LIMIT),
        cost_estimate=pl.CostEstimate(flops=flops, transcendentals=0,
                                      bytes_accessed=bytes_accessed),
    )(xp, w1, w2, w3, wc, vecs, bc_p)
    return out[:, :num_classes]


# ---------------------------------------------------------------------------
# Large-batch path: 2-D grid (core, batch-tile).  Each hidden layer writes its
# raw pre-BN activations in bf16 and accumulates per-feature / per-core
# sum & sum-of-squares (f32, from the in-register f32 matmul result) across
# the sequential batch-tile axis; the exact full-batch BN is folded into the
# next layer's prologue as a per-feature scale/shift.
# ---------------------------------------------------------------------------
def _stats_epilogue(y, y_ref, s_ref, ss_ref):
    y_ref[...] = y.astype(y_ref.dtype)      # bf16 activation store

    @pl.when(pl.program_id(1) == 0)
    def _init():
        s_ref[...] = jnp.zeros_like(s_ref)
        ss_ref[...] = jnp.zeros_like(ss_ref)

    s_ref[...] += jnp.sum(y, axis=0, keepdims=True)[None]
    ss_ref[...] += jnp.sum(y * y, axis=0, keepdims=True)[None]


def _layer1_tile_kernel(x_ref, w_ref, y_ref, s_ref, ss_ref):
    # Zero-padded rows/columns of x contribute exactly zero to y and stats.
    y = jnp.dot(x_ref[...], w_ref[...], preferred_element_type=jnp.float32)
    _stats_epilogue(y, y_ref, s_ref, ss_ref)


def _hidden_tile_kernel(yp_ref, sc_ref, sh_ref, w_ref, y_ref, s_ref, ss_ref,
                        *, valid_rows, tile_b, npc):
    h = jnp.maximum(yp_ref[...].astype(jnp.float32) * sc_ref[...] + sh_ref[...],
                    0.0)
    if valid_rows is not None:
        # Zero pad rows so they contribute nothing to this layer's output or
        # the accumulated BN statistics.
        tile = pl.program_id(0) * npc + pl.program_id(1)
        row = tile * tile_b + jax.lax.broadcasted_iota(jnp.int32, h.shape, 0)
        h = jnp.where(row < valid_rows, h, 0.0)
    y = jnp.dot(h.astype(jnp.bfloat16), w_ref[...],
                preferred_element_type=jnp.float32)
    _stats_epilogue(y, y_ref, s_ref, ss_ref)


def _classifier_tile_kernel(yp_ref, sc_ref, sh_ref, wc_ref, bc_ref, o_ref):
    h = jnp.maximum(yp_ref[...].astype(jnp.float32) * sc_ref[...] + sh_ref[...],
                    0.0)
    out = jnp.dot(h.astype(jnp.bfloat16), wc_ref[...],
                  preferred_element_type=jnp.float32) + bc_ref[...]
    o_ref[...] = out.astype(o_ref.dtype)


def _bn_fold(s, ss, gamma, beta, batch):
    """Fold exact full-batch BN into a per-feature scale/shift.
    s, ss have shape (ncore, 1, HIDDEN) (per-core partial sums)."""
    s = jnp.sum(s, axis=(0, 1))
    ss = jnp.sum(ss, axis=(0, 1))
    mean = s / batch
    var = ss / batch - mean * mean          # biased variance (single pass, f32)
    scale = gamma * jax.lax.rsqrt(var + BN_EPS)
    shift = beta - mean * scale
    return scale[None, :].astype(jnp.float32), shift[None, :].astype(jnp.float32)


@functools.partial(jax.jit, static_argnames=("num_classes", "tile_b"))
def mlp4_forward_tiled(x, params, num_classes, tile_b=512):
    batch = x.size // IN_FEATURES
    batch_pad = ((batch + tile_b - 1) // tile_b) * tile_b   # pad, don't OOM
    nt = batch_pad // tile_b
    ncore = 2 if (nt % 2 == 0 and nt >= 2) else 1           # v7x: 2 TCs
    npc = nt // ncore
    valid_rows = None if batch_pad == batch else batch      # static

    xp, _ = _prep_x(x, batch_pad)
    w1, w2, w3, wc, bc_p, nc_pad = _prep_weights(params, num_classes)

    stats_params = pltpu.CompilerParams(
        dimension_semantics=("parallel", "arbitrary"),
        vmem_limit_bytes=VMEM_LIMIT)

    def row_spec(feat):
        return pl.BlockSpec((tile_b, feat), lambda c, i: (c * npc + i, 0))

    def full_spec(shape):
        return pl.BlockSpec(shape, lambda c, i: (0,) * len(shape))

    stat_shapes = (jax.ShapeDtypeStruct((batch_pad, HIDDEN), jnp.bfloat16),
                   jax.ShapeDtypeStruct((ncore, 1, HIDDEN), jnp.float32),
                   jax.ShapeDtypeStruct((ncore, 1, HIDDEN), jnp.float32))
    stat_specs = (row_spec(HIDDEN),
                  pl.BlockSpec((1, 1, HIDDEN), lambda c, i: (c, 0, 0)),
                  pl.BlockSpec((1, 1, HIDDEN), lambda c, i: (c, 0, 0)))
    stat_bytes = 2 * ncore * HIDDEN * 4

    # ---- layer 1 (no prologue; pad rows of x are zero) ----
    y, s, ss = pl.pallas_call(
        _layer1_tile_kernel,
        grid=(ncore, npc),
        in_specs=[row_spec(IN_PAD), full_spec((IN_PAD, HIDDEN))],
        out_specs=stat_specs,
        out_shape=stat_shapes,
        compiler_params=stats_params,
        cost_estimate=pl.CostEstimate(
            flops=2 * batch_pad * IN_PAD * HIDDEN, transcendentals=0,
            bytes_accessed=batch_pad * IN_PAD * 2 + IN_PAD * HIDDEN * 2
                           + batch_pad * HIDDEN * 2 + stat_bytes),
    )(xp, w1)

    # ---- layers 2 and 3: previous layer's BN+ReLU folded into the prologue ----
    hidden_kernel = functools.partial(_hidden_tile_kernel,
                                      valid_rows=valid_rows,
                                      tile_b=tile_b, npc=npc)
    cost_h = pl.CostEstimate(
        flops=2 * batch_pad * HIDDEN * HIDDEN, transcendentals=0,
        bytes_accessed=2 * batch_pad * HIDDEN * 2 + HIDDEN * HIDDEN * 2
                       + 2 * HIDDEN * 4 + stat_bytes)
    for bn_name, w in (("fc1", w2), ("fc2", w3)):
        _, _, g, be = params[bn_name]
        scale, shift = _bn_fold(s, ss, g, be, batch)
        y, s, ss = pl.pallas_call(
            hidden_kernel,
            grid=(ncore, npc),
            in_specs=[row_spec(HIDDEN),
                      full_spec((1, HIDDEN)), full_spec((1, HIDDEN)),
                      full_spec((HIDDEN, HIDDEN))],
            out_specs=stat_specs,
            out_shape=stat_shapes,
            compiler_params=stats_params,
            cost_estimate=cost_h,
        )(y, scale, shift, w)

    # ---- classifier (layer-3 BN+ReLU folded into its prologue; no stats) ----
    _, _, g3, be3 = params["fc3"]
    scale, shift = _bn_fold(s, ss, g3, be3, batch)
    out = pl.pallas_call(
        _classifier_tile_kernel,
        grid=(nt,),
        in_specs=[pl.BlockSpec((tile_b, HIDDEN), lambda i: (i, 0)),
                  pl.BlockSpec((1, HIDDEN), lambda i: (0, 0)),
                  pl.BlockSpec((1, HIDDEN), lambda i: (0, 0)),
                  pl.BlockSpec((HIDDEN, nc_pad), lambda i: (0, 0)),
                  pl.BlockSpec((1, nc_pad), lambda i: (0, 0))],
        out_specs=pl.BlockSpec((tile_b, nc_pad), lambda i: (i, 0)),
        out_shape=jax.ShapeDtypeStruct((batch_pad, nc_pad), jnp.float32),
        compiler_params=pltpu.CompilerParams(
            dimension_semantics=("parallel",), vmem_limit_bytes=VMEM_LIMIT),
        cost_estimate=pl.CostEstimate(
            flops=2 * batch_pad * HIDDEN * nc_pad, transcendentals=0,
            bytes_accessed=batch_pad * HIDDEN * 2 + HIDDEN * nc_pad * 2
                           + nc_pad * 4 + batch_pad * nc_pad * 4),
    )(y, scale, shift, wc, bc_p)
    return out[:batch, :num_classes]


def mlp4_forward(x, params, num_classes, tile_b=512):
    """Dispatcher: batch-tiled path for large batches (any batch size — pad
    rows are masked out of the BN statistics), fused whole-batch kernel for
    small batches.  tile_b=512 is safe across v5e/v6e/v7x; 1024 also fits on
    v6e/v7x with bf16 activations."""
    batch = x.size // IN_FEATURES
    if batch >= 2 * tile_b:
        return mlp4_forward_tiled(x, params, num_classes, tile_b)
    return mlp4_forward_fused(x, params, num_classes)


# ---------------------------------------------------------------------------
# Parameter init + pure-JAX reference
# ---------------------------------------------------------------------------
def init_params(key, num_classes):
    """kaiming_normal (fan_in) weights, zero biases, BN gamma=1 / beta=0."""
    dims = [(784, 512), (512, 512), (512, 512), (512, num_classes)]
    names = ["fc1", "fc2", "fc3", "classifier"]
    params = {}
    keys = jax.random.split(key, len(dims))
    for k, name, (fan_in, fan_out) in zip(keys, names, dims):
        std = (2.0 / fan_in) ** 0.5
        w = std * jax.random.normal(k, (fan_out, fan_in), jnp.float32)
        b = jnp.zeros((fan_out,), jnp.float32)
        if name == "classifier":
            params[name] = (w, b)
        else:
            params[name] = (w, b, jnp.ones((fan_out,), jnp.float32),
                            jnp.zeros((fan_out,), jnp.float32))
    return params


def reference_forward(x, params, num_classes):
    """Pure-JAX reference in the faithful layer form (linear bias + standard
    BatchNorm formula).  Matmul operands are cast to bf16 with f32 accumulation
    to match the kernels' MXU numerics (ternary weights are exact in bf16);
    inter-layer activations are kept in f32."""
    del num_classes
    h = x.reshape(-1, IN_FEATURES).astype(jnp.float32)
    for name in ("fc1", "fc2", "fc3"):
        w, b, g, be = params[name]
        wq = _ternarize(w).astype(jnp.bfloat16)
        y = jnp.dot(h.astype(jnp.bfloat16), wq.T,
                    preferred_element_type=jnp.float32) + b[None, :]
        mean = jnp.mean(y, axis=0, keepdims=True)
        var = jnp.mean((y - mean) ** 2, axis=0, keepdims=True)
        h = jnp.maximum((y - mean) * jax.lax.rsqrt(var + BN_EPS) * g + be, 0.0)
    wc, bc = params["classifier"]
    wcq = _ternarize(wc).astype(jnp.bfloat16)
    return jnp.dot(h.astype(jnp.bfloat16), wcq.T,
                   preferred_element_type=jnp.float32) + bc[None, :]


def _assert_close_scaled(name, out, ref, tol):
    """Error relative to the overall output scale (bf16 activation storage in
    the tiled path accumulates ~0.2% rounding per layer across 4 layers)."""
    err = float(jnp.max(jnp.abs(out - ref)))
    scale = float(jnp.maximum(jnp.max(jnp.abs(ref)), 1.0))
    assert err <= tol * scale, f"{name}: max|err|={err:.4f}, scale={scale:.2f}"


if __name__ == "__main__":
    num_classes = 10
    key = jax.random.PRNGKey(0)
    k_params, k_x1, k_x2, k_x3 = jax.random.split(key, 4)

    params = init_params(k_params, num_classes)

    # 1) Small batch -> fused single-call fast path (NCHW MNIST-like input).
    x_small = jax.random.normal(k_x1, (8, 1, 28, 28), jnp.float32)
    out_fused = jax.block_until_ready(mlp4_forward(x_small, params, num_classes))
    ref_small = reference_forward(x_small, params, num_classes)
    assert out_fused.shape == (8, num_classes)
    assert jnp.allclose(out_fused, ref_small, rtol=1e-2, atol=1e-2), \
        "fused kernel mismatch vs reference"

    # 2) Tiled path, divisible batch, tiny tiles to exercise the 2-D
    #    (core, batch-tile) grid and BN-stats accumulation (nt=4 -> 2 "cores").
    x_big = jax.random.normal(k_x2, (32, 1, 28, 28), jnp.float32)
    out_tiled = jax.block_until_ready(
        mlp4_forward_tiled(x_big, params, num_classes, tile_b=8))
    ref_big = reference_forward(x_big, params, num_classes)
    assert out_tiled.shape == (32, num_classes)
    _assert_close_scaled("tiled (divisible)", out_tiled, ref_big, 5e-2)

    # 3) Tiled path, non-divisible batch (12 -> padded to 16): exercises the
    #    pad-row masking of the BN statistics.
    x_odd = jax.random.normal(k_x3, (12, 1, 28, 28), jnp.float32)
    out_pad = jax.block_until_ready(
        mlp4_forward_tiled(x_odd, params, num_classes, tile_b=8))
    ref_odd = reference_forward(x_odd, params, num_classes)
    assert out_pad.shape == (12, num_classes)
    _assert_close_scaled("tiled (padded batch)", out_pad, ref_odd, 5e-2)

    print("KERNEL_OK")
</pallas_src>

<mosaic_0001>
module attributes {stable_mosaic.version = 11 : i64} {
  func.func @_fused_kernel(%arg0: memref<8x896xbf16, #tpu.memory_space<vmem>>, %arg1: memref<896x512xbf16, #tpu.memory_space<vmem>>, %arg2: memref<512x512xbf16, #tpu.memory_space<vmem>>, %arg3: memref<512x512xbf16, #tpu.memory_space<vmem>>, %arg4: memref<512x128xbf16, #tpu.memory_space<vmem>>, %arg5: memref<8x512xf32, #tpu.memory_space<vmem>>, %arg6: memref<1x128xf32, #tpu.memory_space<vmem>>, %arg7: memref<8x128xf32, #tpu.memory_space<vmem>>) attributes {dimension_semantics = [], scalar_prefetch = 0 : i64, scratch_operands = 0 : i64, tpu.core_type = #tpu.core_type<tc>} {
    %c0 = arith.constant 0 : index
    %c0_0 = arith.constant 0 : index
    %0 = vector.load %arg0[%c0, %c0_0] : memref<8x896xbf16, #tpu.memory_space<vmem>>, vector<8x896xbf16>
    %c0_1 = arith.constant 0 : index
    %c0_2 = arith.constant 0 : index
    %1 = vector.load %arg1[%c0_1, %c0_2] : memref<896x512xbf16, #tpu.memory_space<vmem>>, vector<896x512xbf16>
    %cst = arith.constant dense<0.000000e+00> : vector<8x512xf32>
    %2 = tpu.matmul %0, %1, %cst {dimension_numbers = #tpu.dot_dimension_numbers<[1], [0], [0], [1], [0, 0, 1, 1], [], []>} : vector<8x896xbf16>, vector<896x512xbf16>, vector<8x512xf32> -> vector<8x512xf32>
    %cst_3 = arith.constant dense<0.000000e+00> : vector<512xf32>
    %3 = vector.multi_reduction <add>, %2, %cst_3 [0] : vector<8x512xf32> to vector<512xf32>
    %4 = vector.shape_cast %3 : vector<512xf32> to vector<1x512xf32>
    %cst_4 = arith.constant 8.000000e+00 : f32
    %5 = vector.broadcast %cst_4 : f32 to vector<1x512xf32>
    %6 = arith.divf %4, %5 : vector<1x512xf32>
    %7 = vector.broadcast %6 : vector<1x512xf32> to vector<8x512xf32>
    %8 = arith.subf %2, %7 : vector<8x512xf32>
    %9 = arith.mulf %8, %8 : vector<8x512xf32>
    %cst_5 = arith.constant dense<0.000000e+00> : vector<512xf32>
    %10 = vector.multi_reduction <add>, %9, %cst_5 [0] : vector<8x512xf32> to vector<512xf32>
    %11 = vector.shape_cast %10 : vector<512xf32> to vector<1x512xf32>
    %cst_6 = arith.constant 8.000000e+00 : f32
    %12 = vector.broadcast %cst_6 : f32 to vector<1x512xf32>
    %13 = arith.divf %11, %12 : vector<1x512xf32>
    %c0_7 = arith.constant 0 : index
    %c0_8 = arith.constant 0 : index
    %14 = vector.load %arg5[%c0_7, %c0_8] : memref<8x512xf32, #tpu.memory_space<vmem>>, vector<1x512xf32>
    %c1 = arith.constant 1 : index
    %c0_9 = arith.constant 0 : index
    %15 = vector.load %arg5[%c1, %c0_9] : memref<8x512xf32, #tpu.memory_space<vmem>>, vector<1x512xf32>
    %cst_10 = arith.constant 9.99999974E-5 : f32
    %16 = vector.broadcast %cst_10 : f32 to vector<1x512xf32>
    %17 = arith.addf %13, %16 : vector<1x512xf32>
    %18 = math.rsqrt %17 : vector<1x512xf32>
    %19 = arith.mulf %14, %18 : vector<1x512xf32>
    %20 = arith.mulf %6, %19 : vector<1x512xf32>
    %21 = arith.subf %15, %20 : vector<1x512xf32>
    %22 = vector.broadcast %19 : vector<1x512xf32> to vector<8x512xf32>
    %23 = arith.mulf %2, %22 : vector<8x512xf32>
    %24 = vector.broadcast %21 : vector<1x512xf32> to vector<8x512xf32>
    %25 = arith.addf %23, %24 : vector<8x512xf32>
    %cst_11 = arith.constant 0.000000e+00 : f32
    %26 = vector.broadcast %cst_11 : f32 to vector<8x512xf32>
    %27 = arith.maximumf %25, %26 : vector<8x512xf32>
    %28 = arith.truncf %27 : vector<8x512xf32> to vector<8x512xbf16>
    %c0_12 = arith.constant 0 : index
    %c0_13 = arith.constant 0 : index
    %29 = vector.load %arg2[%c0_12, %c0_13] : memref<512x512xbf16, #tpu.memory_space<vmem>>, vector<512x512xbf16>
    %cst_14 = arith.constant dense<0.000000e+00> : vector<8x512xf32>
    %30 = tpu.matmul %28, %29, %cst_14 {dimension_numbers = #tpu.dot_dimension_numbers<[1], [0], [0], [1], [0, 0, 1, 1], [], []>} : vector<8x512xbf16>, vector<512x512xbf16>, vector<8x512xf32> -> vector<8x512xf32>
    %cst_15 = arith.constant dense<0.000000e+00> : vector<512xf32>
    %31 = vector.multi_reduction <add>, %30, %cst_15 [0] : vector<8x512xf32> to vector<512xf32>
    %32 = vector.shape_cast %31 : vector<512xf32> to vector<1x512xf32>
    %cst_16 = arith.constant 8.000000e+00 : f32
    %33 = vector.broadcast %cst_16 : f32 to vector<1x512xf32>
    %34 = arith.divf %32, %33 : vector<1x512xf32>
    %35 = vector.broadcast %34 : vector<1x512xf32> to vector<8x512xf32>
    %36 = arith.subf %30, %35 : vector<8x512xf32>
    %37 = arith.mulf %36, %36 : vector<8x512xf32>
    %cst_17 = arith.constant dense<0.000000e+00> : vector<512xf32>
    %38 = vector.multi_reduction <add>, %37, %cst_17 [0] : vector<8x512xf32> to vector<512xf32>
    %39 = vector.shape_cast %38 : vector<512xf32> to vector<1x512xf32>
    %cst_18 = arith.constant 8.000000e+00 : f32
    %40 = vector.broadcast %cst_18 : f32 to vector<1x512xf32>
    %41 = arith.divf %39, %40 : vector<1x512xf32>
    %c2 = arith.constant 2 : index
    %c0_19 = arith.constant 0 : index
    %42 = vector.load %arg5[%c2, %c0_19] : memref<8x512xf32, #tpu.memory_space<vmem>>, vector<1x512xf32>
    %c3 = arith.constant 3 : index
    %c0_20 = arith.constant 0 : index
    %43 = vector.load %arg5[%c3, %c0_20] : memref<8x512xf32, #tpu.memory_space<vmem>>, vector<1x512xf32>
    %cst_21 = arith.constant 9.99999974E-5 : f32
    %44 = vector.broadcast %cst_21 : f32 to vector<1x512xf32>
    %45 = arith.addf %41, %44 : vector<1x512xf32>
    %46 = math.rsqrt %45 : vector<1x512xf32>
    %47 = arith.mulf %42, %46 : vector<1x512xf32>
    %48 = arith.mulf %34, %47 : vector<1x512xf32>
    %49 = arith.subf %43, %48 : vector<1x512xf32>
    %50 = vector.broadcast %47 : vector<1x512xf32> to vector<8x512xf32>
    %51 = arith.mulf %30, %50 : vector<8x512xf32>
    %52 = vector.broadcast %49 : vector<1x512xf32> to vector<8x512xf32>
    %53 = arith.addf %51, %52 : vector<8x512xf32>
    %cst_22 = arith.constant 0.000000e+00 : f32
    %54 = vector.broadcast %cst_22 : f32 to vector<8x512xf32>
    %55 = arith.maximumf %53, %54 : vector<8x512xf32>
    %56 = arith.truncf %55 : vector<8x512xf32> to vector<8x512xbf16>
    %c0_23 = arith.constant 0 : index
    %c0_24 = arith.constant 0 : index
    %57 = vector.load %arg3[%c0_23, %c0_24] : memref<512x512xbf16, #tpu.memory_space<vmem>>, vector<512x512xbf16>
    %cst_25 = arith.constant dense<0.000000e+00> : vector<8x512xf32>
    %58 = tpu.matmul %56, %57, %cst_25 {dimension_numbers = #tpu.dot_dimension_numbers<[1], [0], [0], [1], [0, 0, 1, 1], [], []>} : vector<8x512xbf16>, vector<512x512xbf16>, vector<8x512xf32> -> vector<8x512xf32>
    %cst_26 = arith.constant dense<0.000000e+00> : vector<512xf32>
    %59 = vector.multi_reduction <add>, %58, %cst_26 [0] : vector<8x512xf32> to vector<512xf32>
    %60 = vector.shape_cast %59 : vector<512xf32> to vector<1x512xf32>
    %cst_27 = arith.constant 8.000000e+00 : f32
    %61 = vector.broadcast %cst_27 : f32 to vector<1x512xf32>
    %62 = arith.divf %60, %61 : vector<1x512xf32>
    %63 = vector.broadcast %62 : vector<1x512xf32> to vector<8x512xf32>
    %64 = arith.subf %58, %63 : vector<8x512xf32>
    %65 = arith.mulf %64, %64 : vector<8x512xf32>
    %cst_28 = arith.constant dense<0.000000e+00> : vector<512xf32>
    %66 = vector.multi_reduction <add>, %65, %cst_28 [0] : vector<8x512xf32> to vector<512xf32>
    %67 = vector.shape_cast %66 : vector<512xf32> to vector<1x512xf32>
    %cst_29 = arith.constant 8.000000e+00 : f32
    %68 = vector.broadcast %cst_29 : f32 to vector<1x512xf32>
    %69 = arith.divf %67, %68 : vector<1x512xf32>
    %c4 = arith.constant 4 : index
    %c0_30 = arith.constant 0 : index
    %70 = vector.load %arg5[%c4, %c0_30] : memref<8x512xf32, #tpu.memory_space<vmem>>, vector<1x512xf32>
    %c5 = arith.constant 5 : index
    %c0_31 = arith.constant 0 : index
    %71 = vector.load %arg5[%c5, %c0_31] : memref<8x512xf32, #tpu.memory_space<vmem>>, vector<1x512xf32>
    %cst_32 = arith.constant 9.99999974E-5 : f32
    %72 = vector.broadcast %cst_32 : f32 to vector<1x512xf32>
    %73 = arith.addf %69, %72 : vector<1x512xf32>
    %74 = math.rsqrt %73 : vector<1x512xf32>
    %75 = arith.mulf %70, %74 : vector<1x512xf32>
    %76 = arith.mulf %62, %75 : vector<1x512xf32>
    %77 = arith.subf %71, %76 : vector<1x512xf32>
    %78 = vector.broadcast %75 : vector<1x512xf32> to vector<8x512xf32>
    %79 = arith.mulf %58, %78 : vector<8x512xf32>
    %80 = vector.broadcast %77 : vector<1x512xf32> to vector<8x512xf32>
    %81 = arith.addf %79, %80 : vector<8x512xf32>
    %cst_33 = arith.constant 0.000000e+00 : f32
    %82 = vector.broadcast %cst_33 : f32 to vector<8x512xf32>
    %83 = arith.maximumf %81, %82 : vector<8x512xf32>
    %84 = arith.truncf %83 : vector<8x512xf32> to vector<8x512xbf16>
    %c0_34 = arith.constant 0 : index
    %c0_35 = arith.constant 0 : index
    %85 = vector.load %arg4[%c0_34, %c0_35] : memref<512x128xbf16, #tpu.memory_space<vmem>>, vector<512x128xbf16>
    %cst_36 = arith.constant dense<0.000000e+00> : vector<8x128xf32>
    %86 = tpu.matmul %84, %85, %cst_36 {dimension_numbers = #tpu.dot_dimension_numbers<[1], [0], [0], [1], [0, 0, 1, 1], [], []>} : vector<8x512xbf16>, vector<512x128xbf16>, vector<8x128xf32> -> vector<8x128xf32>
    %c0_37 = arith.constant 0 : index
    %c0_38 = arith.constant 0 : index
    %87 = vector.load %arg6[%c0_37, %c0_38] : memref<1x128xf32, #tpu.memory_space<vmem>>, vector<1x128xf32>
    %88 = vector.broadcast %87 : vector<1x128xf32> to vector<8x128xf32>
    %89 = arith.addf %86, %88 : vector<8x128xf32>
    %c0_39 = arith.constant 0 : index
    %c0_40 = arith.constant 0 : index
    %90 = vector.load %arg7[%c0_39, %c0_40] : memref<8x128xf32, #tpu.memory_space<vmem>>, vector<8x128xf32>
    tpu.vector_store %arg7[%c0_39, %c0_40], %89 {strides = array<i32>} : memref<8x128xf32, #tpu.memory_space<vmem>>, vector<8x128xf32>,
    return
  }
}

</mosaic_0001>

<bundles_post_ra>
// kernel: mlp4_forward_fused.1
= control target key start
LH: loop header
LB: loop body
LE: loop exit
PB: predicated region body
PF: predicated region fallthrough
CT: control target
= control target key end

     0   :  { %s10625_s0 = inlined_call_operand.vmem [shape: bf16[8,896], index: 0, kind: input, shape index: {}]   ;;  %s10626_s1 = inlined_call_operand.vmem [shape: bf16[896,512], index: 1, kind: input, shape index: {}]   ;;  %s10627_s2 = inlined_call_operand.vmem [shape: bf16[512,512], index: 2, kind: input, shape index: {}]   ;;  %s10628_s3 = inlined_call_operand.vmem [shape: bf16[512,512], index: 3, kind: input, shape index: {}]   ;;  %s10629_s4 = inlined_call_operand.vmem [shape: bf16[512,128], index: 4, kind: input, shape index: {}]   ;;  %s10630_s5 = inlined_call_operand.vmem [shape: f32[8,512], index: 5, kind: input, shape index: {}]   ;;  %s10631_s6 = inlined_call_operand.vmem [shape: f32[1,128], index: 6, kind: input, shape index: {}]   ;;  %s10632_s7 = inlined_call_operand.hbm [shape: f32[8,128], index: 7, kind: output, shape index: {}]  }
   0x1   :  { %v4690_v0 = vld [vmem:[%s10626_s1 + $0xe0] sm:$0xf]  ;;  %v6659_v1 = vld [vmem:[%s10626_s1 + $0xec] sm:$0xf0] }
   0x2   :  { %v4818_v2 = vld [vmem:[%s10626_s1 + $0x1e0] sm:$0xf]  ;;  %v4691_v3 = vor.u32 %v6659_v1, %v4690_v0  ;;  %v6691_v4 = vld [vmem:[%s10626_s1 + $0x1ec] sm:$0xf0] }
   0x3   :  { %v4946_v5 = vld [vmem:[%s10626_s1 + $0x2e0] sm:$0xf]  ;;  %v6723_v6 = vld [vmem:[%s10626_s1 + $0x2ec] sm:$0xf0]  ;;  %v4819_v7 = vor.u32 %v6691_v4, %v4818_v2 }
   0x4   :  { %v4947_v8 = vor.u32 %v6723_v6, %v4946_v5  ;;  %v5074_v9 = vld [vmem:[%s10626_s1 + $0x3e0] sm:$0xf]  ;;  %v6755_v10 = vld [vmem:[%s10626_s1 + $0x3ec] sm:$0xf0]  ;;  %1400 = vmatpush.bf16.msra.mxu0 %v4691_v3 }
   0x5   :  { %v4674_v11 = vld [vmem:[%s10626_s1 + $0xc0] sm:$0xf]  ;;  %v5075_v12 = vor.u32 %v6755_v10, %v5074_v9  ;;  %v6655_v13 = vld [vmem:[%s10626_s1 + $0xcc] sm:$0xf0]  ;;  %1413 = vmatpush.bf16.msra.mxu1 %v4819_v7 }
   0x6   :  { %v4802_v14 = vld [vmem:[%s10626_s1 + $0x1c0] sm:$0xf]  ;;  %v6687_v15 = vld [vmem:[%s10626_s1 + $0x1cc] sm:$0xf0]  ;;  %1426 = vmatpush.bf16.msra.mxu2 %v4947_v8  ;;  %v4675_v16 = vor.u32 %v6655_v13, %v4674_v11 }
   0x7   :  { %v4803_v17 = vor.u32 %v6687_v15, %v4802_v14  ;;  %v4930_v18 = vld [vmem:[%s10626_s1 + $0x2c0] sm:$0xf]  ;;  %v6719_v19 = vld [vmem:[%s10626_s1 + $0x2cc] sm:$0xf0]  ;;  %1439 = vmatpush.bf16.msra.mxu3 %v5075_v12 }
   0x8   :  { %v5058_v20 = vld [vmem:[%s10626_s1 + $0x3c0] sm:$0xf]  ;;  %v4931_v21 = vor.u32 %v6719_v19, %v4930_v18  ;;  %v6751_v22 = vld [vmem:[%s10626_s1 + $0x3cc] sm:$0xf0]  ;;  %1401 = vmatpush.bf16.msra.mxu0 %v4675_v16 }
   0x9   :  { %v4658_v23 = vld [vmem:[%s10626_s1 + $0xa0] sm:$0xf]  ;;  %v6651_v24 = vld [vmem:[%s10626_s1 + $0xac] sm:$0xf0]  ;;  %v5059_v25 = vor.u32 %v6751_v22, %v5058_v20  ;;  %1414 = vmatpush.bf16.msra.mxu1 %v4803_v17 }
   0xa   :  { %v4786_v26 = vld [vmem:[%s10626_s1 + $0x1a0] sm:$0xf]  ;;  %v6683_v27 = vld [vmem:[%s10626_s1 + $0x1ac] sm:$0xf0]  ;;  %v4659_v29 = vor.u32 %v6651_v24, %v4658_v23  ;;  %1427 = vmatpush.bf16.msra.mxu2 %v4931_v21 }
   0xb   :  { %v4914_v28 = vld [vmem:[%s10626_s1 + $0x2a0] sm:$0xf]  ;;  %v6715_v30 = vld [vmem:[%s10626_s1 + $0x2ac] sm:$0xf0]  ;;  %v4787_v33 = vor.u32 %v6683_v27, %v4786_v26  ;;  %1440 = vmatpush.bf16.msra.mxu3 %v5059_v25 }
   0xc   :  { %v5042_v31 = vld [vmem:[%s10626_s1 + $0x3a0] sm:$0xf]  ;;  %v6747_v32 = vld [vmem:[%s10626_s1 + $0x3ac] sm:$0xf0]  ;;  %v4915_v34 = vor.u32 %v6715_v30, %v4914_v28  ;;  %1402 = vmatpush.bf16.msra.mxu0 %v4659_v29 }
   0xd   :  { %v4642_v35 = vld [vmem:[%s10626_s1 + $0x80] sm:$0xf]  ;;  %v6647_v36 = vld [vmem:[%s10626_s1 + $0x8c] sm:$0xf0]  ;;  %v5043_v38 = vor.u32 %v6747_v32, %v5042_v31  ;;  %1415 = vmatpush.bf16.msra.mxu1 %v4787_v33 }
   0xe   :  { %v4770_v37 = vld [vmem:[%s10626_s1 + $0x180] sm:$0xf]  ;;  %v6679_v39 = vld [vmem:[%s10626_s1 + $0x18c] sm:$0xf0]  ;;  %v4643_v44 = vor.u32 %v6647_v36, %v4642_v35  ;;  %1428 = vmatpush.bf16.msra.mxu2 %v4915_v34 }
   0xf   :  { %v4898_v40 = vld [vmem:[%s10626_s1 + $0x280] sm:$0xf]  ;;  %v6711_v41 = vld [vmem:[%s10626_s1 + $0x28c] sm:$0xf0]  ;;  %v4771_v45 = vor.u32 %v6679_v39, %v4770_v37  ;;  %1441 = vmatpush.bf16.msra.mxu3 %v5043_v38  ;;  %v6657_v37 = vld [vmem:[%s10626_s1 + $0xe4] sm:$0xf] }
  0x10   :  { %v5026_v42 = vld [vmem:[%s10626_s1 + $0x380] sm:$0xf]  ;;  %v6743_v43 = vld [vmem:[%s10626_s1 + $0x38c] sm:$0xf0]  ;;  %v4899_v46 = vor.u32 %v6711_v41, %v4898_v40  ;;  %1403 = vmatpush.bf16.msra.mxu0 %v4643_v44  ;;  %v4692_v38 = vld [vmem:[%s10626_s1 + $0xf0] sm:$0xf0] }
  0x11   :  { %v4626_v47 = vld [vmem:[%s10626_s1 + $0x60] sm:$0xf]  ;;  %v6643_v48 = vld [vmem:[%s10626_s1 + $0x6c] sm:$0xf0]  ;;  %v5027_v50 = vor.u32 %v6743_v43, %v5026_v42  ;;  %1416 = vmatpush.bf16.msra.mxu1 %v4771_v45 }
  0x12   :  { %v4754_v49 = vld [vmem:[%s10626_s1 + $0x160] sm:$0xf]  ;;  %v6675_v51 = vld [vmem:[%s10626_s1 + $0x16c] sm:$0xf0]  ;;  %v4627_v56 = vor.u32 %v6643_v48, %v4626_v47  ;;  %1429 = vmatpush.bf16.msra.mxu2 %v4899_v46  ;;  %v4695_v46 = vor.u32 %v6657_v37, %v4692_v38 }
  0x13   :  { %v4882_v52 = vld [vmem:[%s10626_s1 + $0x260] sm:$0xf]  ;;  %v6707_v53 = vld [vmem:[%s10626_s1 + $0x26c] sm:$0xf0]  ;;  %v4755_v57 = vor.u32 %v6675_v51, %v4754_v49  ;;  %1442 = vmatpush.bf16.msra.mxu3 %v5027_v50  ;;  %v6653_v50 = vld [vmem:[%s10626_s1 + $0xc4] sm:$0xf] }
  0x14   :  { %v5010_v54 = vld [vmem:[%s10626_s1 + $0x360] sm:$0xf]  ;;  %v6739_v55 = vld [vmem:[%s10626_s1 + $0x36c] sm:$0xf0]  ;;  %v4883_v58 = vor.u32 %v6707_v53, %v4882_v52  ;;  %1404 = vmatpush.bf16.msra.mxu0 %v4627_v56  ;;  %v4676_v51 = vld [vmem:[%s10626_s1 + $0xd0] sm:$0xf0] }
  0x15   :  { %v4610_v59 = vld [vmem:[%s10626_s1 + $0x40] sm:$0xf]  ;;  %v6639_v60 = vld [vmem:[%s10626_s1 + $0x4c] sm:$0xf0]  ;;  %v5011_v62 = vor.u32 %v6739_v55, %v5010_v54  ;;  %1417 = vmatpush.bf16.msra.mxu1 %v4755_v57  ;;  %v28_v52 = vld [vmem:[%s10625_s0 + $0x8] sm:$0xff] }
  0x16   :  { %v4738_v61 = vld [vmem:[%s10626_s1 + $0x140] sm:$0xf]  ;;  %v6671_v63 = vld [vmem:[%s10626_s1 + $0x14c] sm:$0xf0]  ;;  %v4611_v4 = vor.u32 %v6639_v60, %v4610_v59  ;;  %1430 = vmatpush.bf16.msra.mxu2 %v4883_v58  ;;  %v261_v55 = vunpack.c.l.b16 %v28_v52  ;;  %v262_v56 = vunpack.c.h.b16 %v28_v52 }
  0x17   :  { %v4866_v0 = vld [vmem:[%s10626_s1 + $0x240] sm:$0xf]  ;;  %v6703_v1 = vld [vmem:[%s10626_s1 + $0x24c] sm:$0xf0]  ;;  %v4739_v5 = vor.u32 %v6671_v63, %v4738_v61  ;;  %1443 = vmatpush.bf16.msra.mxu3 %v5011_v62  ;;  %v4679_v62 = vor.u32 %v6653_v50, %v4676_v51 }
  0x18   :  { %v4994_v2 = vld [vmem:[%s10626_s1 + $0x340] sm:$0xf]  ;;  %v6735_v3 = vld [vmem:[%s10626_s1 + $0x34c] sm:$0xf0]  ;;  %v4867_v6 = vor.u32 %v6703_v1, %v4866_v0  ;;  %1405 = vmatpush.bf16.msra.mxu0 %v4611_v4  ;;  %v7499_v1 = vpack.c.b16 %v261_v55, %v261_v55  ;;  %v4660_v4 = vld [vmem:[%s10626_s1 + $0xb0] sm:$0xf0] }
  0x19   :  { %v4594_v7 = vld [vmem:[%s10626_s1 + $0x20] sm:$0xf]  ;;  %v6635_v8 = vld [vmem:[%s10626_s1 + $0x2c] sm:$0xf0]  ;;  %v4995_v10 = vor.u32 %v6735_v3, %v4994_v2  ;;  %1418 = vmatpush.bf16.msra.mxu1 %v4739_v5  ;;  %v6649_v3 = vld [vmem:[%s10626_s1 + $0xa4] sm:$0xf] }
  0x1a   :  { %v4722_v9 = vld [vmem:[%s10626_s1 + $0x120] sm:$0xf]  ;;  %v6667_v11 = vld [vmem:[%s10626_s1 + $0x12c] sm:$0xf0]  ;;  %v4595_v16 = vor.u32 %v6635_v8, %v4594_v7  ;;  %1431 = vmatpush.bf16.msra.mxu2 %v4867_v6 }
  0x1b   :  { %v4850_v12 = vld [vmem:[%s10626_s1 + $0x220] sm:$0xf]  ;;  %v6699_v13 = vld [vmem:[%s10626_s1 + $0x22c] sm:$0xf0]  ;;  %v4723_v19 = vor.u32 %v6667_v11, %v4722_v9  ;;  %1444 = vmatpush.bf16.msra.mxu3 %v4995_v10  ;;  %v7511_v9 = vpack.c.b16 %v262_v56, %v262_v56  ;;  %v6633_v56 = vld [vmem:[%s10626_s1 + $0x24] sm:$0xf] }
  0x1c   :  { %v4978_v14 = vld [vmem:[%s10626_s1 + $0x320] sm:$0xf]  ;;  %v6731_v15 = vld [vmem:[%s10626_s1 + $0x32c] sm:$0xf0]  ;;  %v4851_v20 = vor.u32 %v6699_v13, %v4850_v12  ;;  %1406 = vmatpush.bf16.msra.mxu0 %v4595_v16  ;;  %v4663_v16 = vor.u32 %v6649_v3, %v4660_v4  ;;  %v30_v4 = vld [vmem:[%s10625_s0 + $0x18] sm:$0xf] }
  0x1d   :  { %v4578_v17 = vld [vmem:[%s10626_s1] sm:$0xf]  ;;  %v6631_v18 = vld [vmem:[%s10626_s1 + $0xc] sm:$0xf0]  ;;  %v4979_v24 = vor.u32 %v6731_v15, %v4978_v14  ;;  %1419 = vmatpush.bf16.msra.mxu1 %v4723_v19 }
  0x1e   :  { %v4706_v21 = vld [vmem:[%s10626_s1 + $0x100] sm:$0xf]  ;;  %v6663_v22 = vld [vmem:[%s10626_s1 + $0x10c] sm:$0xf0]  ;;  %v4579_v31 = vor.u32 %v6631_v18, %v4578_v17  ;;  %1432 = vmatpush.bf16.msra.mxu2 %v4851_v20  ;;  %v6645_v20 = vld [vmem:[%s10626_s1 + $0x84] sm:$0xf] }
  0x1f   :  { %v4834_v23 = vld [vmem:[%s10626_s1 + $0x200] sm:$0xf]  ;;  %v6695_v25 = vld [vmem:[%s10626_s1 + $0x20c] sm:$0xf0]  ;;  %v4707_v35 = vor.u32 %v6663_v22, %v4706_v21  ;;  %1445 = vmatpush.bf16.msra.mxu3 %v4979_v24  ;;  %v4644_v21 = vld [vmem:[%s10626_s1 + $0x90] sm:$0xf0] }
  0x20   :  { %v4962_v26 = vld [vmem:[%s10626_s1 + $0x300] sm:$0xf]  ;;  %v6727_v27 = vld [vmem:[%s10626_s1 + $0x30c] sm:$0xf0]  ;;  %v4835_v36 = vor.u32 %v6695_v25, %v4834_v23  ;;  %1407 = vmatpush.bf16.msra.mxu0 %v4579_v31 }
  0x21   :  { %v5202_v28 = vld [vmem:[%s10626_s1 + $0x4e0] sm:$0xf]  ;;  %v6787_v29 = vld [vmem:[%s10626_s1 + $0x4ec] sm:$0xf0]  ;;  %v4963_v39 = vor.u32 %v6727_v27, %v4962_v26  ;;  %1420 = vmatpush.bf16.msra.mxu1 %v4707_v35 }
  0x22   :  { %v5330_v30 = vld [vmem:[%s10626_s1 + $0x5e0] sm:$0xf]  ;;  %v6819_v32 = vld [vmem:[%s10626_s1 + $0x5ec] sm:$0xf0]  ;;  %v5203_v40 = vor.u32 %v6787_v29, %v5202_v28  ;;  %1433 = vmatpush.bf16.msra.mxu2 %v4835_v36  ;;  %v4647_v28 = vor.u32 %v6645_v20, %v4644_v21 }
  0x23   :  { %v5458_v33 = vld [vmem:[%s10626_s1 + $0x6e0] sm:$0xf]  ;;  %v6851_v34 = vld [vmem:[%s10626_s1 + $0x6ec] sm:$0xf0]  ;;  %v5331_v41 = vor.u32 %v6819_v32, %v5330_v30  ;;  %1446 = vmatpush.bf16.msra.mxu3 %v4963_v39  ;;  %v6641_v32 = vld [vmem:[%s10626_s1 + $0x64] sm:$0xf] }
  0x24   :  { %v5459_v42 = vor.u32 %v6851_v34, %v5458_v33  ;;  %v5186_v43 = vld [vmem:[%s10626_s1 + $0x4c0] sm:$0xf]  ;;  %v6783_v44 = vld [vmem:[%s10626_s1 + $0x4cc] sm:$0xf0]  ;;  %1452 = vmatpush.bf16.msrb.mxu0 %v5203_v40  ;;  %v4628_v33 = vld [vmem:[%s10626_s1 + $0x70] sm:$0xf0] }
  0x25   :  { %v5314_v45 = vld [vmem:[%s10626_s1 + $0x5c0] sm:$0xf]  ;;  %v6815_v47 = vld [vmem:[%s10626_s1 + $0x5cc] sm:$0xf0]  ;;  %v5187_v53 = vor.u32 %v6783_v44, %v5186_v43  ;;  %1465 = vmatpush.bf16.msrb.mxu1 %v5331_v41  ;;  %1434 = vmatmul.bf16.vlgmr.msra.gmra.mxu2 %v7499_v1  ;;  %v4631_v40 = vor.u32 %v6641_v32, %v4628_v33  ;;  %v6637_v44 = vld [vmem:[%s10626_s1 + $0x44] sm:$0xf] }
  0x26   :  { %v5442_v48 = vld [vmem:[%s10626_s1 + $0x6c0] sm:$0xf]  ;;  %v6847_v49 = vld [vmem:[%s10626_s1 + $0x6cc] sm:$0xf0]  ;;  %1478 = vmatpush.bf16.msrb.mxu2 %v5459_v42  ;;  %v5315_v57 = vor.u32 %v6815_v47, %v5314_v45  ;;  %1447 = vmatmul.bf16.vlgmr.msra.gmra.mxu3 %v7511_v9  ;;  %v4612_v45 = vld [vmem:[%s10626_s1 + $0x50] sm:$0xf0] }
  0x27   :  { %v5170_v54 = vld [vmem:[%s10626_s1 + $0x4a0] sm:$0xf]  ;;  %v5443_v58 = vor.u32 %v6847_v49, %v5442_v48  ;;  %v6779_v59 = vld [vmem:[%s10626_s1 + $0x4ac] sm:$0xf0]  ;;  %1491 = vmatpush.bf16.msrb.mxu3 %v4695_v46  ;;  %v4615_v52 = vor.u32 %v6637_v44, %v4612_v45  ;;  %v6717_v32 = vld [vmem:[%s10626_s1 + $0x2c4] sm:$0xf] }
  0x28   :  { %v5298_v60 = vld [vmem:[%s10626_s1 + $0x5a0] sm:$0xf]  ;;  %v6811_v61 = vld [vmem:[%s10626_s1 + $0x5ac] sm:$0xf0]  ;;  %1453 = vmatpush.bf16.msrb.mxu0 %v5187_v53  ;;  %v5171_v7 = vor.u32 %v6779_v59, %v5170_v54  ;;  %v6681_v45 = vld [vmem:[%s10626_s1 + $0x1a4] sm:$0xf] }
  0x29   :  { %v5426_v63 = vld [vmem:[%s10626_s1 + $0x6a0] sm:$0xf]  ;;  %v6843_v0 = vld [vmem:[%s10626_s1 + $0x6ac] sm:$0xf0]  ;;  %v5299_v8 = vor.u32 %v6811_v61, %v5298_v60  ;;  %1466 = vmatpush.bf16.msrb.mxu1 %v5315_v57  ;;  %v4596_v57 = vld [vmem:[%s10626_s1 + $0x30] sm:$0xf0] }
  0x2a   :  { %v27_v2 = vld [vmem:[%s10625_s0] sm:$0xff]  ;;  %1479 = vmatpush.bf16.msrb.mxu2 %v5443_v58  ;;  %v5427_v10 = vor.u32 %v6843_v0, %v5426_v63  ;;  %v6775_v12 = vld [vmem:[%s10626_s1 + $0x48c] sm:$0xf0] }
  0x2b   :  { %v259_v5 = vunpack.c.l.b16 %v27_v2  ;;  %v260_v6 = vunpack.c.h.b16 %v27_v2  ;;  %v5154_v11 = vld [vmem:[%s10626_s1 + $0x480] sm:$0xf]  ;;  %1492 = vmatpush.bf16.msrb.mxu3 %v4679_v62  ;;  %v6807_v17 = vld [vmem:[%s10626_s1 + $0x58c] sm:$0xf0] }
  0x2c   :  { %v5282_v13 = vld [vmem:[%s10626_s1 + $0x580] sm:$0xf]  ;;  %v6839_v19 = vld [vmem:[%s10626_s1 + $0x68c] sm:$0xf0]  ;;  %1454 = vmatpush.bf16.msrb.mxu0 %v5171_v7  ;;  %v5155_v22 = vor.u32 %v6775_v12, %v5154_v11  ;;  %v4580_v7 = vld [vmem:[%s10626_s1 + $0x10] sm:$0xf0] }
  0x2d   :  { %v7522_v14 = vpack.c.b16 %v259_v5, %v259_v5  ;;  %v7524_v15 = vpack.c.b16 %v260_v6, %v260_v6  ;;  %v5410_v18 = vld [vmem:[%s10626_s1 + $0x680] sm:$0xf]  ;;  %1467 = vmatpush.bf16.msrb.mxu1 %v5299_v8  ;;  %v5283_v23 = vor.u32 %v6807_v17, %v5282_v13  ;;  %v6771_v26 = vld [vmem:[%s10626_s1 + $0x46c] sm:$0xf0]  ;;  %v4599_v5 = vor.u32 %v6633_v56, %v4596_v57  ;;  %v6629_v6 = vld [vmem:[%s10626_s1 + $0x4] sm:$0xf] }
  0x2e   :  { %1480 = vmatpush.bf16.msrb.mxu2 %v5427_v10  ;;  %v5411_v24 = vor.u32 %v6839_v19, %v5410_v18  ;;  %v5138_v25 = vld [vmem:[%s10626_s1 + $0x460] sm:$0xf]  ;;  %v6803_v29 = vld [vmem:[%s10626_s1 + $0x56c] sm:$0xf0]  ;;  %v6689_v10 = vld [vmem:[%s10626_s1 + $0x1e4] sm:$0xf]  ;;  %v265_v19 = vunpack.c.l.b16 %v30_v4 }
  0x2f   :  { %1408 = vmatmul.bf16.vlgmr.msra.gmra.mxu0 %v7522_v14  ;;  %1421 = vmatmul.bf16.vlgmr.msra.gmra.mxu1 %v7524_v15  ;;  %v5266_v27 = vld [vmem:[%s10626_s1 + $0x560] sm:$0xf]  ;;  %v6835_v31 = vld [vmem:[%s10626_s1 + $0x66c] sm:$0xf0]  ;;  %v5139_v34 = vor.u32 %v6771_v26, %v5138_v25  ;;  %v4820_v11 = vld [vmem:[%s10626_s1 + $0x1f0] sm:$0xf0]  ;;  %v4583_v26 = vor.u32 %v6629_v6, %v4580_v7 }
  0x30   :  { %1493 = vmatpush.bf16.msrb.mxu3 %v4663_v16  ;;  %v5394_v30 = vld [vmem:[%s10626_s1 + $0x660] sm:$0xf]  ;;  %1455 = vmatpush.bf16.msrb.mxu0 %v5155_v22  ;;  %v5267_v35 = vor.u32 %v6803_v29, %v5266_v27  ;;  %v6767_v38 = vld [vmem:[%s10626_s1 + $0x44c] sm:$0xf0]  ;;  %v6721_v12 = vld [vmem:[%s10626_s1 + $0x2e4] sm:$0xf]  ;;  %v4823_v27 = vor.u32 %v6689_v10, %v4820_v11 }
  0x31   :  { %1468 = vmatpush.bf16.msrb.mxu1 %v5283_v23  ;;  %v5395_v36 = vor.u32 %v6835_v31, %v5394_v30  ;;  %v5122_v37 = vld [vmem:[%s10626_s1 + $0x440] sm:$0xf]  ;;  %v6799_v41 = vld [vmem:[%s10626_s1 + $0x54c] sm:$0xf0]  ;;  %v4948_v16 = vld [vmem:[%s10626_s1 + $0x2f0] sm:$0xf0] }
  0x32   :  { %1481 = vmatpush.bf16.msrb.mxu2 %v5411_v24  ;;  %v5250_v39 = vld [vmem:[%s10626_s1 + $0x540] sm:$0xf]  ;;  %v6831_v43 = vld [vmem:[%s10626_s1 + $0x64c] sm:$0xf0]  ;;  %v5123_v46 = vor.u32 %v6767_v38, %v5122_v37  ;;  %v6753_v17 = vld [vmem:[%s10626_s1 + $0x3e4] sm:$0xf] }
  0x33   :  { %v5378_v42 = vld [vmem:[%s10626_s1 + $0x640] sm:$0xf]  ;;  %v5251_v47 = vor.u32 %v6799_v41, %v5250_v39  ;;  %v6763_v50 = vld [vmem:[%s10626_s1 + $0x42c] sm:$0xf0]  ;;  %v5076_v18 = vld [vmem:[%s10626_s1 + $0x3f0] sm:$0xf0] }
  0x34   :  { %1494 = vmatpush.bf16.msrb.mxu3 %v4647_v28  ;;  %1456 = vmatpush.bf16.msrb.mxu0 %v5139_v34  ;;  %v5379_v48 = vor.u32 %v6831_v43, %v5378_v42  ;;  %v5106_v49 = vld [vmem:[%s10626_s1 + $0x420] sm:$0xf]  ;;  %v6795_v53 = vld [vmem:[%s10626_s1 + $0x52c] sm:$0xf0]  ;;  %v6785_v22 = vld [vmem:[%s10626_s1 + $0x4e4] sm:$0xf]  ;;  %v4951_v28 = vor.u32 %v6721_v12, %v4948_v16  ;;  %v5079_v29 = vor.u32 %v6753_v17, %v5076_v18 }
  0x35   :  { %1469 = vmatpush.bf16.msrb.mxu1 %v5267_v35  ;;  %v5234_v51 = vld [vmem:[%s10626_s1 + $0x520] sm:$0xf]  ;;  %v6827_v55 = vld [vmem:[%s10626_s1 + $0x62c] sm:$0xf0]  ;;  %v5107_v59 = vor.u32 %v6763_v50, %v5106_v49  ;;  %v5204_v23 = vld [vmem:[%s10626_s1 + $0x4f0] sm:$0xf0]  ;;  %v7679_v34 = vpack.c.b16 %v265_v19, %v265_v19 }
  0x36   :  { %1482 = vmatpush.bf16.msrb.mxu2 %v5395_v36  ;;  %v5362_v54 = vld [vmem:[%s10626_s1 + $0x620] sm:$0xf]  ;;  %v6759_v60 = vld [vmem:[%s10626_s1 + $0x40c] sm:$0xf0]  ;;  %v5235_v63 = vor.u32 %v6795_v53, %v5234_v51  ;;  %v6685_v30 = vld [vmem:[%s10626_s1 + $0x1c4] sm:$0xf]  ;;  %v5207_v33 = vor.u32 %v6785_v22, %v5204_v23 }
  0x37   :  { %v5090_v58 = vld [vmem:[%s10626_s1 + $0x400] sm:$0xf]  ;;  %v6791_v62 = vld [vmem:[%s10626_s1 + $0x50c] sm:$0xf0]  ;;  %v5363_v0 = vor.u32 %v6827_v55, %v5362_v54  ;;  %v4804_v31 = vld [vmem:[%s10626_s1 + $0x1d0] sm:$0xf0] }
  0x38   :  { %1495 = vmatpush.bf16.msrb.mxu3 %v4631_v40  ;;  %1457 = vmatpush.bf16.msrb.mxu0 %v5123_v46  ;;  %v5218_v61 = vld [vmem:[%s10626_s1 + $0x500] sm:$0xf]  ;;  %v6823_v3 = vld [vmem:[%s10626_s1 + $0x60c] sm:$0xf0]  ;;  %v5091_v13 = vor.u32 %v6759_v60, %v5090_v58  ;;  %v4932_v35 = vld [vmem:[%s10626_s1 + $0x2d0] sm:$0xf0]  ;;  %v4807_v42 = vor.u32 %v6685_v30, %v4804_v31 }
  0x39   :  { %1470 = vmatpush.bf16.msrb.mxu1 %v5251_v47  ;;  %v5346_v2 = vld [vmem:[%s10626_s1 + $0x600] sm:$0xf]  ;;  %v29_v8 = vld [vmem:[%s10625_s0 + $0x10] sm:$0xff]  ;;  %v5219_v20 = vor.u32 %v6791_v62, %v5218_v61  ;;  %v6749_v36 = vld [vmem:[%s10626_s1 + $0x3c4] sm:$0xf]  ;;  %v4935_v43 = vor.u32 %v6717_v32, %v4932_v35 }
  0x3a   :  { %1483 = vmatpush.bf16.msrb.mxu2 %v5379_v48  ;;  %v5347_v21 = vor.u32 %v6823_v3, %v5346_v2  ;;  %v263_v24 = vunpack.c.l.b16 %v29_v8  ;;  %v264_v25 = vunpack.c.h.b16 %v29_v8  ;;  %v5060_v37 = vld [vmem:[%s10626_s1 + $0x3d0] sm:$0xf0]  ;;  %v6781_v39 = vld [vmem:[%s10626_s1 + $0x4c4] sm:$0xf] }
  0x3b   :  { %v5188_v40 = vld [vmem:[%s10626_s1 + $0x4d0] sm:$0xf0]  ;;  %v5063_v44 = vor.u32 %v6749_v36, %v5060_v37  ;;  %v6713_v47 = vld [vmem:[%s10626_s1 + $0x2a4] sm:$0xf] }
  0x3c   :  { %1496 = vmatpush.bf16.msrb.mxu3 %v4615_v52  ;;  %1458 = vmatpush.bf16.msrb.mxu0 %v5107_v59  ;;  %v7690_v38 = vpack.c.b16 %v263_v24, %v263_v24  ;;  %v7698_v41 = vpack.c.b16 %v264_v25, %v264_v25  ;;  %v4788_v46 = vld [vmem:[%s10626_s1 + $0x1b0] sm:$0xf0]  ;;  %v5191_v48 = vor.u32 %v6781_v39, %v5188_v40  ;;  %v6745_v50 = vld [vmem:[%s10626_s1 + $0x3a4] sm:$0xf] }
  0x3d   :  { %1471 = vmatpush.bf16.msrb.mxu1 %v5235_v63  ;;  %v4916_v49 = vld [vmem:[%s10626_s1 + $0x2b0] sm:$0xf0]  ;;  %v6777_v52 = vld [vmem:[%s10626_s1 + $0x4a4] sm:$0xf]  ;;  %v4791_v54 = vor.u32 %v6681_v45, %v4788_v46 }
  0x3e   :  { %1484 = vmatpush.bf16.msrb.mxu2 %v5363_v0  ;;  %v5044_v51 = vld [vmem:[%s10626_s1 + $0x3b0] sm:$0xf0]  ;;  %v4919_v55 = vor.u32 %v6713_v47, %v4916_v49  ;;  %v6677_v57 = vld [vmem:[%s10626_s1 + $0x184] sm:$0xf] }
  0x3f   :  { %v5172_v53 = vld [vmem:[%s10626_s1 + $0x4b0] sm:$0xf0]  ;;  %v5047_v56 = vor.u32 %v6745_v50, %v5044_v51  ;;  %v6709_v59 = vld [vmem:[%s10626_s1 + $0x284] sm:$0xf] }
  0x40   :  { %1497 = vmatpush.bf16.msrb.mxu3 %v4599_v5  ;;  %1459 = vmatpush.bf16.msrb.mxu0 %v5091_v13  ;;  %v4772_v58 = vld [vmem:[%s10626_s1 + $0x190] sm:$0xf0]  ;;  %v5175_v60 = vor.u32 %v6777_v52, %v5172_v53  ;;  %v6741_v62 = vld [vmem:[%s10626_s1 + $0x384] sm:$0xf] }
  0x41   :  { %1472 = vmatpush.bf16.msrb.mxu1 %v5219_v20  ;;  %v4900_v61 = vld [vmem:[%s10626_s1 + $0x290] sm:$0xf0]  ;;  %v6773_v0 = vld [vmem:[%s10626_s1 + $0x484] sm:$0xf]  ;;  %v4775_v3 = vor.u32 %v6677_v57, %v4772_v58 }
  0x42   :  { %1485 = vmatpush.bf16.msrb.mxu2 %v5347_v21  ;;  %v5028_v63 = vld [vmem:[%s10626_s1 + $0x390] sm:$0xf0]  ;;  %v4903_v4 = vor.u32 %v6709_v59, %v4900_v61  ;;  %v6673_v6 = vld [vmem:[%s10626_s1 + $0x164] sm:$0xf] }
  0x43   :  { %1460 = vmatmul.bf16.vlgmr.msrb.gmra.mxu0 %v7690_v38  ;;  %v5156_v2 = vld [vmem:[%s10626_s1 + $0x490] sm:$0xf0]  ;;  %v5031_v5 = vor.u32 %v6741_v62, %v5028_v63  ;;  %v6705_v8 = vld [vmem:[%s10626_s1 + $0x264] sm:$0xf] }
  0x44   :  { %1498 = vmatpush.bf16.msrb.mxu3 %v4583_v26  ;;  %1504 = vmatpush.bf16.msra.mxu0 %v4823_v27  ;;  %v4756_v7 = vld [vmem:[%s10626_s1 + $0x170] sm:$0xf0]  ;;  %v5159_v10 = vor.u32 %v6773_v0, %v5156_v2  ;;  %v6737_v12 = vld [vmem:[%s10626_s1 + $0x364] sm:$0xf] }
  0x45   :  { %1517 = vmatpush.bf16.msra.mxu1 %v4951_v28  ;;  %1486 = vmatmul.bf16.vlgmr.msrb.gmra.mxu2 %v7679_v34  ;;  %v4884_v11 = vld [vmem:[%s10626_s1 + $0x270] sm:$0xf0]  ;;  %v6769_v16 = vld [vmem:[%s10626_s1 + $0x464] sm:$0xf]  ;;  %v4759_v18 = vor.u32 %v6673_v6, %v4756_v7 }
  0x46   :  { %1530 = vmatpush.bf16.msra.mxu2 %v5079_v29  ;;  %1473 = vmatmul.bf16.vlgmr.msrb.gmra.mxu1 %v7698_v41  ;;  %v5012_v13 = vld [vmem:[%s10626_s1 + $0x370] sm:$0xf0]  ;;  %v4887_v19 = vor.u32 %v6705_v8, %v4884_v11  ;;  %v6669_v21 = vld [vmem:[%s10626_s1 + $0x144] sm:$0xf] }
  0x47   :  { %1499 = vmatmul.bf16.vlgmr.msrb.gmra.mxu3 %v7522_v14  ;;  %v5140_v17 = vld [vmem:[%s10626_s1 + $0x470] sm:$0xf0]  ;;  %v5015_v20 = vor.u32 %v6737_v12, %v5012_v13  ;;  %v6701_v23 = vld [vmem:[%s10626_s1 + $0x244] sm:$0xf] }
  0x48   :  { %1543 = vmatpush.bf16.msra.mxu3 %v5207_v33  ;;  %1505 = vmatpush.bf16.msra.mxu0 %v4807_v42  ;;  %v4740_v22 = vld [vmem:[%s10626_s1 + $0x150] sm:$0xf0]  ;;  %v5143_v24 = vor.u32 %v6769_v16, %v5140_v17  ;;  %v6733_v26 = vld [vmem:[%s10626_s1 + $0x344] sm:$0xf] }
  0x49   :  { %1518 = vmatpush.bf16.msra.mxu1 %v4935_v43  ;;  %v4868_v25 = vld [vmem:[%s10626_s1 + $0x250] sm:$0xf0]  ;;  %v6765_v28 = vld [vmem:[%s10626_s1 + $0x444] sm:$0xf]  ;;  %v4743_v30 = vor.u32 %v6669_v21, %v4740_v22 }
  0x4a   :  { %1531 = vmatpush.bf16.msra.mxu2 %v5063_v44  ;;  %v4996_v27 = vld [vmem:[%s10626_s1 + $0x350] sm:$0xf0] }
  0x4b   :  { %v5124_v29 = vld [vmem:[%s10626_s1 + $0x450] sm:$0xf0] }
  0x4c   :  { %1544 = vmatpush.bf16.msra.mxu3 %v5191_v48  ;;  %1506 = vmatpush.bf16.msra.mxu0 %v4791_v54 }
  0x4d   :  { %1519 = vmatpush.bf16.msra.mxu1 %v4919_v55 }
  0x4e   :  { %1532 = vmatpush.bf16.msra.mxu2 %v5047_v56 }
  0x50   :  { %1545 = vmatpush.bf16.msra.mxu3 %v5175_v60  ;;  %1507 = vmatpush.bf16.msra.mxu0 %v4775_v3 }
  0x51   :  { %1520 = vmatpush.bf16.msra.mxu1 %v4903_v4 }
  0x52   :  { %1533 = vmatpush.bf16.msra.mxu2 %v5031_v5 }
  0x54   :  { %1546 = vmatpush.bf16.msra.mxu3 %v5159_v10  ;;  %1508 = vmatpush.bf16.msra.mxu0 %v4759_v18 }
  0x55   :  { %12 = vsyncpa [#allocation3], 0  ;;  %1521 = vmatpush.bf16.msra.mxu1 %v4887_v19  ;;  %v4871_v31 = vor.u32 %v6701_v23, %v4868_v25  ;;  %v4999_v32 = vor.u32 %v6733_v26, %v4996_v27  ;;  %v6665_v33 = vld [vmem:[%s10626_s1 + $0x124] sm:$0xf]  ;;  %v4724_v35 = vld [vmem:[%s10626_s1 + $0x130] sm:$0xf0]  ;;  %v5127_v37 = vor.u32 %v6765_v28, %v5124_v29 }
  0x56   :  { %1534 = vmatpush.bf16.msra.mxu2 %v5015_v20  ;;  %v6697_v36 = vld [vmem:[%s10626_s1 + $0x224] sm:$0xf]  ;;  %v4852_v39 = vld [vmem:[%s10626_s1 + $0x230] sm:$0xf0]  ;;  %v4727_v45 = vor.u32 %v6665_v33, %v4724_v35  ;;  %v4698_v62 = vld [vmem:[%s10626_s1 + $0xe8] sm:$0xf] }
  0x57   :  { %v6729_v40 = vld [vmem:[%s10626_s1 + $0x324] sm:$0xf]  ;;  %v4980_v42 = vld [vmem:[%s10626_s1 + $0x330] sm:$0xf0]  ;;  %v4855_v48 = vor.u32 %v6697_v36, %v4852_v39  ;;  %v6660_v63 = vld [vmem:[%s10626_s1 + $0xf4] sm:$0xf0] }
  0x58   :  { %1547 = vmatpush.bf16.msra.mxu3 %v5143_v24  ;;  %v6761_v43 = vld [vmem:[%s10626_s1 + $0x424] sm:$0xf]  ;;  %v5108_v44 = vld [vmem:[%s10626_s1 + $0x430] sm:$0xf0]  ;;  %1509 = vmatpush.bf16.msra.mxu0 %v4743_v30  ;;  %v4983_v49 = vor.u32 %v6729_v40, %v4980_v42  ;;  %v4826_v3 = vld [vmem:[%s10626_s1 + $0x1e8] sm:$0xf]  ;;  %v4699_v8 = vor.u32 %v6660_v63, %v4698_v62 }
  0x59   :  { %v6661_v46 = vld [vmem:[%s10626_s1 + $0x104] sm:$0xf]  ;;  %v4708_v47 = vld [vmem:[%s10626_s1 + $0x110] sm:$0xf0]  ;;  %1522 = vmatpush.bf16.msra.mxu1 %v4871_v31  ;;  %v5111_v53 = vor.u32 %v6761_v43, %v5108_v44  ;;  %v6692_v4 = vld [vmem:[%s10626_s1 + $0x1f4] sm:$0xf0] }
  0x5a   :  { %1535 = vmatpush.bf16.msra.mxu2 %v4999_v32  ;;  %v6693_v50 = vld [vmem:[%s10626_s1 + $0x204] sm:$0xf]  ;;  %v4836_v51 = vld [vmem:[%s10626_s1 + $0x210] sm:$0xf0]  ;;  %v4711_v60 = vor.u32 %v6661_v46, %v4708_v47  ;;  %v4827_v13 = vor.u32 %v6692_v4, %v4826_v3  ;;  %v4682_v17 = vld [vmem:[%s10626_s1 + $0xc8] sm:$0xf] }
  0x5b   :  { %v6725_v52 = vld [vmem:[%s10626_s1 + $0x304] sm:$0xf]  ;;  %v4964_v54 = vld [vmem:[%s10626_s1 + $0x310] sm:$0xf0]  ;;  %v4839_v0 = vor.u32 %v6693_v50, %v4836_v51  ;;  %v6656_v18 = vld [vmem:[%s10626_s1 + $0xd4] sm:$0xf0] }
  0x5c   :  { %1548 = vmatpush.bf16.msra.mxu3 %v5127_v37  ;;  %v6757_v55 = vld [vmem:[%s10626_s1 + $0x404] sm:$0xf]  ;;  %v5092_v56 = vld [vmem:[%s10626_s1 + $0x410] sm:$0xf0]  ;;  %1510 = vmatpush.bf16.msra.mxu0 %v4727_v45  ;;  %v4967_v2 = vor.u32 %v6725_v52, %v4964_v54  ;;  %v4810_v19 = vld [vmem:[%s10626_s1 + $0x1c8] sm:$0xf]  ;;  %v4683_v23 = vor.u32 %v6656_v18, %v4682_v17 }
  0x5d   :  { %v6817_v57 = vld [vmem:[%s10626_s1 + $0x5e4] sm:$0xf]  ;;  %v5332_v58 = vld [vmem:[%s10626_s1 + $0x5f0] sm:$0xf0]  ;;  %1523 = vmatpush.bf16.msra.mxu1 %v4855_v48  ;;  %v5095_v5 = vor.u32 %v6757_v55, %v5092_v56  ;;  %v6688_v20 = vld [vmem:[%s10626_s1 + $0x1d4] sm:$0xf0] }
  0x5e   :  { %v6849_v59 = vld [vmem:[%s10626_s1 + $0x6e4] sm:$0xf]  ;;  %v5460_v61 = vld [vmem:[%s10626_s1 + $0x6f0] sm:$0xf0]  ;;  %1536 = vmatpush.bf16.msra.mxu2 %v4983_v49  ;;  %v5335_v6 = vor.u32 %v6817_v57, %v5332_v58  ;;  %v4811_v27 = vor.u32 %v6688_v20, %v4810_v19  ;;  %v4666_v29 = vld [vmem:[%s10626_s1 + $0xa8] sm:$0xf] }
  0x5f   :  { %v5463_v7 = vor.u32 %v6849_v59, %v5460_v61  ;;  %v6813_v10 = vld [vmem:[%s10626_s1 + $0x5c4] sm:$0xf]  ;;  %v5316_v11 = vld [vmem:[%s10626_s1 + $0x5d0] sm:$0xf0]  ;;  %v6652_v30 = vld [vmem:[%s10626_s1 + $0xb4] sm:$0xf0] }
  0x60   :  { %1549 = vmatpush.bf16.msra.mxu3 %v5111_v53  ;;  %v6845_v12 = vld [vmem:[%s10626_s1 + $0x6c4] sm:$0xf]  ;;  %1511 = vmatpush.bf16.msra.mxu0 %v4711_v60  ;;  %v5444_v16 = vld [vmem:[%s10626_s1 + $0x6d0] sm:$0xf0]  ;;  %v5319_v21 = vor.u32 %v6813_v10, %v5316_v11  ;;  %v4794_v31 = vld [vmem:[%s10626_s1 + $0x1a8] sm:$0xf]  ;;  %v4667_v36 = vor.u32 %v6652_v30, %v4666_v29 }
  0x61   :  { %1524 = vmatpush.bf16.msra.mxu1 %v4839_v0  ;;  %v5447_v22 = vor.u32 %v6845_v12, %v5444_v16  ;;  %v6809_v24 = vld [vmem:[%s10626_s1 + $0x5a4] sm:$0xf]  ;;  %v5300_v25 = vld [vmem:[%s10626_s1 + $0x5b0] sm:$0xf0]  ;;  %v6684_v32 = vld [vmem:[%s10626_s1 + $0x1b4] sm:$0xf0] }
  0x62   :  { %1537 = vmatpush.bf16.msra.mxu2 %v4967_v2  ;;  %v6841_v26 = vld [vmem:[%s10626_s1 + $0x6a4] sm:$0xf]  ;;  %v5428_v28 = vld [vmem:[%s10626_s1 + $0x6b0] sm:$0xf0]  ;;  %v5303_v33 = vor.u32 %v6809_v24, %v5300_v25  ;;  %v4795_v42 = vor.u32 %v6684_v32, %v4794_v31  ;;  %v4650_v44 = vld [vmem:[%s10626_s1 + $0x88] sm:$0xf] }
  0x63   :  { %1512 = vmatmul.bf16.vlgmr.msra.gmra.mxu0 %v7524_v15  ;;  %v5431_v35 = vor.u32 %v6841_v26, %v5428_v28  ;;  %v6805_v37 = vld [vmem:[%s10626_s1 + $0x584] sm:$0xf]  ;;  %v5284_v39 = vld [vmem:[%s10626_s1 + $0x590] sm:$0xf0]  ;;  %v6648_v45 = vld [vmem:[%s10626_s1 + $0x94] sm:$0xf0] }
  0x64   :  { %1550 = vmatpush.bf16.msra.mxu3 %v5095_v5  ;;  %1556 = vmatpush.bf16.msrb.mxu0 %v5335_v6  ;;  %v6837_v40 = vld [vmem:[%s10626_s1 + $0x684] sm:$0xf]  ;;  %v5412_v43 = vld [vmem:[%s10626_s1 + $0x690] sm:$0xf0]  ;;  %v4778_v46 = vld [vmem:[%s10626_s1 + $0x188] sm:$0xf]  ;;  %v5287_v48 = vor.u32 %v6805_v37, %v5284_v39  ;;  %v4651_v50 = vor.u32 %v6648_v45, %v4650_v44 }
  0x65   :  { %1569 = vmatpush.bf16.msrb.mxu1 %v5463_v7  ;;  %1538 = vmatmul.bf16.vlgmr.msra.gmra.mxu2 %v7511_v9  ;;  %v6680_v47 = vld [vmem:[%s10626_s1 + $0x194] sm:$0xf0]  ;;  %v5415_v49 = vor.u32 %v6837_v40, %v5412_v43  ;;  %v6801_v51 = vld [vmem:[%s10626_s1 + $0x564] sm:$0xf]  ;;  %v5268_v52 = vld [vmem:[%s10626_s1 + $0x570] sm:$0xf0] }
  0x66   :  { %1582 = vmatpush.bf16.msrb.mxu2 %v4699_v8  ;;  %1525 = vmatmul.bf16.vlgmr.msra.gmra.mxu1 %v7499_v1  ;;  %v6833_v53 = vld [vmem:[%s10626_s1 + $0x664] sm:$0xf]  ;;  %v4779_v54 = vor.u32 %v6680_v47, %v4778_v46  ;;  %v5396_v55 = vld [vmem:[%s10626_s1 + $0x670] sm:$0xf0]  ;;  %v4634_v56 = vld [vmem:[%s10626_s1 + $0x68] sm:$0xf]  ;;  %v5271_v60 = vor.u32 %v6801_v51, %v5268_v52 }
  0x67   :  { %1551 = vmatmul.bf16.vlgmr.msra.gmra.mxu3 %v7690_v38  ;;  %v6644_v57 = vld [vmem:[%s10626_s1 + $0x74] sm:$0xf0]  ;;  %v4762_v58 = vld [vmem:[%s10626_s1 + $0x168] sm:$0xf]  ;;  %v5399_v61 = vor.u32 %v6833_v53, %v5396_v55  ;;  %v6797_v63 = vld [vmem:[%s10626_s1 + $0x544] sm:$0xf] }
  0x68   :  { %1595 = vmatpush.bf16.msrb.mxu3 %v4827_v13  ;;  %1557 = vmatpush.bf16.msrb.mxu0 %v5319_v21  ;;  %v6676_v59 = vld [vmem:[%s10626_s1 + $0x174] sm:$0xf0]  ;;  %v4635_v62 = vor.u32 %v6644_v57, %v4634_v56  ;;  %v5252_v0 = vld [vmem:[%s10626_s1 + $0x550] sm:$0xf0]  ;;  %v6829_v2 = vld [vmem:[%s10626_s1 + $0x644] sm:$0xf] }
  0x69   :  { %1570 = vmatpush.bf16.msrb.mxu1 %v5447_v22  ;;  %v4763_v3 = vor.u32 %v6676_v59, %v4762_v58  ;;  %v5380_v4 = vld [vmem:[%s10626_s1 + $0x650] sm:$0xf0]  ;;  %v4618_v5 = vld [vmem:[%s10626_s1 + $0x48] sm:$0xf]  ;;  %v6640_v6 = vld [vmem:[%s10626_s1 + $0x54] sm:$0xf0]  ;;  %v5255_v10 = vor.u32 %v6797_v63, %v5252_v0 }
  0x6a   :  { %1583 = vmatpush.bf16.msrb.mxu2 %v4683_v23  ;;  %v4746_v7 = vld [vmem:[%s10626_s1 + $0x148] sm:$0xf]  ;;  %v6672_v8 = vld [vmem:[%s10626_s1 + $0x154] sm:$0xf0]  ;;  %v5383_v11 = vor.u32 %v6829_v2, %v5380_v4  ;;  %v4619_v12 = vor.u32 %v6640_v6, %v4618_v5  ;;  %v6793_v13 = vld [vmem:[%s10626_s1 + $0x524] sm:$0xf] }
  0x6b   :  { %v5236_v16 = vld [vmem:[%s10626_s1 + $0x530] sm:$0xf0]  ;;  %v6825_v17 = vld [vmem:[%s10626_s1 + $0x624] sm:$0xf]  ;;  %v4747_v18 = vor.u32 %v6672_v8, %v4746_v7  ;;  %v4602_v20 = vld [vmem:[%s10626_s1 + $0x28] sm:$0xf] }
  0x6c   :  { %1596 = vmatpush.bf16.msrb.mxu3 %v4811_v27  ;;  %1558 = vmatpush.bf16.msrb.mxu0 %v5303_v33  ;;  %v5364_v19 = vld [vmem:[%s10626_s1 + $0x630] sm:$0xf0]  ;;  %v6636_v21 = vld [vmem:[%s10626_s1 + $0x34] sm:$0xf0]  ;;  %v4730_v22 = vld [vmem:[%s10626_s1 + $0x128] sm:$0xf]  ;;  %v5239_v24 = vor.u32 %v6793_v13, %v5236_v16 }
  0x6d   :  { %1571 = vmatpush.bf16.msrb.mxu1 %v5431_v35  ;;  %v6668_v23 = vld [vmem:[%s10626_s1 + $0x134] sm:$0xf0]  ;;  %v6789_v25 = vld [vmem:[%s10626_s1 + $0x504] sm:$0xf]  ;;  %v5220_v26 = vld [vmem:[%s10626_s1 + $0x510] sm:$0xf0]  ;;  %v5367_v27 = vor.u32 %v6825_v17, %v5364_v19  ;;  %v4603_v28 = vor.u32 %v6636_v21, %v4602_v20 }
  0x6e   :  { %1584 = vmatpush.bf16.msrb.mxu2 %v4667_v36  ;;  %v6821_v29 = vld [vmem:[%s10626_s1 + $0x604] sm:$0xf]  ;;  %v5348_v30 = vld [vmem:[%s10626_s1 + $0x610] sm:$0xf0]  ;;  %v4586_v31 = vld [vmem:[%s10626_s1 + $0x8] sm:$0xf]  ;;  %v4731_v32 = vor.u32 %v6668_v23, %v4730_v22 }
  0x6f   :  { %v6632_v33 = vld [vmem:[%s10626_s1 + $0x14] sm:$0xf0]  ;;  %v4714_v35 = vld [vmem:[%s10626_s1 + $0x108] sm:$0xf]  ;;  %v5351_v46 = vor.u32 %v6821_v29, %v5348_v30  ;;  %vm1889_vm12 = vcmask 1040384   ;;  %vm1891_vm13 = vcmask 1042434  }
  0x70   :  { %1597 = vmatpush.bf16.msrb.mxu3 %v4795_v42  ;;  %1559 = vmatpush.bf16.msrb.mxu0 %v5287_v48  ;;  %v6664_v36 = vld [vmem:[%s10626_s1 + $0x114] sm:$0xf0]  ;;  %v4954_v37 = vld [vmem:[%s10626_s1 + $0x2e8] sm:$0xf]  ;;  %v5223_v42 = vor.u32 %v6789_v25, %v5220_v26  ;;  %v4587_v47 = vor.u32 %v6632_v33, %v4586_v31  ;;  %vm1893_vm15 = vcmask 1041408   ;;  %s7197_s26 = smov [#allocation2]  }
  0x71   :  { %1572 = vmatpush.bf16.msrb.mxu1 %v5415_v49  ;;  %v6724_v39 = vld [vmem:[%s10626_s1 + $0x2f4] sm:$0xf0]  ;;  %v5082_v40 = vld [vmem:[%s10626_s1 + $0x3e8] sm:$0xf]  ;;  %s4567_s29 = sshll.u32 %s10632_s7, 4  ;;  %s4568_s29 = int_to_ptr.hbm [resolvable:$true] %s4567_s29 }
  0x72   :  { %1585 = vmatpush.bf16.msrb.mxu2 %v4651_v50  ;;  %v6756_v43 = vld [vmem:[%s10626_s1 + $0x3f4] sm:$0xf0]  ;;  %v5210_v44 = vld [vmem:[%s10626_s1 + $0x4e8] sm:$0xf]  ;;  %v4715_v50 = vor.u32 %v6664_v36, %v4714_v35  ;;  %v4955_v51 = vor.u32 %v6724_v39, %v4954_v37 }
  0x73   :  { %v6788_v45 = vld [vmem:[%s10626_s1 + $0x4f4] sm:$0xf0]  ;;  %v5338_v48 = vld [vmem:[%s10626_s1 + $0x5e8] sm:$0xf]  ;;  %v5083_v52 = vor.u32 %v6756_v43, %v5082_v40 }
  0x74   :  { %1598 = vmatpush.bf16.msrb.mxu3 %v4779_v54  ;;  %1560 = vmatpush.bf16.msrb.mxu0 %v5271_v60  ;;  %v6820_v49 = vld [vmem:[%s10626_s1 + $0x5f4] sm:$0xf0]  ;;  %v5211_v53 = vor.u32 %v6788_v45, %v5210_v44  ;;  %v4938_v54 = vld [vmem:[%s10626_s1 + $0x2c8] sm:$0xf] }
  0x75   :  { %1573 = vmatpush.bf16.msrb.mxu1 %v5399_v61  ;;  %v6720_v55 = vld [vmem:[%s10626_s1 + $0x2d4] sm:$0xf0]  ;;  %v5066_v56 = vld [vmem:[%s10626_s1 + $0x3c8] sm:$0xf]  ;;  %v5339_v57 = vor.u32 %v6820_v49, %v5338_v48 }
  0x76   :  { %1586 = vmatpush.bf16.msrb.mxu2 %v4635_v62  ;;  %v6752_v58 = vld [vmem:[%s10626_s1 + $0x3d4] sm:$0xf0]  ;;  %v5194_v59 = vld [vmem:[%s10626_s1 + $0x4c8] sm:$0xf]  ;;  %v4939_v63 = vor.u32 %v6720_v55, %v4938_v54 }
  0x77   :  { %v6784_v60 = vld [vmem:[%s10626_s1 + $0x4d4] sm:$0xf0]  ;;  %v5322_v61 = vld [vmem:[%s10626_s1 + $0x5c8] sm:$0xf]  ;;  %v5067_v0 = vor.u32 %v6752_v58, %v5066_v56 }
  0x78   :  { %1599 = vmatpush.bf16.msrb.mxu3 %v4763_v3  ;;  %1561 = vmatpush.bf16.msrb.mxu0 %v5255_v10  ;;  %v6816_v62 = vld [vmem:[%s10626_s1 + $0x5d4] sm:$0xf0]  ;;  %v5195_v2 = vor.u32 %v6784_v60, %v5194_v59  ;;  %v4922_v3 = vld [vmem:[%s10626_s1 + $0x2a8] sm:$0xf] }
  0x79   :  { %1574 = vmatpush.bf16.msrb.mxu1 %v5383_v11  ;;  %v6716_v4 = vld [vmem:[%s10626_s1 + $0x2b4] sm:$0xf0]  ;;  %v5050_v5 = vld [vmem:[%s10626_s1 + $0x3a8] sm:$0xf]  ;;  %v5323_v6 = vor.u32 %v6816_v62, %v5322_v61 }
  0x7a   :  { %1587 = vmatpush.bf16.msrb.mxu2 %v4619_v12  ;;  %v6748_v7 = vld [vmem:[%s10626_s1 + $0x3b4] sm:$0xf0]  ;;  %v5178_v8 = vld [vmem:[%s10626_s1 + $0x4a8] sm:$0xf]  ;;  %v4923_v13 = vor.u32 %v6716_v4, %v4922_v3 }
  0x7b   :  { %v6780_v10 = vld [vmem:[%s10626_s1 + $0x4b4] sm:$0xf0]  ;;  %v5306_v11 = vld [vmem:[%s10626_s1 + $0x5a8] sm:$0xf]  ;;  %v5051_v16 = vor.u32 %v6748_v7, %v5050_v5 }
  0x7c   :  { %1600 = vmatpush.bf16.msrb.mxu3 %v4747_v18  ;;  %1562 = vmatpush.bf16.msrb.mxu0 %v5239_v24  ;;  %v6812_v12 = vld [vmem:[%s10626_s1 + $0x5b4] sm:$0xf0]  ;;  %v5179_v17 = vor.u32 %v6780_v10, %v5178_v8  ;;  %v4906_v18 = vld [vmem:[%s10626_s1 + $0x288] sm:$0xf] }
  0x7d   :  { %1575 = vmatpush.bf16.msrb.mxu1 %v5367_v27  ;;  %v6712_v19 = vld [vmem:[%s10626_s1 + $0x294] sm:$0xf0]  ;;  %v5034_v20 = vld [vmem:[%s10626_s1 + $0x388] sm:$0xf]  ;;  %v5307_v21 = vor.u32 %v6812_v12, %v5306_v11 }
  0x7e   :  { %1588 = vmatpush.bf16.msrb.mxu2 %v4603_v28  ;;  %v6744_v22 = vld [vmem:[%s10626_s1 + $0x394] sm:$0xf0]  ;;  %v5162_v23 = vld [vmem:[%s10626_s1 + $0x488] sm:$0xf]  ;;  %v4907_v27 = vor.u32 %v6712_v19, %v4906_v18 }
  0x7f   :  { %v6776_v24 = vld [vmem:[%s10626_s1 + $0x494] sm:$0xf0]  ;;  %v5290_v25 = vld [vmem:[%s10626_s1 + $0x588] sm:$0xf]  ;;  %v5035_v28 = vor.u32 %v6744_v22, %v5034_v20  ;;  %v6658_v20 = vld [vmem:[%s10626_s1 + $0xec] sm:$0xf] }
  0x80   :  { %1601 = vmatpush.bf16.msrb.mxu3 %v4731_v32  ;;  %1563 = vmatpush.bf16.msrb.mxu0 %v5223_v42  ;;  %v6808_v26 = vld [vmem:[%s10626_s1 + $0x594] sm:$0xf0]  ;;  %v5163_v29 = vor.u32 %v6776_v24, %v5162_v23  ;;  %v4890_v30 = vld [vmem:[%s10626_s1 + $0x268] sm:$0xf]  ;;  %v4700_v22 = vld [vmem:[%s10626_s1 + $0xf8] sm:$0xf0] }
  0x81   :  { %1576 = vmatpush.bf16.msrb.mxu1 %v5351_v46  ;;  %v6708_v31 = vld [vmem:[%s10626_s1 + $0x274] sm:$0xf0]  ;;  %v5018_v32 = vld [vmem:[%s10626_s1 + $0x368] sm:$0xf]  ;;  %v5291_v33 = vor.u32 %v6808_v26, %v5290_v25  ;;  %v6690_v23 = vld [vmem:[%s10626_s1 + $0x1ec] sm:$0xf] }
  0x82   :  { %1589 = vmatpush.bf16.msrb.mxu2 %v4587_v47  ;;  %v6740_v35 = vld [vmem:[%s10626_s1 + $0x374] sm:$0xf0]  ;;  %v5146_v36 = vld [vmem:[%s10626_s1 + $0x468] sm:$0xf]  ;;  %v4891_v42 = vor.u32 %v6708_v31, %v4890_v30  ;;  %v4828_v24 = vld [vmem:[%s10626_s1 + $0x1f8] sm:$0xf0]  ;;  %v4703_v31 = vor.u32 %v6658_v20, %v4700_v22 }
  0x83   :  { %1564 = vmatmul.bf16.vlgmr.msrb.gmra.mxu0 %v7698_v41  ;;  %v6772_v37 = vld [vmem:[%s10626_s1 + $0x474] sm:$0xf0]  ;;  %v5274_v39 = vld [vmem:[%s10626_s1 + $0x568] sm:$0xf]  ;;  %v5019_v43 = vor.u32 %v6740_v35, %v5018_v32  ;;  %v4831_v32 = vor.u32 %v6690_v23, %v4828_v24  ;;  %v4892_v20 = vld [vmem:[%s10626_s1 + $0x278] sm:$0xf0] }
  0x84   :  { %1602 = vmatpush.bf16.msrb.mxu3 %v4715_v50  ;;  %1608 = vmatpush.bf16.msra.mxu0 %v4955_v51  ;;  %v6804_v40 = vld [vmem:[%s10626_s1 + $0x574] sm:$0xf0]  ;;  %v5147_v44 = vor.u32 %v6772_v37, %v5146_v36  ;;  %v4874_v45 = vld [vmem:[%s10626_s1 + $0x248] sm:$0xf]  ;;  %v6654_v36 = vld [vmem:[%s10626_s1 + $0xcc] sm:$0xf] }
  0x85   :  { %1621 = vmatpush.bf16.msra.mxu1 %v5083_v52  ;;  %1590 = vmatmul.bf16.vlgmr.msrb.gmra.mxu2 %v7522_v14  ;;  %v6704_v46 = vld [vmem:[%s10626_s1 + $0x254] sm:$0xf0]  ;;  %v5002_v47 = vld [vmem:[%s10626_s1 + $0x348] sm:$0xf]  ;;  %v5275_v48 = vor.u32 %v6804_v40, %v5274_v39  ;;  %v4684_v39 = vld [vmem:[%s10626_s1 + $0xd8] sm:$0xf0] }
  0x86   :  { %1634 = vmatpush.bf16.msra.mxu2 %v5211_v53  ;;  %1577 = vmatmul.bf16.vlgmr.msrb.gmra.mxu1 %v7679_v34  ;;  %v6736_v49 = vld [vmem:[%s10626_s1 + $0x354] sm:$0xf0]  ;;  %v5130_v50 = vld [vmem:[%s10626_s1 + $0x448] sm:$0xf]  ;;  %v4875_v54 = vor.u32 %v6704_v46, %v4874_v45  ;;  %v6686_v40 = vld [vmem:[%s10626_s1 + $0x1cc] sm:$0xf]  ;;  %v4687_v46 = vor.u32 %v6654_v36, %v4684_v39 }
  0x87   :  { %1603 = vmatmul.bf16.vlgmr.msrb.gmra.mxu3 %v7524_v15  ;;  %v6768_v51 = vld [vmem:[%s10626_s1 + $0x454] sm:$0xf0]  ;;  %v5258_v52 = vld [vmem:[%s10626_s1 + $0x548] sm:$0xf]  ;;  %v5003_v55 = vor.u32 %v6736_v49, %v5002_v47  ;;  %v4876_v36 = vld [vmem:[%s10626_s1 + $0x258] sm:$0xf0] }
  0x88   :  { %1647 = vmatpush.bf16.msra.mxu3 %v5339_v57  ;;  %1609 = vmatpush.bf16.msra.mxu0 %v4939_v63  ;;  %v6800_v53 = vld [vmem:[%s10626_s1 + $0x554] sm:$0xf0]  ;;  %v5131_v56 = vor.u32 %v6768_v51, %v5130_v50  ;;  %v4858_v57 = vld [vmem:[%s10626_s1 + $0x228] sm:$0xf]  ;;  %v6650_v50 = vld [vmem:[%s10626_s1 + $0xac] sm:$0xf] }
  0x89   :  { %1622 = vmatpush.bf16.msra.mxu1 %v5067_v0  ;;  %v6700_v58 = vld [vmem:[%s10626_s1 + $0x234] sm:$0xf0]  ;;  %v4986_v59 = vld [vmem:[%s10626_s1 + $0x328] sm:$0xf]  ;;  %v5259_v60 = vor.u32 %v6800_v53, %v5258_v52  ;;  %v4668_v52 = vld [vmem:[%s10626_s1 + $0xb8] sm:$0xf0] }
  0x8a   :  { %1635 = vmatpush.bf16.msra.mxu2 %v5195_v2  ;;  %v6732_v61 = vld [vmem:[%s10626_s1 + $0x334] sm:$0xf0]  ;;  %v5114_v62 = vld [vmem:[%s10626_s1 + $0x428] sm:$0xf]  ;;  %v4859_v3 = vor.u32 %v6700_v58, %v4858_v57  ;;  %v6682_v53 = vld [vmem:[%s10626_s1 + $0x1ac] sm:$0xf]  ;;  %v4671_v58 = vor.u32 %v6650_v50, %v4668_v52 }
  0x8b   :  { %v6764_v63 = vld [vmem:[%s10626_s1 + $0x434] sm:$0xf0]  ;;  %v5242_v0 = vld [vmem:[%s10626_s1 + $0x528] sm:$0xf]  ;;  %v4732_v50 = vld [vmem:[%s10626_s1 + $0x138] sm:$0xf0] }
  0x8c   :  { %1648 = vmatpush.bf16.msra.mxu3 %v5323_v6  ;;  %1610 = vmatpush.bf16.msra.mxu0 %v4923_v13  ;;  %v6796_v2 = vld [vmem:[%s10626_s1 + $0x534] sm:$0xf0]  ;;  %v4842_v4 = vld [vmem:[%s10626_s1 + $0x208] sm:$0xf]  ;;  %v4987_v6 = vor.u32 %v6732_v61, %v4986_v59  ;;  %v5115_v7 = vor.u32 %v6764_v63, %v5114_v62  ;;  %v6646_v62 = vld [vmem:[%s10626_s1 + $0x8c] sm:$0xf] }
  0x8d   :  { %1623 = vmatpush.bf16.msra.mxu1 %v5051_v16  ;;  %v6696_v5 = vld [vmem:[%s10626_s1 + $0x214] sm:$0xf0]  ;;  %v4970_v8 = vld [vmem:[%s10626_s1 + $0x308] sm:$0xf]  ;;  %v5243_v12 = vor.u32 %v6796_v2, %v5242_v0  ;;  %v4652_v0 = vld [vmem:[%s10626_s1 + $0x98] sm:$0xf0] }
  0x8e   :  { %1636 = vmatpush.bf16.msra.mxu2 %v5179_v17  ;;  %v6728_v10 = vld [vmem:[%s10626_s1 + $0x314] sm:$0xf0]  ;;  %v5098_v11 = vld [vmem:[%s10626_s1 + $0x408] sm:$0xf]  ;;  %v6678_v2 = vld [vmem:[%s10626_s1 + $0x18c] sm:$0xf] }
  0x8f   :  { %v6760_v13 = vld [vmem:[%s10626_s1 + $0x414] sm:$0xf0]  ;;  %v5226_v16 = vld [vmem:[%s10626_s1 + $0x508] sm:$0xf]  ;;  %v4971_v25 = vor.u32 %v6728_v10, %v4970_v8  ;;  %v4860_v52 = vld [vmem:[%s10626_s1 + $0x238] sm:$0xf0] }
  0x90   :  { %1649 = vmatpush.bf16.msra.mxu3 %v5307_v21  ;;  %1611 = vmatpush.bf16.msra.mxu0 %v4907_v27  ;;  %v6792_v17 = vld [vmem:[%s10626_s1 + $0x514] sm:$0xf0]  ;;  %v5466_v18 = vld [vmem:[%s10626_s1 + $0x6e8] sm:$0xf]  ;;  %v4843_v21 = vor.u32 %v6696_v5, %v4842_v4  ;;  %v5099_v26 = vor.u32 %v6760_v13, %v5098_v11  ;;  %v6722_v27 = vld [vmem:[%s10626_s1 + $0x2ec] sm:$0xf] }
  0x91   :  { %1624 = vmatpush.bf16.msra.mxu1 %v5035_v28  ;;  %v6852_v19 = vld [vmem:[%s10626_s1 + $0x6f4] sm:$0xf0]  ;;  %v4956_v28 = vld [vmem:[%s10626_s1 + $0x2f8] sm:$0xf0]  ;;  %v6710_v4 = vld [vmem:[%s10626_s1 + $0x28c] sm:$0xf] }
  0x92   :  { %1637 = vmatpush.bf16.msra.mxu2 %v5163_v29  ;;  %v5227_v29 = vor.u32 %v6792_v17, %v5226_v16  ;;  %v5467_v30 = vor.u32 %v6852_v19, %v5466_v18  ;;  %v6848_v35 = vld [vmem:[%s10626_s1 + $0x6d4] sm:$0xf0]  ;;  %v4959_v37 = vor.u32 %v6722_v27, %v4956_v28  ;;  %v4908_v5 = vld [vmem:[%s10626_s1 + $0x298] sm:$0xf0]  ;;  %v5402_v10 = vld [vmem:[%s10626_s1 + $0x668] sm:$0xf] }
  0x93   :  { %v6844_v49 = vld [vmem:[%s10626_s1 + $0x6b4] sm:$0xf0]  ;;  %v4911_v13 = vor.u32 %v6710_v4, %v4908_v5  ;;  %v4636_v16 = vld [vmem:[%s10626_s1 + $0x78] sm:$0xf0]  ;;  %v6674_v17 = vld [vmem:[%s10626_s1 + $0x16c] sm:$0xf] }
  0x94   :  { %1650 = vmatpush.bf16.msra.mxu3 %v5291_v33  ;;  %1612 = vmatpush.bf16.msra.mxu0 %v4891_v42  ;;  %v5450_v33 = vld [vmem:[%s10626_s1 + $0x6c8] sm:$0xf]  ;;  %v4812_v42 = vld [vmem:[%s10626_s1 + $0x1d8] sm:$0xf0]  ;;  %v6840_v61 = vld [vmem:[%s10626_s1 + $0x694] sm:$0xf0] }
  0x95   :  { %1625 = vmatpush.bf16.msra.mxu1 %v5019_v43  ;;  %v6718_v43 = vld [vmem:[%s10626_s1 + $0x2cc] sm:$0xf]  ;;  %v5451_v45 = vor.u32 %v6848_v35, %v5450_v33  ;;  %v4815_v47 = vor.u32 %v6686_v40, %v4812_v42  ;;  %v6836_v11 = vld [vmem:[%s10626_s1 + $0x674] sm:$0xf0]  ;;  %v4764_v18 = vld [vmem:[%s10626_s1 + $0x178] sm:$0xf0] }
  0x96   :  { %1638 = vmatpush.bf16.msra.mxu2 %v5147_v44  ;;  %v4940_v44 = vld [vmem:[%s10626_s1 + $0x2d8] sm:$0xf0]  ;;  %v6706_v19 = vld [vmem:[%s10626_s1 + $0x26c] sm:$0xf]  ;;  %v6832_v27 = vld [vmem:[%s10626_s1 + $0x654] sm:$0xf0] }
  0x97   :  { %v4943_v51 = vor.u32 %v6718_v43, %v4940_v44  ;;  %v6638_v28 = vld [vmem:[%s10626_s1 + $0x4c] sm:$0xf]  ;;  %v4748_v33 = vld [vmem:[%s10626_s1 + $0x158] sm:$0xf0]  ;;  %v5370_v44 = vld [vmem:[%s10626_s1 + $0x628] sm:$0xf] }
  0x98   :  { %1651 = vmatpush.bf16.msra.mxu3 %v5275_v48  ;;  %1613 = vmatpush.bf16.msra.mxu0 %v4875_v54  ;;  %v5434_v48 = vld [vmem:[%s10626_s1 + $0x6a8] sm:$0xf]  ;;  %v4796_v54 = vld [vmem:[%s10626_s1 + $0x1b8] sm:$0xf0]  ;;  %v6702_v35 = vld [vmem:[%s10626_s1 + $0x24c] sm:$0xf] }
  0x99   :  { %1626 = vmatpush.bf16.msra.mxu1 %v5003_v55  ;;  %v6714_v55 = vld [vmem:[%s10626_s1 + $0x2ac] sm:$0xf]  ;;  %v5435_v57 = vor.u32 %v6844_v49, %v5434_v48  ;;  %v4799_v59 = vor.u32 %v6682_v53, %v4796_v54  ;;  %v4604_v48 = vld [vmem:[%s10626_s1 + $0x38] sm:$0xf0] }
  0x9a   :  { %1639 = vmatpush.bf16.msra.mxu2 %v5131_v56  ;;  %v4924_v56 = vld [vmem:[%s10626_s1 + $0x2b8] sm:$0xf0]  ;;  %v6666_v49 = vld [vmem:[%s10626_s1 + $0x12c] sm:$0xf] }
  0x9b   :  { %v4927_v63 = vor.u32 %v6714_v55, %v4924_v56  ;;  %v5354_v55 = vld [vmem:[%s10626_s1 + $0x608] sm:$0xf]  ;;  %v6824_v56 = vld [vmem:[%s10626_s1 + $0x614] sm:$0xf0]  ;;  %v6694_v4 = vld [vmem:[%s10626_s1 + $0x20c] sm:$0xf] }
  0x9c   :  { %1652 = vmatpush.bf16.msra.mxu3 %v5259_v60  ;;  %1614 = vmatpush.bf16.msra.mxu0 %v4859_v3  ;;  %v5418_v60 = vld [vmem:[%s10626_s1 + $0x688] sm:$0xf]  ;;  %v4780_v3 = vld [vmem:[%s10626_s1 + $0x198] sm:$0xf0] }
  0x9d   :  { %1627 = vmatpush.bf16.msra.mxu1 %v4987_v6  ;;  %v5419_v6 = vor.u32 %v6840_v61, %v5418_v60  ;;  %v4783_v8 = vor.u32 %v6678_v2, %v4780_v3  ;;  %v4735_v61 = vor.u32 %v6666_v49, %v4732_v50  ;;  %v4716_v3 = vld [vmem:[%s10626_s1 + $0x118] sm:$0xf0] }
  0x9e   :  { %1640 = vmatpush.bf16.msra.mxu2 %v5115_v7  ;;  %v4655_v7 = vor.u32 %v6646_v62, %v4652_v0  ;;  %v6630_v62 = vld [vmem:[%s10626_s1 + $0xc] sm:$0xf]  ;;  %v4844_v5 = vld [vmem:[%s10626_s1 + $0x218] sm:$0xf0] }
  0x9f   :  { %v6662_v0 = vld [vmem:[%s10626_s1 + $0x10c] sm:$0xf]  ;;  %v5436_v49 = vld [vmem:[%s10626_s1 + $0x6b8] sm:$0xf0] }
  0xa0   :  { %1653 = vmatpush.bf16.msra.mxu3 %v5243_v12  ;;  %1615 = vmatpush.bf16.msra.mxu0 %v4843_v21  ;;  %v6642_v12 = vld [vmem:[%s10626_s1 + $0x6c] sm:$0xf]  ;;  %v5403_v21 = vor.u32 %v6836_v11, %v5402_v10  ;;  %v5355_v11 = vor.u32 %v6824_v56, %v5354_v55  ;;  %v5292_v56 = vld [vmem:[%s10626_s1 + $0x598] sm:$0xf0] }
  0xa1   :  { %1628 = vmatpush.bf16.msra.mxu1 %v4971_v25  ;;  %v4639_v24 = vor.u32 %v6642_v12, %v4636_v16  ;;  %v4767_v25 = vor.u32 %v6674_v17, %v4764_v18  ;;  %v5212_v12 = vld [vmem:[%s10626_s1 + $0x4f8] sm:$0xf0]  ;;  %v4719_v18 = vor.u32 %v6662_v0, %v4716_v3  ;;  %v6806_v55 = vld [vmem:[%s10626_s1 + $0x58c] sm:$0xf] }
  0xa2   :  { %1641 = vmatpush.bf16.msra.mxu2 %v5099_v26  ;;  %v5386_v26 = vld [vmem:[%s10626_s1 + $0x648] sm:$0xf]  ;;  %v5340_v16 = vld [vmem:[%s10626_s1 + $0x5f8] sm:$0xf0]  ;;  %v5295_v0 = vor.u32 %v6806_v55, %v5292_v56  ;;  %v6738_v3 = vld [vmem:[%s10626_s1 + $0x36c] sm:$0xf] }
  0xa3   :  { %1616 = vmatmul.bf16.vlgmr.msra.gmra.mxu0 %v7499_v1  ;;  %v5387_v39 = vor.u32 %v6832_v27, %v5386_v26  ;;  %v5068_v26 = vld [vmem:[%s10626_s1 + $0x3d8] sm:$0xf0]  ;;  %v6782_v27 = vld [vmem:[%s10626_s1 + $0x4cc] sm:$0xf] }
  0xa4   :  { %1654 = vmatpush.bf16.msra.mxu3 %v5227_v29  ;;  %1660 = vmatpush.bf16.msrb.mxu0 %v5467_v30  ;;  %v4895_v30 = vor.u32 %v6706_v19, %v4892_v20  ;;  %v6850_v19 = vld [vmem:[%s10626_s1 + $0x6ec] sm:$0xf]  ;;  %v5468_v20 = vld [vmem:[%s10626_s1 + $0x6f8] sm:$0xf0] }
  0xa5   :  { %1673 = vmatpush.bf16.msrb.mxu1 %v4703_v31  ;;  %1642 = vmatmul.bf16.vlgmr.msra.gmra.mxu2 %v7690_v38  ;;  %v4620_v31 = vld [vmem:[%s10626_s1 + $0x58] sm:$0xf0]  ;;  %v6822_v55 = vld [vmem:[%s10626_s1 + $0x60c] sm:$0xf] }
  0xa6   :  { %1686 = vmatpush.bf16.msrb.mxu2 %v4831_v32  ;;  %1629 = vmatmul.bf16.vlgmr.msra.gmra.mxu1 %v7511_v9  ;;  %v6670_v32 = vld [vmem:[%s10626_s1 + $0x14c] sm:$0xf]  ;;  %v4623_v42 = vor.u32 %v6638_v28, %v4620_v31  ;;  %v5356_v56 = vld [vmem:[%s10626_s1 + $0x618] sm:$0xf0] }
  0xa7   :  { %1655 = vmatmul.bf16.vlgmr.msra.gmra.mxu3 %v7698_v41  ;;  %v4751_v43 = vor.u32 %v6670_v32, %v4748_v33  ;;  %v6814_v31 = vld [vmem:[%s10626_s1 + $0x5cc] sm:$0xf]  ;;  %v5324_v32 = vld [vmem:[%s10626_s1 + $0x5d8] sm:$0xf0] }
  0xa8   :  { %1699 = vmatpush.bf16.msrb.mxu3 %v4959_v37  ;;  %1661 = vmatpush.bf16.msrb.mxu0 %v5451_v45  ;;  %v1435_v37 = vpop.f32.mrf.mxu2  ;;  %v6828_v45 = vld [vmem:[%s10626_s1 + $0x634] sm:$0xf0]  ;;  %v6846_v33 = vld [vmem:[%s10626_s1 + $0x6cc] sm:$0xf] }
  0xa9   :  { %1674 = vmatpush.bf16.msrb.mxu1 %v4687_v46  ;;  %v6634_v46 = vld [vmem:[%s10626_s1 + $0x2c] sm:$0xf]  ;;  %v1448_v53 = vpop.f32.mrf.mxu3  ;;  %v5371_v54 = vor.u32 %v6828_v45, %v5370_v44  ;;  %v5180_v45 = vld [vmem:[%s10626_s1 + $0x4b8] sm:$0xf0] }
  0xaa   :  { %1687 = vmatpush.bf16.msrb.mxu2 %v4815_v47  ;;  %v4879_v47 = vor.u32 %v6702_v35, %v4876_v36  ;;  %v4607_v60 = vor.u32 %v6634_v46, %v4604_v48  ;;  %v5452_v35 = vld [vmem:[%s10626_s1 + $0x6d8] sm:$0xf0]  ;;  %v6810_v46 = vld [vmem:[%s10626_s1 + $0x5ac] sm:$0xf] }
  0xab   :  { %v5455_v44 = vor.u32 %v6846_v33, %v5452_v35  ;;  %v6842_v48 = vld [vmem:[%s10626_s1 + $0x6ac] sm:$0xf] }
  0xac   :  { %1700 = vmatpush.bf16.msrb.mxu3 %v4943_v51  ;;  %1662 = vmatpush.bf16.msrb.mxu0 %v5435_v57  ;;  %v1409_v22 = vpop.f32.mrf.mxu0  ;;  %v1422_v23 = vpop.f32.mrf.mxu1  ;;  %v6698_v51 = vld [vmem:[%s10626_s1 + $0x22c] sm:$0xf] }
  0xad   :  { %1675 = vmatpush.bf16.msrb.mxu1 %v4671_v58  ;;  %v1423_v29 = vadd.f32 %v1422_v23, %v1409_v22  ;;  %v4863_v2 = vor.u32 %v6698_v51, %v4860_v52 }
  0xae   :  { %1688 = vmatpush.bf16.msrb.mxu2 %v4799_v59 }
  0xaf   :  { %v1436_v40 = vadd.f32 %v1435_v37, %v1423_v29  ;;  %v5471_v29 = vor.u32 %v6850_v19, %v5468_v20  ;;  %v6734_v19 = vld [vmem:[%s10626_s1 + $0x34c] sm:$0xf]  ;;  %v5004_v20 = vld [vmem:[%s10626_s1 + $0x358] sm:$0xf0] }
  0xb0   :  { %1701 = vmatpush.bf16.msrb.mxu3 %v4927_v63  ;;  %1663 = vmatpush.bf16.msrb.mxu0 %v5419_v6  ;;  %v4588_v63 = vld [vmem:[%s10626_s1 + $0x18] sm:$0xf0]  ;;  %v6754_v6 = vld [vmem:[%s10626_s1 + $0x3ec] sm:$0xf]  ;;  %v1437_v10 = vpop.f32.mrf.mxu2 }
  0xb1   :  { %1676 = vmatpush.bf16.msrb.mxu1 %v4655_v7  ;;  %v8418_v59 = vadd.f32 %v1448_v53, %v1436_v40  ;;  %v5084_v7 = vld [vmem:[%s10626_s1 + $0x3f8] sm:$0xf0]  ;;  %v4591_v17 = vor.u32 %v6630_v62, %v4588_v63  ;;  %v1450_v28 = vpop.f32.mrf.mxu3  ;;  %v6746_v40 = vld [vmem:[%s10626_s1 + $0x3ac] sm:$0xf] }
  0xb2   :  { %1689 = vmatpush.bf16.msrb.mxu2 %v4783_v8  ;;  %v6786_v8 = vld [vmem:[%s10626_s1 + $0x4ec] sm:$0xf]  ;;  %v5087_v22 = vor.u32 %v6754_v6, %v5084_v7  ;;  %v5036_v53 = vld [vmem:[%s10626_s1 + $0x398] sm:$0xf0] }
  0xb3   :  { %v5215_v23 = vor.u32 %v6786_v8, %v5212_v12  ;;  %v5148_v7 = vld [vmem:[%s10626_s1 + $0x478] sm:$0xf0] }
  0xb4   :  { %1702 = vmatpush.bf16.msrb.mxu3 %v4911_v13  ;;  %1664 = vmatpush.bf16.msrb.mxu0 %v5403_v21  ;;  %v1411_v57 = vpop.f32.mrf.mxu0  ;;  %v1424_v58 = vpop.f32.mrf.mxu1  ;;  %v6818_v13 = vld [vmem:[%s10626_s1 + $0x5ec] sm:$0xf]  ;;  %v4847_v21 = vor.u32 %v6694_v4, %v4844_v5  ;;  %v5020_v4 = vld [vmem:[%s10626_s1 + $0x378] sm:$0xf0] }
  0xb5   :  { %1677 = vmatpush.bf16.msrb.mxu1 %v4639_v24  ;;  %v5343_v24 = vor.u32 %v6818_v13, %v5340_v16  ;;  %v6838_v57 = vld [vmem:[%s10626_s1 + $0x68c] sm:$0xf]  ;;  %v5420_v58 = vld [vmem:[%s10626_s1 + $0x698] sm:$0xf0]  ;;  %v5023_v13 = vor.u32 %v6738_v3, %v5020_v4 }
  0xb6   :  { %1690 = vmatpush.bf16.msrb.mxu2 %v4767_v25  ;;  %v6750_v25 = vld [vmem:[%s10626_s1 + $0x3cc] sm:$0xf]  ;;  %v5423_v6 = vor.u32 %v6838_v57, %v5420_v58  ;;  %v5276_v8 = vld [vmem:[%s10626_s1 + $0x578] sm:$0xf0] }
  0xb7   :  { %v5071_v36 = vor.u32 %v6750_v25, %v5068_v26  ;;  %v6770_v5 = vld [vmem:[%s10626_s1 + $0x46c] sm:$0xf]  ;;  %v5404_v12 = vld [vmem:[%s10626_s1 + $0x678] sm:$0xf0] }
  0xb8   :  { %1703 = vmatpush.bf16.msrb.mxu3 %v4895_v30  ;;  %1665 = vmatpush.bf16.msrb.mxu0 %v5387_v39  ;;  %v5196_v30 = vld [vmem:[%s10626_s1 + $0x4d8] sm:$0xf0]  ;;  %v5327_v39 = vor.u32 %v6814_v31, %v5324_v32  ;;  %v5151_v16 = vor.u32 %v6770_v5, %v5148_v7  ;;  %v6798_v25 = vld [vmem:[%s10626_s1 + $0x54c] sm:$0xf] }
  0xb9   :  { %1678 = vmatpush.bf16.msrb.mxu1 %v4623_v42  ;;  %v5199_v37 = vor.u32 %v6782_v27, %v5196_v30  ;;  %v5052_v42 = vld [vmem:[%s10626_s1 + $0x3b8] sm:$0xf0]  ;;  %v6830_v27 = vld [vmem:[%s10626_s1 + $0x64c] sm:$0xf]  ;;  %v5007_v30 = vor.u32 %v6734_v19, %v5004_v20 }
  0xba   :  { %1691 = vmatpush.bf16.msrb.mxu2 %v4751_v43  ;;  %v6778_v43 = vld [vmem:[%s10626_s1 + $0x4ac] sm:$0xf]  ;;  %v5055_v50 = vor.u32 %v6746_v40, %v5052_v42  ;;  %v5260_v26 = vld [vmem:[%s10626_s1 + $0x558] sm:$0xf0] }
  0xbb   :  { %v5183_v51 = vor.u32 %v6778_v43, %v5180_v45  ;;  %v5388_v28 = vld [vmem:[%s10626_s1 + $0x658] sm:$0xf0]  ;;  %v5263_v35 = vor.u32 %v6798_v25, %v5260_v26  ;;  %v6794_v43 = vld [vmem:[%s10626_s1 + $0x52c] sm:$0xf] }
  0xbc   :  { %1704 = vmatpush.bf16.msrb.mxu3 %v4879_v47  ;;  %1666 = vmatpush.bf16.msrb.mxu0 %v5371_v54  ;;  %v5308_v47 = vld [vmem:[%s10626_s1 + $0x5b8] sm:$0xf0]  ;;  %v5439_v54 = vor.u32 %v6842_v48, %v5436_v49  ;;  %v5391_v40 = vor.u32 %v6830_v27, %v5388_v28  ;;  %v6826_v45 = vld [vmem:[%s10626_s1 + $0x62c] sm:$0xf]  ;;  %v7196_v28 = vmov 8.0  }
  0xbd   :  { %1679 = vmatpush.bf16.msrb.mxu1 %v4607_v60  ;;  %v5311_v52 = vor.u32 %v6810_v46, %v5308_v47  ;;  %v5116_v42 = vld [vmem:[%s10626_s1 + $0x438] sm:$0xf0]  ;;  %7144 = vrcp.f32 %v7196_v28  ;;  %v6947_v28 = vld [vmem:[%s10627_s2 + $0x2ec] sm:$0xf0] }
  0xbe   :  { %1692 = vmatpush.bf16.msrb.mxu2 %v4735_v61  ;;  %v5372_v46 = vld [vmem:[%s10626_s1 + $0x638] sm:$0xf0] }
  0xc0   :  { %1705 = vmatpush.bf16.msrb.mxu3 %v4863_v2  ;;  %1667 = vmatpush.bf16.msrb.mxu0 %v5355_v11  ;;  %v1461_v61 = vpop.f32.mrf.mxu0  ;;  %v6834_v11 = vld [vmem:[%s10626_s1 + $0x66c] sm:$0xf] }
  0xc1   :  { %1680 = vmatpush.bf16.msrb.mxu1 %v4591_v17  ;;  %v1462_v2 = vadd.f32 %v1461_v61, %v8418_v59  ;;  %v6802_v59 = vld [vmem:[%s10626_s1 + $0x56c] sm:$0xf] }
  0xc2   :  { %1693 = vmatpush.bf16.msrb.mxu2 %v4719_v18  ;;  %v5279_v17 = vor.u32 %v6802_v59, %v5276_v8 }
  0xc3   :  { %1668 = vmatmul.bf16.vlgmr.msrb.gmra.mxu0 %v7679_v34  ;;  %v1474_v62 = vpop.f32.mrf.mxu1 }
  0xc4   :  { %1706 = vmatpush.bf16.msrb.mxu3 %v4847_v21  ;;  %1712 = vmatpush.bf16.msra.mxu0 %v5087_v22  ;;  %v1475_v10 = vadd.f32 %v1474_v62, %v1462_v2  ;;  %v6766_v21 = vld [vmem:[%s10626_s1 + $0x44c] sm:$0xf]  ;;  %v5407_v22 = vor.u32 %v6834_v11, %v5404_v12  ;;  %v5359_v62 = vor.u32 %v6822_v55, %v5356_v56 }
  0xc5   :  { %1725 = vmatpush.bf16.msra.mxu1 %v5215_v23  ;;  %1694 = vmatmul.bf16.vlgmr.msrb.gmra.mxu2 %v7524_v15  ;;  %v6742_v15 = vld [vmem:[%s10626_s1 + $0x38c] sm:$0xf] }
  0xc6   :  { %1738 = vmatpush.bf16.msra.mxu2 %v5343_v24  ;;  %1681 = vmatmul.bf16.vlgmr.msrb.gmra.mxu1 %v7522_v14  ;;  %v5164_v14 = vld [vmem:[%s10626_s1 + $0x498] sm:$0xf0]  ;;  %v5039_v60 = vor.u32 %v6742_v15, %v5036_v53  ;;  %v5375_v53 = vor.u32 %v6826_v45, %v5372_v46 }
  0xc7   :  { %1707 = vmatmul.bf16.vlgmr.msrb.gmra.mxu3 %v7499_v1  ;;  %v6774_v1 = vld [vmem:[%s10626_s1 + $0x48c] sm:$0xf]  ;;  %v5132_v24 = vld [vmem:[%s10626_s1 + $0x458] sm:$0xf0] }
  0xc8   :  { %1751 = vmatpush.bf16.msra.mxu3 %v5471_v29  ;;  %1713 = vmatpush.bf16.msra.mxu0 %v5071_v36  ;;  %v5167_v63 = vor.u32 %v6774_v1, %v5164_v14  ;;  %v1487_v18 = vpop.f32.mrf.mxu2  ;;  %v1463_v31 = vpop.f32.mrf.mxu0  ;;  %v5135_v33 = vor.u32 %v6766_v21, %v5132_v24  ;;  %v6730_v36 = vld [vmem:[%s10626_s1 + $0x32c] sm:$0xf]  ;;  %v5100_v1 = vld [vmem:[%s10626_s1 + $0x418] sm:$0xf0] }
  0xc9   :  { %1726 = vmatpush.bf16.msra.mxu1 %v5199_v37  ;;  %v8572_v23 = vadd.f32 %v1487_v18, %v1475_v10  ;;  %v4988_v37 = vld [vmem:[%s10626_s1 + $0x338] sm:$0xf0] }
  0xca   :  { %1739 = vmatpush.bf16.msra.mxu2 %v5327_v39  ;;  %v1500_v29 = vpop.f32.mrf.mxu3  ;;  %v6762_v39 = vld [vmem:[%s10626_s1 + $0x42c] sm:$0xf]  ;;  %v4991_v47 = vor.u32 %v6730_v36, %v4988_v37  ;;  %v5228_v14 = vld [vmem:[%s10626_s1 + $0x518] sm:$0xf0] }
  0xcb   :  { %v1476_v32 = vpop.f32.mrf.mxu1  ;;  %v5119_v48 = vor.u32 %v6762_v39, %v5116_v42  ;;  %v1764_v31 = vrot.slane %v8572_v23, 4 }
  0xcc   :  { %1752 = vmatpush.bf16.msra.mxu3 %v5455_v44  ;;  %1714 = vmatpush.bf16.msra.mxu0 %v5055_v50  ;;  %v5244_v44 = vld [vmem:[%s10626_s1 + $0x538] sm:$0xf0]  ;;  %v6726_v50 = vld [vmem:[%s10626_s1 + $0x30c] sm:$0xf] }
  0xcd   :  { %1727 = vmatpush.bf16.msra.mxu1 %v5183_v51  ;;  %v5247_v49 = vor.u32 %v6794_v43, %v5244_v44  ;;  %v4972_v51 = vld [vmem:[%s10626_s1 + $0x318] sm:$0xf0]  ;;  %v1765_v37 = vadd.f32 %v1764_v31, %v8572_v23 }
  0xce   :  { %1740 = vmatpush.bf16.msra.mxu2 %v5311_v52  ;;  %v6758_v52 = vld [vmem:[%s10626_s1 + $0x40c] sm:$0xf]  ;;  %v4975_v58 = vor.u32 %v6726_v50, %v4972_v51 }
  0xcf   :  { %v1766_v43 = vrot.slane %v1765_v37, 2 }
  0xd0   :  { %1753 = vmatpush.bf16.msra.mxu3 %v5439_v54  ;;  %1715 = vmatpush.bf16.msra.mxu0 %v5039_v60  ;;  %v1489_v15 = vpop.f32.mrf.mxu2  ;;  %v6790_v54 = vld [vmem:[%s10626_s1 + $0x50c] sm:$0xf]  ;;  %v5103_v60 = vor.u32 %v6758_v52, %v5100_v1  ;;  %s4565_s1 = sshll.u32 %s7197_s26, 4  ;;  %s4566_s1 = int_to_ptr.vmem [resolvable:$true] %s4565_s1 }
  0xd1   :  { %1728 = vmatpush.bf16.msra.mxu1 %v5167_v63  ;;  %v5231_v61 = vor.u32 %v6790_v54, %v5228_v14 }
  0xd2   :  { %1741 = vmatpush.bf16.msra.mxu2 %v5295_v0  ;;  %v1502_v57 = vpop.f32.mrf.mxu3 }
  0xd4   :  { %1754 = vmatpush.bf16.msra.mxu3 %v5423_v6  ;;  %1716 = vmatpush.bf16.msra.mxu0 %v5023_v13 }
  0xd5   :  { %1729 = vmatpush.bf16.msra.mxu1 %v5151_v16 }
  0xd6   :  { %1742 = vmatpush.bf16.msra.mxu2 %v5279_v17 }
  0xd8   :  { %1755 = vmatpush.bf16.msra.mxu3 %v5407_v22  ;;  %1717 = vmatpush.bf16.msra.mxu0 %v5007_v30 }
  0xd9   :  { %1730 = vmatpush.bf16.msra.mxu1 %v5135_v33  ;;  %v7145_v33 = vpop.eup %7144 }
  0xda   :  { %1743 = vmatpush.bf16.msra.mxu2 %v5263_v35  ;;  %v1789_v39 = vmul.f32 8.0, %v7145_v33  ;;  %vm1793_vm0 = vweird.f32 %v7145_v33 }
  0xdc   :  { %1756 = vmatpush.bf16.msra.mxu3 %v5391_v40  ;;  %1718 = vmatpush.bf16.msra.mxu0 %v4991_v47  ;;  %v1790_v44 = vsub.f32 1.0, %v1789_v39  ;;  %v1767_v47 = vadd.f32 %v1766_v43, %v1765_v37 }
  0xdd   :  { %1731 = vmatpush.bf16.msra.mxu1 %v5119_v48 }
  0xde   :  { %1744 = vmatpush.bf16.msra.mxu2 %v5247_v49  ;;  %v1791_v48 = vmul.f32 %v7145_v33, %v1790_v44  ;;  %v1768_v52 = vrot.slane %v1767_v47, 1 }
  0xe0   :  { %1757 = vmatpush.bf16.msra.mxu3 %v5375_v53  ;;  %1719 = vmatpush.bf16.msra.mxu0 %v4975_v58  ;;  %v1513_v63 = vpop.f32.mrf.mxu0  ;;  %v1792_v53 = vadd.f32 %v7145_v33, %v1791_v48  ;;  %v1769_v55 = vadd.f32 %v1768_v52, %v1767_v47  ;;  %v5827_v47 = vld [vmem:[%s10627_s2 + $0x2c0] sm:$0xf]  ;;  %v6975_v52 = vld [vmem:[%s10627_s2 + $0x3cc] sm:$0xf0] }
  0xe1   :  { %1732 = vmatpush.bf16.msra.mxu1 %v5103_v60  ;;  %v1514_v0 = vadd.f32 %v1513_v63, %v1500_v29 }
  0xe2   :  { %1745 = vmatpush.bf16.msra.mxu2 %v5231_v61  ;;  %v8651_v57 = vsel %vm1793_vm0, %v7145_v33, %v1792_v53 }
  0xe3   :  { %1720 = vmatmul.bf16.vlgmr.msra.gmra.mxu0 %v7511_v9  ;;  %v1526_v2 = vpop.f32.mrf.mxu1 }
  0xe4   :  { %1758 = vmatpush.bf16.msra.mxu3 %v5359_v62  ;;  %1733 = vmatmul.bf16.vlgmr.msra.gmra.mxu1 %v7690_v38  ;;  %v1527_v3 = vadd.f32 %v1526_v2, %v1514_v0  ;;  %v8657_v0 = vmul.f32 %v8651_v57, %v1769_v55  ;;  %v5555_v55 = vld [vmem:[%s10627_s2 + $0xa0] sm:$0xf] }
  0xe5   :  { %1746 = vmatmul.bf16.vlgmr.msra.gmra.mxu2 %v7698_v41 }
  0xe7   :  { %1759 = vmatmul.bf16.vlgmr.msra.gmra.mxu3 %v7679_v34 }
  0xe8   :  { %v1539_v4 = vpop.f32.mrf.mxu2  ;;  %v1515_v59 = vpop.f32.mrf.mxu0 }
  0xe9   :  { %v1540_v5 = vadd.f32 %v1539_v4, %v1527_v3 }
  0xea   :  { %v1552_v6 = vpop.f32.mrf.mxu3 }
  0xeb   :  { %v1553_v7 = vadd.f32 %v1552_v6, %v1540_v5  ;;  %v1528_v8 = vpop.f32.mrf.mxu1  ;;  %v1799_v6 = vsub.f32 %v8572_v23, %v8657_v0 }
  0xf0   :  { %v1541_v10 = vpop.f32.mrf.mxu2 }
  0xf2   :  { %v1554_v11 = vpop.f32.mrf.mxu3 }
 0x100   :  { %v1565_v12 = vpop.f32.mrf.mxu0 }
 0x101   :  { %v1566_v9 = vadd.f32 %v1565_v12, %v1553_v7  ;;  %v1803_v12 = vmul.f32 %v1799_v6, %v1799_v6  ;;  %v5939_v6 = vld [vmem:[%s10627_s2 + $0x3a0] sm:$0xf] }
 0x103   :  { %v1578_v13 = vpop.f32.mrf.mxu1 }
 0x104   :  { %v8641_v38 = vadd.f32 %v1578_v13, %v1566_v9 }
 0x106   :  { %v1770_v29 = vrot.slane %v8641_v38, 4 }
 0x108   :  { %v1591_v41 = vpop.f32.mrf.mxu2  ;;  %v1567_v34 = vpop.f32.mrf.mxu0  ;;  %v1771_v36 = vadd.f32 %v1770_v29, %v8641_v38  ;;  %v5971_v29 = vld [vmem:[%s10627_s2 + $0x3e0] sm:$0xf] }
 0x10a   :  { %v1604_v16 = vpop.f32.mrf.mxu3  ;;  %v1772_v42 = vrot.slane %v1771_v36, 2 }
 0x10b   :  { %v1605_v17 = vadd.f32 %v1604_v16, %v1591_v41  ;;  %v1580_v18 = vpop.f32.mrf.mxu1  ;;  %v1807_v16 = vrot.slane %v1803_v12, 4 }
 0x10c   :  { %v1773_v46 = vadd.f32 %v1772_v42, %v1771_v36  ;;  %v6879_v42 = vld [vmem:[%s10627_s2 + $0xcc] sm:$0xf0] }
 0x10d   :  { %v1808_v18 = vadd.f32 %v1807_v16, %v1803_v12 }
 0x10e   :  { %v1774_v50 = vrot.slane %v1773_v46, 1 }
 0x10f   :  { %v1809_v36 = vrot.slane %v1808_v18, 2 }
 0x110   :  { %v1593_v19 = vpop.f32.mrf.mxu2  ;;  %v1775_v14 = vadd.f32 %v1774_v50, %v1773_v46  ;;  %v6911_v46 = vld [vmem:[%s10627_s2 + $0x1cc] sm:$0xf0] }
 0x111   :  { %v6943_v50 = vld [vmem:[%s10627_s2 + $0x2cc] sm:$0xf0] }
 0x112   :  { %v1606_v20 = vpop.f32.mrf.mxu3  ;;  %v8654_v62 = vmul.f32 %v8651_v57, %v1775_v14 }
 0x113   :  { %v5587_v20 = vld [vmem:[%s10627_s2 + $0xe0] sm:$0xf] }
 0x114   :  { %v1800_v5 = vsub.f32 %v8641_v38, %v8654_v62 }
 0x116   :  { %v1804_v11 = vmul.f32 %v1800_v5, %v1800_v5 }
 0x118   :  { %v1813_v13 = vrot.slane %v1804_v11, 4 }
 0x11a   :  { %v1814_v34 = vadd.f32 %v1813_v13, %v1804_v11 }
 0x11c   :  { %v1815_v31 = vrot.slane %v1814_v34, 2 }
 0x11e   :  { %v1816_v53 = vadd.f32 %v1815_v31, %v1814_v34  ;;  %v5539_v34 = vld [vmem:[%s10627_s2 + $0x80] sm:$0xf] }
 0x120   :  { %v1617_v21 = vpop.f32.mrf.mxu0 }
 0x121   :  { %v1618_v35 = vadd.f32 %v1617_v21, %v1605_v17  ;;  %v6883_v21 = vld [vmem:[%s10627_s2 + $0xec] sm:$0xf0] }
 0x123   :  { %v1630_v22 = vpop.f32.mrf.mxu1 }
 0x124   :  { %v1631_v40 = vadd.f32 %v1630_v22, %v1618_v35  ;;  %v5588_v22 = vor.u32 %v6883_v21, %v5587_v20  ;;  %v6903_v21 = vld [vmem:[%s10627_s2 + $0x18c] sm:$0xf0] }
 0x126   :  { %2715 = vmatpush.bf16.msrb.mxu0 %v5588_v22  ;;  %v5795_v22 = vld [vmem:[%s10627_s2 + $0x280] sm:$0xf] }
 0x128   :  { %v1643_v24 = vpop.f32.mrf.mxu2  ;;  %v1619_v26 = vpop.f32.mrf.mxu0 }
 0x129   :  { %v1644_v45 = vadd.f32 %v1643_v24, %v1631_v40  ;;  %v5715_v24 = vld [vmem:[%s10627_s2 + $0x1e0] sm:$0xf] }
 0x12a   :  { %v1656_v25 = vpop.f32.mrf.mxu3  ;;  %v5843_v26 = vld [vmem:[%s10627_s2 + $0x2e0] sm:$0xf] }
 0x12b   :  { %v1632_v27 = vpop.f32.mrf.mxu1  ;;  %v1657_v49 = vadd.f32 %v1656_v25, %v1644_v45  ;;  %v6915_v25 = vld [vmem:[%s10627_s2 + $0x1ec] sm:$0xf0]  ;;  %v5844_v33 = vor.u32 %v6947_v28, %v5843_v26  ;;  %v5571_v40 = vld [vmem:[%s10627_s2 + $0xc0] sm:$0xf] }
 0x12c   :  { %v5716_v27 = vor.u32 %v6915_v25, %v5715_v24  ;;  %v5572_v44 = vor.u32 %v6879_v42, %v5571_v40  ;;  %v5699_v45 = vld [vmem:[%s10627_s2 + $0x1c0] sm:$0xf]  ;;  %v6935_v24 = vld [vmem:[%s10627_s2 + $0x28c] sm:$0xf0] }
 0x12d   :  { %2741 = vmatpush.bf16.msrb.mxu2 %v5844_v33  ;;  %v5923_v28 = vld [vmem:[%s10627_s2 + $0x380] sm:$0xf]  ;;  %v6899_v42 = vld [vmem:[%s10627_s2 + $0x16c] sm:$0xf0] }
 0x12e   :  { %2728 = vmatpush.bf16.msrb.mxu1 %v5716_v27  ;;  %2716 = vmatpush.bf16.msrb.mxu0 %v5572_v44  ;;  %v5796_v27 = vor.u32 %v6935_v24, %v5795_v22  ;;  %v5651_v40 = vld [vmem:[%s10627_s2 + $0x160] sm:$0xf] }
 0x12f   :  { %v5875_v22 = vld [vmem:[%s10627_s2 + $0x320] sm:$0xf] }
 0x130   :  { %v1645_v30 = vpop.f32.mrf.mxu2 }
 0x131   :  { %v6979_v30 = vld [vmem:[%s10627_s2 + $0x3ec] sm:$0xf0] }
 0x132   :  { %v1658_v32 = vpop.f32.mrf.mxu3  ;;  %v5972_v35 = vor.u32 %v6979_v30, %v5971_v29  ;;  %v6967_v30 = vld [vmem:[%s10627_s2 + $0x38c] sm:$0xf0] }
 0x133   :  { %v5924_v33 = vor.u32 %v6967_v30, %v5923_v28  ;;  %v5475_v30 = vld [vmem:[%s10627_s2] sm:$0xf] }
 0x134   :  { %2754 = vmatpush.bf16.msrb.mxu3 %v5972_v35  ;;  %v5523_v35 = vld [vmem:[%s10627_s2 + $0x60] sm:$0xf] }
 0x140   :  { %v1669_v51 = vpop.f32.mrf.mxu0 }
 0x141   :  { %v8647_v15 = vadd.f32 %v1669_v51, %v1657_v49  ;;  %v5700_v49 = vor.u32 %v6911_v46, %v5699_v45  ;;  %v5955_v51 = vld [vmem:[%s10627_s2 + $0x3c0] sm:$0xf]  ;;  %v5652_v45 = vor.u32 %v6899_v42, %v5651_v40  ;;  %v6931_v46 = vld [vmem:[%s10627_s2 + $0x26c] sm:$0xf0] }
 0x142   :  { %v5956_v14 = vor.u32 %v6975_v52, %v5955_v51 }
 0x143   :  { %v1682_v1 = vpop.f32.mrf.mxu1  ;;  %v1776_v54 = vrot.slane %v8647_v15, 4  ;;  %2729 = vmatpush.bf16.msrb.mxu1 %v5700_v49 }
 0x144   :  { %2755 = vmatpush.bf16.msrb.mxu3 %v5956_v14  ;;  %v6863_v14 = vld [vmem:[%s10627_s2 + $0x4c] sm:$0xf0] }
 0x145   :  { %v1777_v56 = vadd.f32 %v1776_v54, %v8647_v15  ;;  %v5828_v54 = vor.u32 %v6943_v50, %v5827_v47  ;;  %v5907_v47 = vld [vmem:[%s10627_s2 + $0x360] sm:$0xf] }
 0x147   :  { %v1778_v58 = vrot.slane %v1777_v56, 2  ;;  %2742 = vmatpush.bf16.msrb.mxu2 %v5828_v54  ;;  %v5507_v54 = vld [vmem:[%s10627_s2 + $0x40] sm:$0xf] }
 0x148   :  { %v1695_v60 = vpop.f32.mrf.mxu2  ;;  %v1671_v63 = vpop.f32.mrf.mxu0 }
 0x149   :  { %v1779_v2 = vadd.f32 %v1778_v58, %v1777_v56  ;;  %v1696_v19 = vadd.f32 %v1695_v60, %v1682_v1  ;;  %v6875_v56 = vld [vmem:[%s10627_s2 + $0xac] sm:$0xf0]  ;;  %v5683_v58 = vld [vmem:[%s10627_s2 + $0x1a0] sm:$0xf] }
 0x14a   :  { %v1708_v61 = vpop.f32.mrf.mxu3  ;;  %v5556_v60 = vor.u32 %v6875_v56, %v5555_v55  ;;  %v5811_v63 = vld [vmem:[%s10627_s2 + $0x2a0] sm:$0xf]  ;;  %v5508_v56 = vor.u32 %v6863_v14, %v5507_v54 }
 0x14b   :  { %v1684_v3 = vpop.f32.mrf.mxu1  ;;  %v1780_v4 = vrot.slane %v1779_v2, 1  ;;  %v1709_v37 = vadd.f32 %v1708_v61, %v1696_v19  ;;  %v6907_v61 = vld [vmem:[%s10627_s2 + $0x1ac] sm:$0xf0] }
 0x14c   :  { %2717 = vmatpush.bf16.msrb.mxu0 %v5556_v60  ;;  %v6895_v60 = vld [vmem:[%s10627_s2 + $0x14c] sm:$0xf0] }
 0x14d   :  { %v1781_v7 = vadd.f32 %v1780_v4, %v1779_v2  ;;  %v6939_v2 = vld [vmem:[%s10627_s2 + $0x2ac] sm:$0xf0]  ;;  %v5684_v4 = vor.u32 %v6907_v61, %v5683_v58  ;;  %v5635_v58 = vld [vmem:[%s10627_s2 + $0x140] sm:$0xf] }
 0x14e   :  { %v5812_v5 = vor.u32 %v6939_v2, %v5811_v63  ;;  %v5763_v61 = vld [vmem:[%s10627_s2 + $0x240] sm:$0xf] }
 0x14f   :  { %v8664_v59 = vmul.f32 %v8651_v57, %v1781_v7  ;;  %v6971_v7 = vld [vmem:[%s10627_s2 + $0x3ac] sm:$0xf0]  ;;  %2730 = vmatpush.bf16.msrb.mxu1 %v5684_v4 }
 0x150   :  { %v1697_v8 = vpop.f32.mrf.mxu2  ;;  %v5940_v12 = vor.u32 %v6971_v7, %v5939_v6  ;;  %2743 = vmatpush.bf16.msrb.mxu2 %v5812_v5  ;;  %v6927_v4 = vld [vmem:[%s10627_s2 + $0x24c] sm:$0xf0]  ;;  %v5891_v5 = vld [vmem:[%s10627_s2 + $0x340] sm:$0xf] }
 0x151   :  { %v1801_v9 = vsub.f32 %v8647_v15, %v8664_v59  ;;  %v1810_v8 = vadd.f32 %v1809_v36, %v1808_v18  ;;  %v5667_v18 = vld [vmem:[%s10627_s2 + $0x180] sm:$0xf]  ;;  %v6867_v36 = vld [vmem:[%s10627_s2 + $0x6c] sm:$0xf0] }
 0x152   :  { %v1710_v10 = vpop.f32.mrf.mxu3  ;;  %2756 = vmatpush.bf16.msrb.mxu3 %v5940_v12  ;;  %v5668_v26 = vor.u32 %v6903_v21, %v5667_v18  ;;  %v6959_v6 = vld [vmem:[%s10627_s2 + $0x34c] sm:$0xf0]  ;;  %v5491_v12 = vld [vmem:[%s10627_s2 + $0x20] sm:$0xf] }
 0x153   :  { %v1805_v41 = vmul.f32 %v1801_v9, %v1801_v9  ;;  %v1817_v10 = vrot.slane %v1816_v53, 1  ;;  %v1811_v29 = vrot.slane %v1810_v8, 1  ;;  %v6923_v21 = vld [vmem:[%s10627_s2 + $0x22c] sm:$0xf0] }
 0x154   :  { %2731 = vmatpush.bf16.msrb.mxu1 %v5668_v26  ;;  %2744 = vmatpush.bf16.msrb.mxu2 %v5796_v27  ;;  %v6955_v27 = vld [vmem:[%s10627_s2 + $0x32c] sm:$0xf0] }
 0x155   :  { %v1819_v17 = vrot.slane %v1805_v41, 4  ;;  %v1812_v49 = vadd.f32 %v1811_v29, %v1810_v8  ;;  %v5764_v8 = vor.u32 %v6927_v4, %v5763_v61  ;;  %v5876_v29 = vor.u32 %v6955_v27, %v5875_v22  ;;  %v5813_v27 = vld [vmem:[%s10627_s2 + $0x2b0] sm:$0xf0] }
 0x156   :  { %2757 = vmatpush.bf16.msrb.mxu3 %v5924_v33 }
 0x157   :  { %v1820_v32 = vadd.f32 %v1819_v17, %v1805_v41  ;;  %v6871_v17 = vld [vmem:[%s10627_s2 + $0x8c] sm:$0xf0]  ;;  %v1831_v7 = vmul.f32 %v1812_v49, %v8651_v57  ;;  %v6913_v49 = vld [vmem:[%s10627_s2 + $0x1e4] sm:$0xf] }
 0x158   :  { %v5540_v20 = vor.u32 %v6871_v17, %v5539_v34  ;;  %2732 = vmatpush.bf16.msrb.mxu1 %v5652_v45  ;;  %v6891_v34 = vld [vmem:[%s10627_s2 + $0x12c] sm:$0xf0] }
 0x159   :  { %v1821_v1 = vrot.slane %v1820_v32, 2  ;;  %v8842_v24 = vadd.f32 0.0001, %v1831_v7  ;;  %v6951_v45 = vld [vmem:[%s10627_s2 + $0x30c] sm:$0xf0] }
 0x15a   :  { %2718 = vmatpush.bf16.msrb.mxu0 %v5540_v20  ;;  %v5747_v20 = vld [vmem:[%s10627_s2 + $0x220] sm:$0xf]  ;;  %v5829_v7 = vld [vmem:[%s10627_s2 + $0x2d0] sm:$0xf0] }
 0x15b   :  { %v1822_v9 = vadd.f32 %v1821_v1, %v1820_v32  ;;  %v5748_v26 = vor.u32 %v6923_v21, %v5747_v20  ;;  %v5685_v20 = vld [vmem:[%s10627_s2 + $0x1b0] sm:$0xf0]  ;;  %v6937_v21 = vld [vmem:[%s10627_s2 + $0x2a4] sm:$0xf]  ;;  %vm1848_vm11 = vweird.f32 %v8842_v24 }
 0x15d   :  { %v1823_v31 = vrot.slane %v1822_v9, 1 }
 0x15f   :  { %v1824_v63 = vadd.f32 %v1823_v31, %v1822_v9  ;;  %v6859_v9 = vld [vmem:[%s10627_s2 + $0x2c] sm:$0xf0] }
 0x160   :  { %v1721_v39 = vpop.f32.mrf.mxu0  ;;  %v6855_v31 = vld [vmem:[%s10627_s2 + $0xc] sm:$0xf0] }
 0x161   :  { %v1734_v43 = vpop.f32.mrf.mxu1  ;;  %v1722_v48 = vadd.f32 %v1721_v39, %v1709_v37  ;;  %v1818_v37 = vadd.f32 %v1817_v10, %v1816_v53  ;;  %v5524_v39 = vor.u32 %v6867_v36, %v5523_v35  ;;  %v5892_v10 = vor.u32 %v6959_v6, %v5891_v5  ;;  %v6887_v35 = vld [vmem:[%s10627_s2 + $0x10c] sm:$0xf0]  ;;  %v5731_v36 = vld [vmem:[%s10627_s2 + $0x200] sm:$0xf]  ;;  %v5701_v5 = vld [vmem:[%s10627_s2 + $0x1d0] sm:$0xf0] }
 0x162   :  { %v1833_v17 = vmul.f32 %v1824_v63, %v8651_v57  ;;  %v5476_v33 = vor.u32 %v6855_v31, %v5475_v30  ;;  %v5573_v63 = vld [vmem:[%s10627_s2 + $0xd0] sm:$0xf0]  ;;  %v6941_v6 = vld [vmem:[%s10627_s2 + $0x2c4] sm:$0xf] }
 0x163   :  { %v1735_v3 = vadd.f32 %v1734_v43, %v1722_v48  ;;  %v5779_v43 = vld [vmem:[%s10627_s2 + $0x260] sm:$0xf]  ;;  %v6963_v48 = vld [vmem:[%s10627_s2 + $0x36c] sm:$0xf0]  ;;  %2719 = vmatpush.bf16.msrb.mxu0 %v5524_v39  ;;  %v1832_v55 = vmul.f32 %v1818_v37, %v8651_v57  ;;  %v5941_v30 = vld [vmem:[%s10627_s2 + $0x3b0] sm:$0xf0] }
 0x164   :  { %v5780_v51 = vor.u32 %v6931_v46, %v5779_v43  ;;  %v5908_v52 = vor.u32 %v6963_v48, %v5907_v47  ;;  %v6919_v37 = vld [vmem:[%s10627_s2 + $0x20c] sm:$0xf0]  ;;  %v8869_v39 = vadd.f32 0.0001, %v1833_v17  ;;  %v6881_v47 = vld [vmem:[%s10627_s2 + $0xe4] sm:$0xf] }
 0x165   :  { %v5732_v43 = vor.u32 %v6919_v37, %v5731_v36  ;;  %v5589_v48 = vld [vmem:[%s10627_s2 + $0xf0] sm:$0xf0]  ;;  %v6905_v17 = vld [vmem:[%s10627_s2 + $0x1a4] sm:$0xf] }
 0x166   :  { %2745 = vmatpush.bf16.msrb.mxu2 %v5780_v51  ;;  %2758 = vmatpush.bf16.msrb.mxu3 %v5908_v52  ;;  %v5592_v51 = vor.u32 %v6881_v47, %v5589_v48  ;;  %v5717_v52 = vld [vmem:[%s10627_s2 + $0x1f0] sm:$0xf0]  ;;  %v6901_v37 = vld [vmem:[%s10627_s2 + $0x184] sm:$0xf]  ;;  %vm1868_vm5 = vweird.f32 %v8869_v39 }
 0x167   :  { %2720 = vmatpush.bf16.msrb.mxu0 %v5508_v56  ;;  %v5720_v54 = vor.u32 %v6913_v49, %v5717_v52  ;;  %v5973_v56 = vld [vmem:[%s10627_s2 + $0x3f0] sm:$0xf0] }
 0x168   :  { %v1747_v11 = vpop.f32.mrf.mxu2  ;;  %v1723_v16 = vpop.f32.mrf.mxu0  ;;  %v5541_v36 = vld [vmem:[%s10627_s2 + $0x90] sm:$0xf0] }
 0x169   :  { %v1748_v13 = vadd.f32 %v1747_v11, %v1735_v3  ;;  %v1736_v19 = vpop.f32.mrf.mxu1  ;;  %v5636_v3 = vor.u32 %v6895_v60, %v5635_v58  ;;  %v5619_v16 = vld [vmem:[%s10627_s2 + $0x120] sm:$0xf]  ;;  %v6877_v58 = vld [vmem:[%s10627_s2 + $0xc4] sm:$0xf]  ;;  %v5797_v49 = vld [vmem:[%s10627_s2 + $0x290] sm:$0xf0] }
 0x16a   :  { %v1760_v41 = vpop.f32.mrf.mxu3  ;;  %2746 = vmatpush.bf16.msrb.mxu2 %v5764_v8  ;;  %2759 = vmatpush.bf16.msrb.mxu3 %v5892_v10  ;;  %v5620_v19 = vor.u32 %v6891_v34, %v5619_v16  ;;  %v5576_v4 = vor.u32 %v6877_v58, %v5573_v63  ;;  %v6873_v16 = vld [vmem:[%s10627_s2 + $0xa4] sm:$0xf]  ;;  %v5557_v34 = vld [vmem:[%s10627_s2 + $0xb0] sm:$0xf0] }
 0x16b   :  { %v8758_v25 = vadd.f32 %v1760_v41, %v1748_v13  ;;  %2733 = vmatpush.bf16.msrb.mxu1 %v5636_v3  ;;  %v8824_v13 = vadd.f32 0.0001, %v1832_v55  ;;  %v5492_v41 = vor.u32 %v6859_v9, %v5491_v12  ;;  %v6977_v55 = vld [vmem:[%s10627_s2 + $0x3e4] sm:$0xf]  ;;  %v5957_v9 = vld [vmem:[%s10627_s2 + $0x3d0] sm:$0xf0] }
 0x16c   :  { %v5976_v61 = vor.u32 %v6977_v55, %v5973_v56  ;;  %v6973_v12 = vld [vmem:[%s10627_s2 + $0x3c4] sm:$0xf]  ;;  %v5525_v55 = vld [vmem:[%s10627_s2 + $0x70] sm:$0xf0] }
 0x16d   :  { %v1782_v32 = vrot.slane %v8758_v25, 4  ;;  %2721 = vmatpush.bf16.msrb.mxu0 %v5492_v41  ;;  %7146 = vrsqrt.f32 %v8824_v13  ;;  %v5960_v41 = vor.u32 %v6973_v12, %v5957_v9  ;;  %v6897_v56 = vld [vmem:[%s10627_s2 + $0x164] sm:$0xf]  ;;  %v5653_v63 = vld [vmem:[%s10627_s2 + $0x170] sm:$0xf0]  ;;  %vm1858_vm2 = vweird.f32 %v8824_v13 }
 0x16e   :  { %2747 = vmatpush.bf16.msrb.mxu2 %v5748_v26  ;;  %2760 = vmatpush.bf16.msrb.mxu3 %v5876_v29  ;;  %7148 = vrsqrt.f32 %v8869_v39  ;;  %v5688_v26 = vor.u32 %v6905_v17, %v5685_v20  ;;  %v6969_v29 = vld [vmem:[%s10627_s2 + $0x3a4] sm:$0xf]  ;;  %v5637_v17 = vld [vmem:[%s10627_s2 + $0x150] sm:$0xf0] }
 0x16f   :  { %v1783_v44 = vadd.f32 %v1782_v32, %v8758_v25  ;;  %2734 = vmatpush.bf16.msrb.mxu1 %v5620_v19  ;;  %v5603_v32 = vld [vmem:[%s10627_s2 + $0x100] sm:$0xf]  ;;  %7150 = vrsqrt.f32 %v8842_v24  ;;  %v5560_v19 = vor.u32 %v6873_v16, %v5557_v34  ;;  %v6861_v9 = vld [vmem:[%s10627_s2 + $0x44] sm:$0xf] }
 0x170   :  { %v1749_v50 = vpop.f32.mrf.mxu2  ;;  %v5604_v42 = vor.u32 %v6887_v35, %v5603_v32  ;;  %v5816_v32 = vor.u32 %v6937_v21, %v5813_v27  ;;  %v6869_v35 = vld [vmem:[%s10627_s2 + $0x84] sm:$0xf]  ;;  %v5765_v21 = vld [vmem:[%s10627_s2 + $0x250] sm:$0xf0] }
 0x171   :  { %v1784_v53 = vrot.slane %v1783_v44, 2  ;;  %2722 = vmatpush.bf16.msrb.mxu0 %v5476_v33  ;;  %v5944_v33 = vor.u32 %v6969_v29, %v5941_v30  ;;  %v6893_v34 = vld [vmem:[%s10627_s2 + $0x144] sm:$0xf] }
 0x172   :  { %v1762_v1 = vpop.f32.mrf.mxu3  ;;  %2748 = vmatpush.bf16.msrb.mxu2 %v5732_v43  ;;  %v5544_v43 = vor.u32 %v6869_v35, %v5541_v36  ;;  %v5640_v27 = vor.u32 %v6893_v34, %v5637_v17  ;;  %v6857_v30 = vld [vmem:[%s10627_s2 + $0x24] sm:$0xf]  ;;  %v5621_v35 = vld [vmem:[%s10627_s2 + $0x130] sm:$0xf0] }
 0x173   :  { %v1785_v2 = vadd.f32 %v1784_v53, %v1783_v44  ;;  %v5859_v44 = vld [vmem:[%s10627_s2 + $0x300] sm:$0xf]  ;;  %2735 = vmatpush.bf16.msrb.mxu1 %v5604_v42  ;;  %v6945_v53 = vld [vmem:[%s10627_s2 + $0x2e4] sm:$0xf]  ;;  %v5845_v1 = vld [vmem:[%s10627_s2 + $0x2f0] sm:$0xf0]  ;;  %v8912_v3 = vpop.eup %7146 }
 0x174   :  { %v5860_v46 = vor.u32 %v6951_v45, %v5859_v44  ;;  %v5848_v14 = vor.u32 %v6945_v53, %v5845_v1  ;;  %v1853_v22 = vmul.f32 %v8912_v3, %v8824_v13  ;;  %v5669_v44 = vld [vmem:[%s10627_s2 + $0x190] sm:$0xf0]  ;;  %v6933_v45 = vld [vmem:[%s10627_s2 + $0x284] sm:$0xf]  ;;  %vm1859_vm1 = vweird.f32 %v8912_v3 }
 0x175   :  { %v1786_v11 = vrot.slane %v1785_v2, 1  ;;  %2767 = vmatpush.bf16.msra.mxu0 %v5592_v51  ;;  %v5672_v48 = vor.u32 %v6901_v37, %v5669_v44  ;;  %v5925_v51 = vld [vmem:[%s10627_s2 + $0x390] sm:$0xf0]  ;;  %v5800_v53 = vor.u32 %v6933_v45, %v5797_v49  ;;  %v6921_v36 = vld [vmem:[%s10627_s2 + $0x224] sm:$0xf]  ;;  %vm1860_vm4 = vmor %vm1858_vm2, %vm1859_vm1 }
 0x176   :  { %2761 = vmatpush.bf16.msrb.mxu3 %v5860_v46  ;;  %2793 = vmatpush.bf16.msra.mxu2 %v5848_v14  ;;  %v1854_v47 = vmul.f32 %v8912_v3, %v1853_v22  ;;  %v6865_v14 = vld [vmem:[%s10627_s2 + $0x64] sm:$0xf]  ;;  %v5749_v37 = vld [vmem:[%s10627_s2 + $0x230] sm:$0xf0] }
 0x177   :  { %v1787_v18 = vadd.f32 %v1786_v11, %v1785_v2  ;;  %v6909_v2 = vld [vmem:[%s10627_s2 + $0x1c4] sm:$0xf]  ;;  %2780 = vmatpush.bf16.msra.mxu1 %v5720_v54  ;;  %v5832_v11 = vor.u32 %v6941_v6, %v5829_v7  ;;  %v5656_v6 = vor.u32 %v6897_v56, %v5653_v63  ;;  %v5877_v44 = vld [vmem:[%s10627_s2 + $0x330] sm:$0xf0] }
 0x178   :  { %v5704_v10 = vor.u32 %v6909_v2, %v5701_v5  ;;  %v6929_v2 = vld [vmem:[%s10627_s2 + $0x264] sm:$0xf]  ;;  %v1855_v5 = vmul.f32 0.5, %v1854_v47  ;;  %v5733_v56 = vld [vmem:[%s10627_s2 + $0x210] sm:$0xf0] }
 0x179   :  { %v8848_v28 = vmul.f32 %v8651_v57, %v1787_v18  ;;  %2768 = vmatpush.bf16.msra.mxu0 %v5576_v4  ;;  %v5781_v4 = vld [vmem:[%s10627_s2 + $0x270] sm:$0xf0]  ;;  %v6957_v22 = vld [vmem:[%s10627_s2 + $0x344] sm:$0xf] }
 0x17a   :  { %2806 = vmatpush.bf16.msra.mxu3 %v5976_v61  ;;  %2794 = vmatpush.bf16.msra.mxu2 %v5832_v11  ;;  %v5528_v61 = vor.u32 %v6865_v14, %v5525_v55  ;;  %v5784_v7 = vor.u32 %v6929_v2, %v5781_v4  ;;  %v1856_v47 = vsub.f32 1.5, %v1855_v5  ;;  %v5605_v14 = vld [vmem:[%s10627_s2 + $0x110] sm:$0xf0]  ;;  %v6917_v55 = vld [vmem:[%s10627_s2 + $0x204] sm:$0xf] }
 0x17b   :  { %v1802_v40 = vsub.f32 %v8758_v25, %v8848_v28  ;;  %2781 = vmatpush.bf16.msra.mxu1 %v5704_v10  ;;  %v5909_v10 = vld [vmem:[%s10627_s2 + $0x370] sm:$0xf0] }
 0x17c   :  { %v5861_v63 = vld [vmem:[%s10627_s2 + $0x310] sm:$0xf0]  ;;  %v1857_v2 = vmul.f32 %v8912_v3, %v1856_v47 }
 0x17d   :  { %v1806_v50 = vmul.f32 %v1802_v40, %v1802_v40  ;;  %v8966_v40 = vpop.eup %7148  ;;  %2769 = vmatpush.bf16.msra.mxu0 %v5560_v19 }
 0x17e   :  { %2807 = vmatpush.bf16.msra.mxu3 %v5960_v41  ;;  %v8974_v46 = vpop.eup %7150  ;;  %2795 = vmatpush.bf16.msra.mxu2 %v5816_v32  ;;  %v1863_v54 = vmul.f32 %v8966_v40, %v8869_v39  ;;  %v5509_v41 = vld [vmem:[%s10627_s2 + $0x50] sm:$0xf0]  ;;  %v6889_v32 = vld [vmem:[%s10627_s2 + $0x124] sm:$0xf]  ;;  %vm1869_vm3 = vweird.f32 %v8966_v40 }
 0x17f   :  { %v1825_v60 = vrot.slane %v1806_v50, 4  ;;  %2782 = vmatpush.bf16.msra.mxu1 %v5688_v26  ;;  %v1843_v58 = vmul.f32 %v8974_v46, %v8842_v24  ;;  %v5512_v20 = vor.u32 %v6861_v9, %v5509_v41  ;;  %v5893_v26 = vld [vmem:[%s10627_s2 + $0x350] sm:$0xf0]  ;;  %v5624_v49 = vor.u32 %v6889_v32, %v5621_v35  ;;  %vm1870_vm8 = vmor %vm1868_vm5, %vm1869_vm3 }
 0x180   :  { %v1864_v16 = vmul.f32 %v8966_v40, %v1863_v54  ;;  %v1861_v41 = vsel %vm1860_vm4, %v8912_v3, %v1857_v2  ;;  %vm1849_vm7 = vweird.f32 %v8974_v46  ;;  %v6980_v2 = vld [vmem:[%s10627_s2 + $0x3f4] sm:$0xf0] }
 0x181   :  { %v1826_v8 = vadd.f32 %v1825_v60, %v1806_v50  ;;  %v6965_v50 = vld [vmem:[%s10627_s2 + $0x384] sm:$0xf]  ;;  %2770 = vmatpush.bf16.msra.mxu0 %v5544_v43  ;;  %v1844_v19 = vmul.f32 %v8974_v46, %v1843_v58  ;;  %vm1850_vm14 = vmor %vm1848_vm11, %vm1849_vm7 }
 0x182   :  { %2808 = vmatpush.bf16.msra.mxu3 %v5944_v33  ;;  %v5928_v1 = vor.u32 %v6965_v50, %v5925_v51  ;;  %2796 = vmatpush.bf16.msra.mxu2 %v5800_v53  ;;  %v5896_v33 = vor.u32 %v6957_v22, %v5893_v26  ;;  %v6953_v43 = vld [vmem:[%s10627_s2 + $0x324] sm:$0xf]  ;;  %v5752_v50 = vor.u32 %v6921_v36, %v5749_v37 }
 0x183   :  { %v1827_v18 = vrot.slane %v1826_v8, 2  ;;  %2783 = vmatpush.bf16.msra.mxu1 %v5672_v48  ;;  %v1845_v45 = vmul.f32 0.5, %v1844_v19  ;;  %v6853_v51 = vld [vmem:[%s10627_s2 + $0x4] sm:$0xf]  ;;  %v5880_v54 = vor.u32 %v6953_v43, %v5877_v44 }
 0x184   :  { %v6885_v53 = vld [vmem:[%s10627_s2 + $0x104] sm:$0xf]  ;;  %v5472_v43 = vld [vmem:[%s10630_s5 + $0x1] ss:$8 sm:$0xf] }
 0x185   :  { %v1828_v31 = vadd.f32 %v1827_v18, %v1826_v8  ;;  %v6961_v8 = vld [vmem:[%s10627_s2 + $0x364] sm:$0xf]  ;;  %2771 = vmatpush.bf16.msra.mxu0 %v5528_v61 }
 0x186   :  { %2809 = vmatpush.bf16.msra.mxu3 %v5928_v1  ;;  %v5912_v12 = vor.u32 %v6961_v8, %v5909_v10  ;;  %v6925_v18 = vld [vmem:[%s10627_s2 + $0x244] sm:$0xf]  ;;  %2797 = vmatpush.bf16.msra.mxu2 %v5784_v7  ;;  %v5736_v7 = vor.u32 %v6917_v55, %v5733_v56  ;;  %v1846_v8 = vsub.f32 1.5, %v1845_v45  ;;  %v6948_v55 = vld [vmem:[%s10627_s2 + $0x2f4] sm:$0xf0] }
 0x187   :  { %v1829_v42 = vrot.slane %v1828_v31, 1  ;;  %2784 = vmatpush.bf16.msra.mxu1 %v5656_v6  ;;  %v5768_v29 = vor.u32 %v6925_v18, %v5765_v21  ;;  %v6949_v61 = vld [vmem:[%s10627_s2 + $0x304] sm:$0xf]  ;;  %v5608_v6 = vor.u32 %v6885_v53, %v5605_v14  ;;  %v1886_v18 = vrot.slane %v1861_v41, 7  ;;  %v5979_v56 = vld [vmem:[%s10627_s2 + $0x3e8] sm:$0xf] }
 0x188   :  { %v5864_v10 = vor.u32 %v6949_v61, %v5861_v63  ;;  %v1847_v13 = vmul.f32 %v8974_v46, %v1846_v8 }
 0x189   :  { %v1830_v52 = vadd.f32 %v1829_v42, %v1828_v31  ;;  %v5493_v31 = vld [vmem:[%s10627_s2 + $0x30] sm:$0xf0]  ;;  %v1865_v42 = vmul.f32 0.5, %v1864_v16  ;;  %2772 = vmatpush.bf16.msra.mxu0 %v5512_v20  ;;  %v1835_v20 = vld [vmem:[%s10630_s5] ss:$8 sm:$0xf] }
 0x18a   :  { %2810 = vmatpush.bf16.msra.mxu3 %v5912_v12  ;;  %v5496_v48 = vor.u32 %v6857_v30, %v5493_v31  ;;  %2798 = vmatpush.bf16.msra.mxu2 %v5768_v29 }
 0x18b   :  { %v1834_v60 = vmul.f32 %v1830_v52, %v8651_v57  ;;  %2785 = vmatpush.bf16.msra.mxu1 %v5640_v27  ;;  %v5477_v52 = vld [vmem:[%s10627_s2 + $0x10] sm:$0xf0]  ;;  %v1866_v58 = vsub.f32 1.5, %v1865_v42 }
 0x18c   :  { %v5480_v4 = vor.u32 %v6853_v51, %v5477_v52  ;;  %v5595_v52 = vld [vmem:[%s10627_s2 + $0xe8] sm:$0xf] }
 0x18d   :  { %v9015_v11 = vadd.f32 0.0001, %v1834_v60  ;;  %2773 = vmatpush.bf16.msra.mxu0 %v5496_v48  ;;  %v1867_v12 = vmul.f32 %v8966_v40, %v1866_v58 }
 0x18e   :  { %2811 = vmatpush.bf16.msra.mxu3 %v5896_v33  ;;  %2799 = vmatpush.bf16.msra.mxu2 %v5752_v50 }
 0x18f   :  { %7152 = vrsqrt.f32 %v9015_v11  ;;  %2786 = vmatpush.bf16.msra.mxu1 %v5624_v49  ;;  %v1871_v34 = vsel %vm1870_vm8, %v8966_v40, %v1867_v12  ;;  %vm1878_vm9 = vweird.f32 %v9015_v11  ;;  %v1851_v40 = vsel %vm1850_vm14, %v8974_v46, %v1847_v13  ;;  %v5579_v12 = vld [vmem:[%s10627_s2 + $0xc8] sm:$0xf] }
 0x190   :  { %v1887_v3 = vrot.slane %v1871_v34, 6  ;;  %v1890_v21 = vsel %vm1889_vm12, %v1851_v40, %v1886_v18  ;;  %v5707_v13 = vld [vmem:[%s10627_s2 + $0x1c8] sm:$0xf]  ;;  %v6912_v34 = vld [vmem:[%s10627_s2 + $0x1d4] sm:$0xf0] }
 0x191   :  { %2774 = vmatpush.bf16.msra.mxu0 %v5480_v4  ;;  %v6944_v18 = vld [vmem:[%s10627_s2 + $0x2d4] sm:$0xf0]  ;;  %v5563_v40 = vld [vmem:[%s10627_s2 + $0xa8] sm:$0xf] }
 0x192   :  { %2812 = vmatpush.bf16.msra.mxu3 %v5880_v54  ;;  %2800 = vmatpush.bf16.msra.mxu2 %v5736_v7 }
 0x193   :  { %2787 = vmatpush.bf16.msra.mxu1 %v5608_v6 }
 0x195   :  { %v7153_v1 = vpop.eup %7152 }
 0x196   :  { %v1873_v60 = vmul.f32 %v7153_v1, %v9015_v11  ;;  %vm1879_vm6 = vweird.f32 %v7153_v1  ;;  %2813 = vmatpush.bf16.msra.mxu3 %v5864_v10 }
 0x197   :  { %vm1880_vm10 = vmor %vm1878_vm9, %vm1879_vm6 }
 0x198   :  { %v1874_v5 = vmul.f32 %v7153_v1, %v1873_v60 }
 0x19a   :  { %v1875_v9 = vmul.f32 0.5, %v1874_v5 }
 0x19c   :  { %v1876_v16 = vsub.f32 1.5, %v1875_v9  ;;  %v6880_v9 = vld [vmem:[%s10627_s2 + $0xd4] sm:$0xf0] }
 0x19e   :  { %v1877_v17 = vmul.f32 %v7153_v1, %v1876_v16  ;;  %v5980_v16 = vor.u32 %v6980_v2, %v5979_v56  ;;  %v5899_v2 = vld [vmem:[%s10627_s2 + $0x348] sm:$0xf] }
 0x1a0   :  { %v1881_v39 = vsel %vm1880_vm10, %v7153_v1, %v1877_v17  ;;  %v5835_v17 = vld [vmem:[%s10627_s2 + $0x2c8] sm:$0xf] }
 0x1a1   :  { %v1888_v19 = vrot.slane %v1881_v39, 5  ;;  %v5963_v39 = vld [vmem:[%s10627_s2 + $0x3c8] sm:$0xf] }
 0x1a3   :  { %v1892_v11 = vsel %vm1891_vm13, %v1887_v3, %v1888_v19  ;;  %v6976_v3 = vld [vmem:[%s10627_s2 + $0x3d4] sm:$0xf0]  ;;  %v5580_v19 = vor.u32 %v6880_v9, %v5579_v12  ;;  %v5499_v9 = vld [vmem:[%s10627_s2 + $0x28] sm:$0xf] }
 0x1a4   :  { %v1894_v22 = vsel %vm1893_vm15, %v1890_v21, %v1892_v11  ;;  %v6876_v21 = vld [vmem:[%s10627_s2 + $0xb4] sm:$0xf0]  ;;  %v5836_v11 = vor.u32 %v6944_v18, %v5835_v17  ;;  %v5755_v18 = vld [vmem:[%s10627_s2 + $0x228] sm:$0xf] }
 0x1a5   :  { %v1896_v24 = vmul.f32 %v1894_v22, %v1835_v20  ;;  %v5708_v20 = vor.u32 %v6912_v34, %v5707_v13  ;;  %v5964_v22 = vor.u32 %v6976_v3, %v5963_v39  ;;  %v5627_v34 = vld [vmem:[%s10627_s2 + $0x128] sm:$0xf]  ;;  %v6892_v17 = vld [vmem:[%s10627_s2 + $0x134] sm:$0xf0] }
 0x1a6   :  { %v6924_v39 = vld [vmem:[%s10627_s2 + $0x234] sm:$0xf0]  ;;  %v5883_v3 = vld [vmem:[%s10627_s2 + $0x328] sm:$0xf] }
 0x1a7   :  { %v1900_v26 = vperm.slane %v1896_v24, 2  ;;  %v1901_v27 = vperm.slane %v1896_v24, 3  ;;  %v1899_v29 = vperm.slane %v1896_v24, 1  ;;  %v1898_v30 = vperm.slane %v1896_v24, 0  ;;  %v5691_v24 = vld [vmem:[%s10627_s2 + $0x1a8] sm:$0xf] }
 0x1a9   :  { %v1908_v31 = vmul.f32 %v1900_v26, %v8664_v59  ;;  %v1909_v32 = vmul.f32 %v1901_v27, %v8848_v28  ;;  %v1907_v33 = vmul.f32 %v1899_v29, %v8654_v62  ;;  %v1906_v46 = vmul.f32 %v1898_v30, %v8657_v0 }
 0x1aa   :  { %v1925_v28 = vmul.f32 %v1901_v27, %v8758_v25  ;;  %v1922_v62 = vmul.f32 %v1898_v30, %v8572_v23  ;;  %v1923_v47 = vmul.f32 %v1899_v29, %v8641_v38  ;;  %v1924_v0 = vmul.f32 %v1900_v26, %v8647_v15  ;;  %v6884_v23 = vld [vmem:[%s10627_s2 + $0xf4] sm:$0xf0]  ;;  %v5723_v38 = vld [vmem:[%s10627_s2 + $0x1e8] sm:$0xf] }
 0x1ab   :  { %v1915_v35 = vrot.slane %v1908_v31, 6  ;;  %v1916_v36 = vrot.slane %v1909_v32, 5  ;;  %v1914_v37 = vrot.slane %v1907_v33, 7  ;;  %v6916_v15 = vld [vmem:[%s10627_s2 + $0x1f4] sm:$0xf0]  ;;  %v5596_v4 = vor.u32 %v6884_v23, %v5595_v52 }
 0x1ac   :  { %v5851_v25 = vld [vmem:[%s10627_s2 + $0x2e8] sm:$0xf]  ;;  %v5724_v5 = vor.u32 %v6916_v15, %v5723_v38  ;;  %v6908_v26 = vld [vmem:[%s10627_s2 + $0x1b4] sm:$0xf0]  ;;  %v5564_v32 = vor.u32 %v6876_v21, %v5563_v40  ;;  %v5628_v21 = vor.u32 %v6892_v17, %v5627_v34  ;;  %v6902_v17 = vld [vmem:[%s10627_s2 + $0x18c] sm:$0xf] }
 0x1ad   :  { %v1918_v42 = vsel %vm1891_vm13, %v1915_v35, %v1916_v36  ;;  %v1917_v44 = vsel %vm1889_vm12, %v1906_v46, %v1914_v37  ;;  %v5852_v41 = vor.u32 %v6948_v55, %v5851_v25  ;;  %v5819_v27 = vld [vmem:[%s10627_s2 + $0x2a8] sm:$0xf]  ;;  %v6940_v29 = vld [vmem:[%s10627_s2 + $0x2b4] sm:$0xf0]  ;;  %v5692_v33 = vor.u32 %v6908_v26, %v5691_v24 }
 0x1ae   :  { %v1919_v45 = vsel %vm1893_vm15, %v1917_v44, %v1918_v42  ;;  %v5947_v30 = vld [vmem:[%s10627_s2 + $0x3a8] sm:$0xf]  ;;  %v6972_v31 = vld [vmem:[%s10627_s2 + $0x3b4] sm:$0xf0]  ;;  %v5820_v46 = vor.u32 %v6940_v29, %v5819_v27  ;;  %v5756_v26 = vor.u32 %v6924_v39, %v5755_v18  ;;  %v5677_v18 = vld [vmem:[%s10627_s2 + $0x198] sm:$0xf0] }
 0x1af   :  { %v1921_v59 = vsub.f32 %v5472_v43, %v1919_v45  ;;  %v5547_v35 = vld [vmem:[%s10627_s2 + $0x88] sm:$0xf]  ;;  %v6872_v36 = vld [vmem:[%s10627_s2 + $0x94] sm:$0xf0]  ;;  %v5948_v37 = vor.u32 %v6972_v31, %v5947_v30  ;;  %v6934_v39 = vld [vmem:[%s10627_s2 + $0x28c] sm:$0xf] }
 0x1b0   :  { %v5675_v42 = vld [vmem:[%s10627_s2 + $0x188] sm:$0xf]  ;;  %v6904_v43 = vld [vmem:[%s10627_s2 + $0x194] sm:$0xf0] }
 0x1b1   :  { %v1927_v48 = vperm.slane %v1921_v59, 0  ;;  %v1928_v49 = vperm.slane %v1921_v59, 1  ;;  %v1929_v50 = vperm.slane %v1921_v59, 2  ;;  %v1930_v51 = vperm.slane %v1921_v59, 3  ;;  %v5803_v44 = vld [vmem:[%s10627_s2 + $0x288] sm:$0xf] }
 0x1b2   :  { %v6936_v45 = vld [vmem:[%s10627_s2 + $0x294] sm:$0xf0]  ;;  %v5931_v59 = vld [vmem:[%s10627_s2 + $0x388] sm:$0xf] }
 0x1b3   :  { %v1935_v53 = vadd.f32 %v1927_v48, %v1922_v62  ;;  %v1936_v1 = vadd.f32 %v1928_v49, %v1923_v47  ;;  %v1937_v54 = vadd.f32 %v1929_v50, %v1924_v0  ;;  %v1938_v14 = vadd.f32 %v1930_v51, %v1925_v28  ;;  %v6968_v28 = vld [vmem:[%s10627_s2 + $0x394] sm:$0xf0]  ;;  %v5531_v0 = vld [vmem:[%s10627_s2 + $0x68] sm:$0xf] }
 0x1b4   :  { %v5548_v62 = vor.u32 %v6872_v36, %v5547_v35  ;;  %v5676_v47 = vor.u32 %v6904_v43, %v5675_v42  ;;  %v6868_v48 = vld [vmem:[%s10627_s2 + $0x74] sm:$0xf0]  ;;  %v5804_v49 = vor.u32 %v6936_v45, %v5803_v44  ;;  %v5932_v50 = vor.u32 %v6968_v28, %v5931_v59  ;;  %v5659_v51 = vld [vmem:[%s10627_s2 + $0x168] sm:$0xf]  ;;  %v5597_v35 = vld [vmem:[%s10627_s2 + $0xf8] sm:$0xf0] }
 0x1b5   :  { %v1939_v58 = vmax.f32 %v1935_v53, 0.0  ;;  %v1940_v60 = vmax.f32 %v1936_v1, 0.0  ;;  %v1941_v61 = vmax.f32 %v1937_v54, 0.0  ;;  %v1942_v63 = vmax.f32 %v1938_v14, 0.0  ;;  %v6900_v52 = vld [vmem:[%s10627_s2 + $0x174] sm:$0xf0] }
 0x1b6   :  { %v5787_v53 = vld [vmem:[%s10627_s2 + $0x268] sm:$0xf]  ;;  %v6932_v1 = vld [vmem:[%s10627_s2 + $0x274] sm:$0xf0]  ;;  %v5532_v23 = vor.u32 %v6868_v48, %v5531_v0  ;;  %v5660_v38 = vor.u32 %v6900_v52, %v5659_v51  ;;  %v6914_v36 = vld [vmem:[%s10627_s2 + $0x1ec] sm:$0xf] }
 0x1b7   :  { %v9150_v6 = vpack.c.bf16 %v1939_v58, %v1939_v58  ;;  %v9152_v7 = vpack.c.bf16 %v1940_v60, %v1940_v60  ;;  %v9154_v8 = vpack.c.bf16 %v1941_v61, %v1941_v61  ;;  %v9156_v10 = vpack.c.bf16 %v1942_v63, %v1942_v63  ;;  %v5915_v54 = vld [vmem:[%s10627_s2 + $0x368] sm:$0xf]  ;;  %v6964_v14 = vld [vmem:[%s10627_s2 + $0x374] sm:$0xf0]  ;;  %v5853_v44 = vld [vmem:[%s10627_s2 + $0x2f8] sm:$0xf0] }
 0x1b8   :  { %v5515_v15 = vld [vmem:[%s10627_s2 + $0x48] sm:$0xf]  ;;  %v6864_v25 = vld [vmem:[%s10627_s2 + $0x54] sm:$0xf0]  ;;  %v5788_v55 = vor.u32 %v6932_v1, %v5787_v53  ;;  %v5916_v56 = vor.u32 %v6964_v14, %v5915_v54  ;;  %v6978_v45 = vld [vmem:[%s10627_s2 + $0x3ec] sm:$0xf] }
 0x1b9   :  { %2723 = vmatmul.bf16.vlgmr.msrb.gmra.mxu0 %v9150_v6  ;;  %2736 = vmatmul.bf16.vlgmr.msrb.gmra.mxu1 %v9152_v7  ;;  %v5643_v58 = vld [vmem:[%s10627_s2 + $0x148] sm:$0xf]  ;;  %v6896_v60 = vld [vmem:[%s10627_s2 + $0x154] sm:$0xf0]  ;;  %v5981_v59 = vld [vmem:[%s10627_s2 + $0x3f8] sm:$0xf0] }
 0x1ba   :  { %2749 = vmatmul.bf16.vlgmr.msrb.gmra.mxu2 %v9154_v8  ;;  %2762 = vmatmul.bf16.vlgmr.msrb.gmra.mxu3 %v9156_v10  ;;  %v5771_v61 = vld [vmem:[%s10627_s2 + $0x248] sm:$0xf]  ;;  %v6928_v63 = vld [vmem:[%s10627_s2 + $0x254] sm:$0xf0]  ;;  %v5644_v12 = vor.u32 %v6896_v60, %v5643_v58  ;;  %v6878_v48 = vld [vmem:[%s10627_s2 + $0xcc] sm:$0xf]  ;;  %v5984_v51 = vor.u32 %v6978_v45, %v5981_v59 }
 0x1bb   :  { %2819 = vmatpush.bf16.msrb.mxu0 %v5596_v4  ;;  %2832 = vmatpush.bf16.msrb.mxu1 %v5724_v5  ;;  %v6960_v4 = vld [vmem:[%s10627_s2 + $0x354] sm:$0xf0]  ;;  %v5516_v5 = vor.u32 %v6864_v25, %v5515_v15  ;;  %v5739_v29 = vld [vmem:[%s10627_s2 + $0x208] sm:$0xf]  ;;  %v6910_v52 = vld [vmem:[%s10627_s2 + $0x1cc] sm:$0xf] }
 0x1bc   :  { %2845 = vmatpush.bf16.msrb.mxu2 %v5852_v41  ;;  %2858 = vmatpush.bf16.msrb.mxu3 %v5980_v16  ;;  %v6860_v41 = vld [vmem:[%s10627_s2 + $0x34] sm:$0xf0]  ;;  %v5772_v16 = vor.u32 %v6928_v63, %v5771_v61  ;;  %v5900_v13 = vor.u32 %v6960_v4, %v5899_v2  ;;  %v5867_v31 = vld [vmem:[%s10627_s2 + $0x308] sm:$0xf]  ;;  %v5709_v53 = vld [vmem:[%s10627_s2 + $0x1d8] sm:$0xf0] }
 0x1bd   :  { %v5500_v40 = vor.u32 %v6860_v41, %v5499_v9  ;;  %v6888_v24 = vld [vmem:[%s10627_s2 + $0x114] sm:$0xf0]  ;;  %v6942_v1 = vld [vmem:[%s10627_s2 + $0x2cc] sm:$0xf]  ;;  %v5837_v54 = vld [vmem:[%s10627_s2 + $0x2d8] sm:$0xf0]  ;;  %v5712_v15 = vor.u32 %v6910_v52, %v5709_v53 }
 0x1be   :  { %v6920_v30 = vld [vmem:[%s10627_s2 + $0x214] sm:$0xf0]  ;;  %v6974_v14 = vld [vmem:[%s10627_s2 + $0x3cc] sm:$0xf]  ;;  %v5693_v61 = vld [vmem:[%s10627_s2 + $0x1b8] sm:$0xf0] }
 0x1bf   :  { %2820 = vmatpush.bf16.msrb.mxu0 %v5580_v19  ;;  %2833 = vmatpush.bf16.msrb.mxu1 %v5708_v20  ;;  %v6956_v19 = vld [vmem:[%s10627_s2 + $0x334] sm:$0xf0]  ;;  %v5483_v20 = vld [vmem:[%s10627_s2 + $0x8] sm:$0xf]  ;;  %v5740_v28 = vor.u32 %v6920_v30, %v5739_v29  ;;  %v6874_v25 = vld [vmem:[%s10627_s2 + $0xac] sm:$0xf] }
 0x1c0   :  { %2846 = vmatpush.bf16.msrb.mxu2 %v5836_v11  ;;  %2859 = vmatpush.bf16.msrb.mxu3 %v5964_v22  ;;  %v6856_v11 = vld [vmem:[%s10627_s2 + $0x14] sm:$0xf0]  ;;  %v5611_v22 = vld [vmem:[%s10627_s2 + $0x108] sm:$0xf]  ;;  %v5884_v27 = vor.u32 %v6956_v19, %v5883_v3  ;;  %v6906_v60 = vld [vmem:[%s10627_s2 + $0x1ac] sm:$0xf] }
 0x1c1   :  { %v5484_v42 = vor.u32 %v6856_v11, %v5483_v20  ;;  %v5612_v43 = vor.u32 %v6888_v24, %v5611_v22  ;;  %v6938_v63 = vld [vmem:[%s10627_s2 + $0x2ac] sm:$0xf]  ;;  %v5821_v2 = vld [vmem:[%s10627_s2 + $0x2b8] sm:$0xf0]  ;;  %v5696_v9 = vor.u32 %v6906_v60, %v5693_v61 }
 0x1c2   :  { %v6970_v4 = vld [vmem:[%s10627_s2 + $0x3ac] sm:$0xf]  ;;  %v5805_v3 = vld [vmem:[%s10627_s2 + $0x298] sm:$0xf0] }
 0x1c3   :  { %2821 = vmatpush.bf16.msrb.mxu0 %v5564_v32  ;;  %2834 = vmatpush.bf16.msrb.mxu1 %v5692_v33  ;;  %v6952_v32 = vld [vmem:[%s10627_s2 + $0x314] sm:$0xf0]  ;;  %v6882_v33 = vld [vmem:[%s10627_s2 + $0xec] sm:$0xf]  ;;  %v5933_v20 = vld [vmem:[%s10627_s2 + $0x398] sm:$0xf0]  ;;  %v5808_v24 = vor.u32 %v6934_v39, %v5805_v3 }
 0x1c4   :  { %2847 = vmatpush.bf16.msrb.mxu2 %v5820_v46  ;;  %2860 = vmatpush.bf16.msrb.mxu3 %v5948_v37  ;;  %v5725_v46 = vld [vmem:[%s10627_s2 + $0x1f8] sm:$0xf0]  ;;  %v6946_v37 = vld [vmem:[%s10627_s2 + $0x2ec] sm:$0xf] }
 0x1c5   :  { %v5728_v0 = vor.u32 %v6914_v36, %v5725_v46  ;;  %v6870_v41 = vld [vmem:[%s10627_s2 + $0x8c] sm:$0xf]  ;;  %v5533_v22 = vld [vmem:[%s10627_s2 + $0x78] sm:$0xf0] }
 0x1c6   :  { %v6966_v19 = vld [vmem:[%s10627_s2 + $0x38c] sm:$0xf]  ;;  %v5661_v29 = vld [vmem:[%s10627_s2 + $0x178] sm:$0xf0] }
 0x1c7   :  { %2822 = vmatpush.bf16.msrb.mxu0 %v5548_v62  ;;  %2835 = vmatpush.bf16.msrb.mxu1 %v5676_v47  ;;  %v5868_v62 = vor.u32 %v6952_v32, %v5867_v31  ;;  %v5600_v47 = vor.u32 %v6882_v33, %v5597_v35  ;;  %v6866_v11 = vld [vmem:[%s10627_s2 + $0x6c] sm:$0xf]  ;;  %v5789_v31 = vld [vmem:[%s10627_s2 + $0x278] sm:$0xf0] }
 0x1c8   :  { %2848 = vmatpush.bf16.msrb.mxu2 %v5804_v49  ;;  %2861 = vmatpush.bf16.msrb.mxu3 %v5932_v50  ;;  %v5581_v49 = vld [vmem:[%s10627_s2 + $0xd8] sm:$0xf0]  ;;  %v5856_v50 = vor.u32 %v6946_v37, %v5853_v44  ;;  %v6930_v30 = vld [vmem:[%s10627_s2 + $0x26c] sm:$0xf]  ;;  %v5536_v35 = vor.u32 %v6866_v11, %v5533_v22 }
 0x1c9   :  { %2775 = vmatmul.bf16.vlgmr.msra.gmra.mxu0 %v9150_v6  ;;  %2788 = vmatmul.bf16.vlgmr.msra.gmra.mxu1 %v9152_v7  ;;  %v6962_v32 = vld [vmem:[%s10627_s2 + $0x36c] sm:$0xf]  ;;  %v5917_v33 = vld [vmem:[%s10627_s2 + $0x378] sm:$0xf0] }
 0x1ca   :  { %2801 = vmatmul.bf16.vlgmr.msra.gmra.mxu2 %v9154_v8  ;;  %2814 = vmatmul.bf16.vlgmr.msra.gmra.mxu3 %v9156_v10  ;;  %v6862_v46 = vld [vmem:[%s10627_s2 + $0x4c] sm:$0xf]  ;;  %v5517_v37 = vld [vmem:[%s10627_s2 + $0x58] sm:$0xf0] }
 0x1cb   :  { %2823 = vmatpush.bf16.msrb.mxu0 %v5532_v23  ;;  %2836 = vmatpush.bf16.msrb.mxu1 %v5660_v38  ;;  %v5965_v23 = vld [vmem:[%s10627_s2 + $0x3d8] sm:$0xf0]  ;;  %v5584_v38 = vor.u32 %v6878_v48, %v5581_v49  ;;  %v6894_v44 = vld [vmem:[%s10627_s2 + $0x14c] sm:$0xf] }
 0x1cc   :  { %2849 = vmatpush.bf16.msrb.mxu2 %v5788_v55  ;;  %2862 = vmatpush.bf16.msrb.mxu3 %v5916_v56  ;;  %v5565_v55 = vld [vmem:[%s10627_s2 + $0xb8] sm:$0xf0]  ;;  %v5840_v56 = vor.u32 %v6942_v1, %v5837_v54  ;;  %v5968_v58 = vor.u32 %v6974_v14, %v5965_v23  ;;  %v6926_v59 = vld [vmem:[%s10627_s2 + $0x24c] sm:$0xf] }
 0x1cd   :  { %v5645_v45 = vld [vmem:[%s10627_s2 + $0x158] sm:$0xf0]  ;;  %v6858_v49 = vld [vmem:[%s10627_s2 + $0x2c] sm:$0xf] }
 0x1ce   :  { %v5648_v48 = vor.u32 %v6894_v44, %v5645_v45  ;;  %v6890_v53 = vld [vmem:[%s10627_s2 + $0x12c] sm:$0xf]  ;;  %v5629_v1 = vld [vmem:[%s10627_s2 + $0x138] sm:$0xf0] }
 0x1cf   :  { %2824 = vmatpush.bf16.msrb.mxu0 %v5516_v5  ;;  %2837 = vmatpush.bf16.msrb.mxu1 %v5644_v12  ;;  %v5949_v5 = vld [vmem:[%s10627_s2 + $0x3b8] sm:$0xf0]  ;;  %v5568_v12 = vor.u32 %v6874_v25, %v5565_v55  ;;  %v6922_v54 = vld [vmem:[%s10627_s2 + $0x22c] sm:$0xf]  ;;  %v5632_v25 = vor.u32 %v6890_v53, %v5629_v1 }
 0x1d0   :  { %2850 = vmatpush.bf16.msrb.mxu2 %v5772_v16  ;;  %2863 = vmatpush.bf16.msrb.mxu3 %v5900_v13  ;;  %v5549_v16 = vld [vmem:[%s10627_s2 + $0x98] sm:$0xf0]  ;;  %v5824_v13 = vor.u32 %v6938_v63, %v5821_v2  ;;  %v5952_v34 = vor.u32 %v6970_v4, %v5949_v5  ;;  %v6954_v23 = vld [vmem:[%s10627_s2 + $0x32c] sm:$0xf] }
 0x1d1   :  { %v5757_v14 = vld [vmem:[%s10627_s2 + $0x238] sm:$0xf0]  ;;  %v6854_v55 = vld [vmem:[%s10627_s2 + $0xc] sm:$0xf] }
 0x1d2   :  { %v6886_v61 = vld [vmem:[%s10627_s2 + $0x10c] sm:$0xf]  ;;  %v5613_v63 = vld [vmem:[%s10627_s2 + $0x118] sm:$0xf0] }
 0x1d3   :  { %2825 = vmatpush.bf16.msrb.mxu0 %v5500_v40  ;;  %2838 = vmatpush.bf16.msrb.mxu1 %v5628_v21  ;;  %v5552_v40 = vor.u32 %v6870_v41, %v5549_v16  ;;  %v5680_v21 = vor.u32 %v6902_v17, %v5677_v18  ;;  %v6918_v2 = vld [vmem:[%s10627_s2 + $0x20c] sm:$0xf]  ;;  %v5741_v4 = vld [vmem:[%s10627_s2 + $0x218] sm:$0xf0]  ;;  %v5616_v41 = vor.u32 %v6886_v61, %v5613_v63 }
 0x1d4   :  { %2851 = vmatpush.bf16.msrb.mxu2 %v5756_v26  ;;  %2864 = vmatpush.bf16.msrb.mxu3 %v5884_v27  ;;  %v5936_v26 = vor.u32 %v6966_v19, %v5933_v20  ;;  %v6898_v27 = vld [vmem:[%s10627_s2 + $0x16c] sm:$0xf]  ;;  %v5744_v16 = vor.u32 %v6918_v2, %v5741_v4 }
 0x1d5   :  { %v5664_v36 = vor.u32 %v6898_v27, %v5661_v29  ;;  %v6950_v5 = vld [vmem:[%s10627_s2 + $0x30c] sm:$0xf] }
 0x1d7   :  { %2826 = vmatpush.bf16.msrb.mxu0 %v5484_v42  ;;  %2839 = vmatpush.bf16.msrb.mxu1 %v5612_v43  ;;  %v5792_v42 = vor.u32 %v6930_v30, %v5789_v31  ;;  %v5920_v43 = vor.u32 %v6962_v32, %v5917_v33 }
 0x1d8   :  { %2852 = vmatpush.bf16.msrb.mxu2 %v5740_v28  ;;  %2865 = vmatpush.bf16.msrb.mxu3 %v5868_v62  ;;  %v5773_v28 = vld [vmem:[%s10627_s2 + $0x258] sm:$0xf0]  ;;  %v6958_v62 = vld [vmem:[%s10627_s2 + $0x34c] sm:$0xf] }
 0x1da   :  { %2827 = vmatmul.bf16.vlgmr.msrb.gmra.mxu0 %v9150_v6  ;;  %2840 = vmatmul.bf16.vlgmr.msrb.gmra.mxu1 %v9152_v7 }
 0x1db   :  { %2871 = vmatpush.bf16.msra.mxu0 %v5600_v47  ;;  %2884 = vmatpush.bf16.msra.mxu1 %v5728_v0  ;;  %v5901_v47 = vld [vmem:[%s10627_s2 + $0x358] sm:$0xf0]  ;;  %v5520_v0 = vor.u32 %v6862_v46, %v5517_v37 }
 0x1dc   :  { %2897 = vmatpush.bf16.msra.mxu2 %v5856_v50  ;;  %2910 = vmatpush.bf16.msra.mxu3 %v5984_v51  ;;  %v5501_v50 = vld [vmem:[%s10627_s2 + $0x38] sm:$0xf0]  ;;  %v5776_v51 = vor.u32 %v6926_v59, %v5773_v28  ;;  %v5904_v52 = vor.u32 %v6958_v62, %v5901_v47 }
 0x1dd   :  { %2853 = vmatmul.bf16.vlgmr.msrb.gmra.mxu2 %v9154_v8  ;;  %2866 = vmatmul.bf16.vlgmr.msrb.gmra.mxu3 %v9156_v10 }
 0x1df   :  { %2872 = vmatpush.bf16.msra.mxu0 %v5584_v38  ;;  %2885 = vmatpush.bf16.msra.mxu1 %v5712_v15  ;;  %v5885_v38 = vld [vmem:[%s10627_s2 + $0x338] sm:$0xf0]  ;;  %v5504_v15 = vor.u32 %v6858_v49, %v5501_v50 }
 0x1e0   :  { %2898 = vmatpush.bf16.msra.mxu2 %v5840_v56  ;;  %2911 = vmatpush.bf16.msra.mxu3 %v5968_v58  ;;  %v5485_v56 = vld [vmem:[%s10627_s2 + $0x18] sm:$0xf0]  ;;  %v5760_v58 = vor.u32 %v6922_v54, %v5757_v14  ;;  %v5888_v60 = vor.u32 %v6954_v23, %v5885_v38 }
 0x1e3   :  { %2873 = vmatpush.bf16.msra.mxu0 %v5568_v12  ;;  %2886 = vmatpush.bf16.msra.mxu1 %v5696_v9  ;;  %v5869_v12 = vld [vmem:[%s10627_s2 + $0x318] sm:$0xf0]  ;;  %v5488_v9 = vor.u32 %v6854_v55, %v5485_v56 }
 0x1e4   :  { %2899 = vmatpush.bf16.msra.mxu2 %v5824_v13  ;;  %2912 = vmatpush.bf16.msra.mxu3 %v5952_v34  ;;  %v5872_v13 = vor.u32 %v6950_v5, %v5869_v12 }
 0x1e7   :  { %2874 = vmatpush.bf16.msra.mxu0 %v5552_v40  ;;  %2887 = vmatpush.bf16.msra.mxu1 %v5680_v21 }
 0x1e8   :  { %2900 = vmatpush.bf16.msra.mxu2 %v5808_v24  ;;  %2913 = vmatpush.bf16.msra.mxu3 %v5936_v26 }
 0x1eb   :  { %2875 = vmatpush.bf16.msra.mxu0 %v5536_v35  ;;  %2888 = vmatpush.bf16.msra.mxu1 %v5664_v36 }
 0x1ec   :  { %2901 = vmatpush.bf16.msra.mxu2 %v5792_v42  ;;  %2914 = vmatpush.bf16.msra.mxu3 %v5920_v43 }
 0x1ef   :  { %2876 = vmatpush.bf16.msra.mxu0 %v5520_v0  ;;  %2889 = vmatpush.bf16.msra.mxu1 %v5648_v48 }
 0x1f0   :  { %2902 = vmatpush.bf16.msra.mxu2 %v5776_v51  ;;  %2915 = vmatpush.bf16.msra.mxu3 %v5904_v52 }
 0x1f3   :  { %2877 = vmatpush.bf16.msra.mxu0 %v5504_v15  ;;  %2890 = vmatpush.bf16.msra.mxu1 %v5632_v25 }
 0x1f4   :  { %2903 = vmatpush.bf16.msra.mxu2 %v5760_v58  ;;  %2916 = vmatpush.bf16.msra.mxu3 %v5888_v60 }
 0x1f7   :  { %2878 = vmatpush.bf16.msra.mxu0 %v5488_v9  ;;  %2891 = vmatpush.bf16.msra.mxu1 %v5616_v41  ;;  %v6101_v41 = vld [vmem:[%s10628_s3 + $0xe0] sm:$0xf] }
 0x1f8   :  { %2904 = vmatpush.bf16.msra.mxu2 %v5744_v16  ;;  %2917 = vmatpush.bf16.msra.mxu3 %v5872_v13  ;;  %v7011_v16 = vld [vmem:[%s10628_s3 + $0xec] sm:$0xf0]  ;;  %v6229_v13 = vld [vmem:[%s10628_s3 + $0x1e0] sm:$0xf] }
 0x1fa   :  { %2879 = vmatmul.bf16.vlgmr.msra.gmra.mxu0 %v9150_v6  ;;  %2892 = vmatmul.bf16.vlgmr.msra.gmra.mxu1 %v9152_v7 }
 0x1fb   :  { %2905 = vmatmul.bf16.vlgmr.msra.gmra.mxu2 %v9154_v8  ;;  %2918 = vmatmul.bf16.vlgmr.msra.gmra.mxu3 %v9156_v10 }
 0x236   :  { %v2724_v34 = vpop.f32.mrf.mxu0  ;;  %v2737_v17 = vpop.f32.mrf.mxu1 }
 0x237   :  { %v2738_v18 = vadd.f32 %v2737_v17, %v2724_v34  ;;  %v6102_v34 = vor.u32 %v7011_v16, %v6101_v41  ;;  %v7043_v17 = vld [vmem:[%s10628_s3 + $0x1ec] sm:$0xf0]  ;;  %v6181_v16 = vld [vmem:[%s10628_s3 + $0x180] sm:$0xf] }
 0x239   :  { %3865 = vmatpush.bf16.msrb.mxu0 %v6102_v34  ;;  %v6309_v34 = vld [vmem:[%s10628_s3 + $0x280] sm:$0xf] }
 0x23d   :  { %v2750_v39 = vpop.f32.mrf.mxu2  ;;  %v2763_v3 = vpop.f32.mrf.mxu3 }
 0x23e   :  { %v2751_v19 = vadd.f32 %v2750_v39, %v2738_v18  ;;  %v2726_v20 = vpop.f32.mrf.mxu0  ;;  %v2739_v40 = vpop.f32.mrf.mxu1  ;;  %v6357_v18 = vld [vmem:[%s10628_s3 + $0x2e0] sm:$0xf] }
 0x23f   :  { %v6485_v20 = vld [vmem:[%s10628_s3 + $0x3e0] sm:$0xf] }
 0x240   :  { %v9534_v21 = vadd.f32 %v2763_v3, %v2751_v19  ;;  %v6230_v3 = vor.u32 %v7043_v17, %v6229_v13  ;;  %v7075_v19 = vld [vmem:[%s10628_s3 + $0x2ec] sm:$0xf0] }
 0x241   :  { %v7031_v13 = vld [vmem:[%s10628_s3 + $0x18c] sm:$0xf0] }
 0x242   :  { %v2923_v7 = vrot.slane %v9534_v21, 4  ;;  %3878 = vmatpush.bf16.msrb.mxu1 %v6230_v3  ;;  %v6182_v17 = vor.u32 %v7031_v13, %v6181_v16  ;;  %v7051_v16 = vld [vmem:[%s10628_s3 + $0x22c] sm:$0xf0]  ;;  %v6389_v13 = vld [vmem:[%s10628_s3 + $0x320] sm:$0xf] }
 0x244   :  { %v2924_v31 = vadd.f32 %v2923_v7, %v9534_v21 }
 0x245   :  { %v2752_v11 = vpop.f32.mrf.mxu2  ;;  %v2765_v22 = vpop.f32.mrf.mxu3 }
 0x246   :  { %v2776_v24 = vpop.f32.mrf.mxu0  ;;  %v2789_v6 = vpop.f32.mrf.mxu1  ;;  %v2925_v35 = vrot.slane %v2924_v31, 2  ;;  %v6358_v22 = vor.u32 %v7075_v19, %v6357_v18  ;;  %v7063_v18 = vld [vmem:[%s10628_s3 + $0x28c] sm:$0xf0] }
 0x247   :  { %v2790_v26 = vadd.f32 %v2789_v6, %v2776_v24  ;;  %v7107_v24 = vld [vmem:[%s10628_s3 + $0x3ec] sm:$0xf0] }
 0x248   :  { %v2926_v43 = vadd.f32 %v2925_v35, %v2924_v31  ;;  %v6486_v7 = vor.u32 %v7107_v24, %v6485_v20  ;;  %3891 = vmatpush.bf16.msrb.mxu2 %v6358_v22  ;;  %v7039_v31 = vld [vmem:[%s10628_s3 + $0x1cc] sm:$0xf0]  ;;  %v6310_v20 = vor.u32 %v7063_v18, %v6309_v34  ;;  %v6037_v22 = vld [vmem:[%s10628_s3 + $0x60] sm:$0xf] }
 0x249   :  { %v7071_v35 = vld [vmem:[%s10628_s3 + $0x2cc] sm:$0xf0] }
 0x24a   :  { %v2927_v28 = vrot.slane %v2926_v43, 1  ;;  %3904 = vmatpush.bf16.msrb.mxu3 %v6486_v7  ;;  %v6995_v24 = vld [vmem:[%s10628_s3 + $0x6c] sm:$0xf0] }
 0x24b   :  { %v7083_v34 = vld [vmem:[%s10628_s3 + $0x32c] sm:$0xf0] }
 0x24c   :  { %v2928_v0 = vadd.f32 %v2927_v28, %v2926_v43  ;;  %v7103_v43 = vld [vmem:[%s10628_s3 + $0x3cc] sm:$0xf0] }
 0x24d   :  { %v2802_v8 = vpop.f32.mrf.mxu2  ;;  %v2815_v27 = vpop.f32.mrf.mxu3 }
 0x24e   :  { %v2803_v10 = vadd.f32 %v2802_v8, %v2790_v26  ;;  %v2778_v29 = vpop.f32.mrf.mxu0  ;;  %v2791_v30 = vpop.f32.mrf.mxu1  ;;  %v9545_v54 = vmul.f32 %v2928_v0, %v8651_v57  ;;  %v6085_v26 = vld [vmem:[%s10628_s3 + $0xc0] sm:$0xf]  ;;  %v7007_v8 = vld [vmem:[%s10628_s3 + $0xcc] sm:$0xf0] }
 0x24f   :  { %v6086_v30 = vor.u32 %v7007_v8, %v6085_v26  ;;  %v6197_v0 = vld [vmem:[%s10628_s3 + $0x1a0] sm:$0xf] }
 0x250   :  { %v9538_v32 = vadd.f32 %v2815_v27, %v2803_v10  ;;  %v2951_v15 = vsub.f32 %v9534_v21, %v9545_v54  ;;  %v6213_v27 = vld [vmem:[%s10628_s3 + $0x1c0] sm:$0xf] }
 0x251   :  { %3866 = vmatpush.bf16.msrb.mxu0 %v6086_v30 }
 0x252   :  { %v2929_v33 = vrot.slane %v9538_v32, 4  ;;  %v2955_v61 = vmul.f32 %v2951_v15, %v2951_v15 }
 0x254   :  { %v2930_v36 = vadd.f32 %v2929_v33, %v9538_v32  ;;  %v2959_v5 = vrot.slane %v2955_v61, 4  ;;  %v6341_v33 = vld [vmem:[%s10628_s3 + $0x2c0] sm:$0xf] }
 0x255   :  { %v2804_v46 = vpop.f32.mrf.mxu2  ;;  %v2817_v37 = vpop.f32.mrf.mxu3 }
 0x256   :  { %v2931_v42 = vrot.slane %v2930_v36, 2  ;;  %v2960_v40 = vadd.f32 %v2959_v5, %v2955_v61  ;;  %v6214_v46 = vor.u32 %v7039_v31, %v6213_v27  ;;  %v6342_v37 = vor.u32 %v7071_v35, %v6341_v33  ;;  %v6053_v61 = vld [vmem:[%s10628_s3 + $0x80] sm:$0xf]  ;;  %v7059_v31 = vld [vmem:[%s10628_s3 + $0x26c] sm:$0xf0] }
 0x257   :  { %v2828_v45 = vpop.f32.mrf.mxu0  ;;  %v2841_v59 = vpop.f32.mrf.mxu1  ;;  %v6038_v27 = vor.u32 %v6995_v24, %v6037_v22  ;;  %v6421_v33 = vld [vmem:[%s10628_s3 + $0x360] sm:$0xf]  ;;  %v7091_v35 = vld [vmem:[%s10628_s3 + $0x36c] sm:$0xf0] }
 0x258   :  { %v2932_v44 = vadd.f32 %v2931_v42, %v2930_v36  ;;  %v2842_v47 = vadd.f32 %v2841_v59, %v2828_v45  ;;  %v6469_v42 = vld [vmem:[%s10628_s3 + $0x3c0] sm:$0xf]  ;;  %3879 = vmatpush.bf16.msrb.mxu1 %v6214_v46  ;;  %3892 = vmatpush.bf16.msrb.mxu2 %v6342_v37 }
 0x259   :  { %v6470_v59 = vor.u32 %v7103_v43, %v6469_v42  ;;  %v6422_v42 = vor.u32 %v7091_v35, %v6421_v33 }
 0x25a   :  { %v2933_v62 = vrot.slane %v2932_v44, 1 }
 0x25b   :  { %3905 = vmatpush.bf16.msrb.mxu3 %v6470_v59  ;;  %v6991_v59 = vld [vmem:[%s10628_s3 + $0x4c] sm:$0xf0] }
 0x25c   :  { %v2934_v48 = vadd.f32 %v2933_v62, %v2932_v44  ;;  %v2961_v44 = vrot.slane %v2960_v40, 2  ;;  %v6069_v62 = vld [vmem:[%s10628_s3 + $0xa0] sm:$0xf] }
 0x25e   :  { %v9548_v14 = vmul.f32 %v2934_v48, %v8651_v57 }
 0x25f   :  { %v2830_v52 = vpop.f32.mrf.mxu0  ;;  %v2843_v53 = vpop.f32.mrf.mxu1 }
 0x260   :  { %v2854_v49 = vpop.f32.mrf.mxu2  ;;  %v2867_v50 = vpop.f32.mrf.mxu3  ;;  %v2952_v25 = vsub.f32 %v9538_v32, %v9548_v14 }
 0x261   :  { %v2855_v51 = vadd.f32 %v2854_v49, %v2842_v47  ;;  %v7003_v47 = vld [vmem:[%s10628_s3 + $0xac] sm:$0xf0] }
 0x262   :  { %v2956_v63 = vmul.f32 %v2952_v25, %v2952_v25  ;;  %v6070_v48 = vor.u32 %v7003_v47, %v6069_v62  ;;  %v7035_v49 = vld [vmem:[%s10628_s3 + $0x1ac] sm:$0xf0] }
 0x263   :  { %v9542_v1 = vadd.f32 %v2867_v50, %v2855_v51  ;;  %v6325_v50 = vld [vmem:[%s10628_s3 + $0x2a0] sm:$0xf]  ;;  %v7067_v51 = vld [vmem:[%s10628_s3 + $0x2ac] sm:$0xf0]  ;;  %v6198_v52 = vor.u32 %v7035_v49, %v6197_v0 }
 0x264   :  { %v2965_v12 = vrot.slane %v2956_v63, 4  ;;  %v6326_v53 = vor.u32 %v7067_v51, %v6325_v50  ;;  %3867 = vmatpush.bf16.msrb.mxu0 %v6070_v48  ;;  %v6149_v0 = vld [vmem:[%s10628_s3 + $0x140] sm:$0xf]  ;;  %v7023_v48 = vld [vmem:[%s10628_s3 + $0x14c] sm:$0xf0] }
 0x265   :  { %v2935_v23 = vrot.slane %v9542_v1, 4  ;;  %3880 = vmatpush.bf16.msrb.mxu1 %v6198_v52  ;;  %v6150_v50 = vor.u32 %v7023_v48, %v6149_v0  ;;  %v6277_v51 = vld [vmem:[%s10628_s3 + $0x240] sm:$0xf]  ;;  %v7055_v52 = vld [vmem:[%s10628_s3 + $0x24c] sm:$0xf0] }
 0x266   :  { %v2966_v11 = vadd.f32 %v2965_v12, %v2956_v63  ;;  %v6999_v63 = vld [vmem:[%s10628_s3 + $0x8c] sm:$0xf0]  ;;  %3893 = vmatpush.bf16.msrb.mxu2 %v6326_v53  ;;  %v7105_v0 = vld [vmem:[%s10628_s3 + $0x3e4] sm:$0xf]  ;;  %v6487_v48 = vld [vmem:[%s10628_s3 + $0x3f0] sm:$0xf0] }
 0x267   :  { %v2936_v38 = vadd.f32 %v2935_v23, %v9542_v1  ;;  %v6453_v23 = vld [vmem:[%s10628_s3 + $0x3a0] sm:$0xf]  ;;  %v6054_v41 = vor.u32 %v6999_v63, %v6053_v61 }
 0x268   :  { %v2856_v55 = vpop.f32.mrf.mxu2  ;;  %v2869_v56 = vpop.f32.mrf.mxu3  ;;  %v2967_v45 = vrot.slane %v2966_v11, 2 }
 0x269   :  { %v2937_v58 = vrot.slane %v2936_v38, 2  ;;  %3868 = vmatpush.bf16.msrb.mxu0 %v6054_v41  ;;  %3881 = vmatpush.bf16.msrb.mxu1 %v6182_v17 }
 0x26a   :  { %v2968_v15 = vadd.f32 %v2967_v45, %v2966_v11  ;;  %3894 = vmatpush.bf16.msrb.mxu2 %v6310_v20  ;;  %v6021_v45 = vld [vmem:[%s10628_s3 + $0x40] sm:$0xf] }
 0x26b   :  { %v2938_v60 = vadd.f32 %v2937_v58, %v2936_v38  ;;  %v7099_v38 = vld [vmem:[%s10628_s3 + $0x3ac] sm:$0xf0]  ;;  %v6022_v47 = vor.u32 %v6991_v59, %v6021_v45  ;;  %v5989_v20 = vld [vmem:[%s10628_s3] sm:$0xf]  ;;  %v6359_v45 = vld [vmem:[%s10628_s3 + $0x2f0] sm:$0xf0] }
 0x26c   :  { %v6454_v55 = vor.u32 %v7099_v38, %v6453_v23  ;;  %v2969_v3 = vrot.slane %v2968_v15, 1  ;;  %v6278_v38 = vor.u32 %v7055_v52, %v6277_v51  ;;  %v6087_v51 = vld [vmem:[%s10628_s3 + $0xd0] sm:$0xf0]  ;;  %v7037_v52 = vld [vmem:[%s10628_s3 + $0x1c4] sm:$0xf] }
 0x26d   :  { %v2939_v2 = vrot.slane %v2938_v60, 1  ;;  %3869 = vmatpush.bf16.msrb.mxu0 %v6038_v27 }
 0x26e   :  { %3906 = vmatpush.bf16.msrb.mxu3 %v6454_v55 }
 0x26f   :  { %v2940_v4 = vadd.f32 %v2939_v2, %v2938_v60  ;;  %v2962_v2 = vadd.f32 %v2961_v44, %v2960_v40  ;;  %v7095_v40 = vld [vmem:[%s10628_s3 + $0x38c] sm:$0xf0] }
 0x271   :  { %v9557_v9 = vmul.f32 %v2940_v4, %v8651_v57  ;;  %v2963_v7 = vrot.slane %v2962_v2, 1  ;;  %3870 = vmatpush.bf16.msrb.mxu0 %v6022_v47 }
 0x273   :  { %v2953_v39 = vsub.f32 %v9542_v1, %v9557_v9  ;;  %v2964_v49 = vadd.f32 %v2963_v7, %v2962_v2  ;;  %v7015_v7 = vld [vmem:[%s10628_s3 + $0x10c] sm:$0xf0] }
 0x275   :  { %v2957_v6 = vmul.f32 %v2953_v39, %v2953_v39  ;;  %v6437_v39 = vld [vmem:[%s10628_s3 + $0x380] sm:$0xf] }
 0x276   :  { %v6438_v11 = vor.u32 %v7095_v40, %v6437_v39  ;;  %v6983_v40 = vld [vmem:[%s10628_s3 + $0xc] sm:$0xf0] }
 0x277   :  { %v2880_v10 = vpop.f32.mrf.mxu0  ;;  %v2893_v29 = vpop.f32.mrf.mxu1  ;;  %v2971_v36 = vrot.slane %v2957_v6, 4 }
 0x278   :  { %v2894_v25 = vadd.f32 %v2893_v29, %v2880_v10  ;;  %v7027_v10 = vld [vmem:[%s10628_s3 + $0x16c] sm:$0xf0]  ;;  %v6293_v29 = vld [vmem:[%s10628_s3 + $0x260] sm:$0xf]  ;;  %3907 = vmatpush.bf16.msrb.mxu3 %v6438_v11 }
 0x279   :  { %v2972_v28 = vadd.f32 %v2971_v36, %v2957_v6  ;;  %v6165_v6 = vld [vmem:[%s10628_s3 + $0x160] sm:$0xf]  ;;  %v2970_v36 = vadd.f32 %v2969_v3, %v2968_v15  ;;  %v6294_v37 = vor.u32 %v7059_v31, %v6293_v29  ;;  %v6390_v3 = vor.u32 %v7083_v34, %v6389_v13  ;;  %v7079_v31 = vld [vmem:[%s10628_s3 + $0x30c] sm:$0xf0]  ;;  %v7065_v13 = vld [vmem:[%s10628_s3 + $0x2a4] sm:$0xf] }
 0x27a   :  { %v6166_v30 = vor.u32 %v7027_v10, %v6165_v6  ;;  %v6405_v15 = vld [vmem:[%s10628_s3 + $0x340] sm:$0xf]  ;;  %v5990_v6 = vor.u32 %v6983_v40, %v5989_v20  ;;  %v6327_v34 = vld [vmem:[%s10628_s3 + $0x2b0] sm:$0xf0]  ;;  %v7097_v20 = vld [vmem:[%s10628_s3 + $0x3a4] sm:$0xf] }
 0x27b   :  { %v2973_v56 = vrot.slane %v2972_v28, 2  ;;  %3895 = vmatpush.bf16.msrb.mxu2 %v6294_v37  ;;  %v2984_v53 = vmul.f32 %v2970_v36, %v8651_v57  ;;  %v6117_v11 = vld [vmem:[%s10628_s3 + $0x100] sm:$0xf]  ;;  %v7009_v36 = vld [vmem:[%s10628_s3 + $0xe4] sm:$0xf] }
 0x27c   :  { %3882 = vmatpush.bf16.msrb.mxu1 %v6166_v30  ;;  %3908 = vmatpush.bf16.msrb.mxu3 %v6422_v42  ;;  %v6118_v10 = vor.u32 %v7015_v7, %v6117_v11  ;;  %v6373_v30 = vld [vmem:[%s10628_s3 + $0x300] sm:$0xf]  ;;  %v7041_v37 = vld [vmem:[%s10628_s3 + $0x1e4] sm:$0xf]  ;;  %v6455_v40 = vld [vmem:[%s10628_s3 + $0x3b0] sm:$0xf0] }
 0x27d   :  { %v2974_v26 = vadd.f32 %v2973_v56, %v2972_v28  ;;  %v6005_v56 = vld [vmem:[%s10628_s3 + $0x20] sm:$0xf]  ;;  %v9735_v17 = vadd.f32 0.0001, %v2984_v53  ;;  %v6374_v35 = vor.u32 %v7079_v31, %v6373_v30  ;;  %v6997_v7 = vld [vmem:[%s10628_s3 + $0x84] sm:$0xf] }
 0x27e   :  { %v2906_v58 = vpop.f32.mrf.mxu2  ;;  %v2919_v60 = vpop.f32.mrf.mxu3  ;;  %v7061_v30 = vld [vmem:[%s10628_s3 + $0x284] sm:$0xf]  ;;  %v6311_v31 = vld [vmem:[%s10628_s3 + $0x290] sm:$0xf0] }
 0x27f   :  { %v2907_v4 = vadd.f32 %v2906_v58, %v2894_v25  ;;  %v2882_v5 = vpop.f32.mrf.mxu0  ;;  %v2895_v12 = vpop.f32.mrf.mxu1  ;;  %v2975_v28 = vrot.slane %v2974_v26, 1  ;;  %v7087_v25 = vld [vmem:[%s10628_s3 + $0x34c] sm:$0xf0]  ;;  %3896 = vmatpush.bf16.msrb.mxu2 %v6278_v38  ;;  %7154 = vrsqrt.f32 %v9735_v17  ;;  %v6215_v38 = vld [vmem:[%s10628_s3 + $0x1d0] sm:$0xf0]  ;;  %vm3011_vm1 = vweird.f32 %v9735_v17 }
 0x280   :  { %3883 = vmatpush.bf16.msrb.mxu1 %v6150_v50  ;;  %v6406_v55 = vor.u32 %v7087_v25, %v6405_v15  ;;  %v6987_v58 = vld [vmem:[%s10628_s3 + $0x2c] sm:$0xf0]  ;;  %v6261_v5 = vld [vmem:[%s10628_s3 + $0x220] sm:$0xf]  ;;  %v2983_v12 = vmul.f32 %v2964_v49, %v8651_v57  ;;  %v6490_v49 = vor.u32 %v7105_v0, %v6487_v48  ;;  %v7005_v50 = vld [vmem:[%s10628_s3 + $0xc4] sm:$0xf]  ;;  %v6218_v25 = vor.u32 %v7037_v52, %v6215_v38 }
 0x281   :  { %v9654_v19 = vadd.f32 %v2919_v60, %v2907_v4  ;;  %v6133_v60 = vld [vmem:[%s10628_s3 + $0x120] sm:$0xf]  ;;  %v2976_v61 = vadd.f32 %v2975_v28, %v2974_v26  ;;  %v6006_v2 = vor.u32 %v6987_v58, %v6005_v56  ;;  %v7019_v4 = vld [vmem:[%s10628_s3 + $0x12c] sm:$0xf0]  ;;  %v6262_v39 = vor.u32 %v7051_v16, %v6261_v5  ;;  %v7069_v15 = vld [vmem:[%s10628_s3 + $0x2c4] sm:$0xf] }
 0x282   :  { %3909 = vmatpush.bf16.msrb.mxu3 %v6406_v55  ;;  %v6134_v41 = vor.u32 %v7019_v4, %v6133_v60  ;;  %v6245_v26 = vld [vmem:[%s10628_s3 + $0x200] sm:$0xf]  ;;  %v9759_v27 = vadd.f32 0.0001, %v2983_v12  ;;  %v6343_v55 = vld [vmem:[%s10628_s3 + $0x2d0] sm:$0xf0] }
 0x283   :  { %v2941_v8 = vrot.slane %v9654_v19, 4  ;;  %3871 = vmatpush.bf16.msrb.mxu0 %v6006_v2  ;;  %v2985_v22 = vmul.f32 %v2976_v61, %v8651_v57  ;;  %3897 = vmatpush.bf16.msrb.mxu2 %v6262_v39  ;;  %v7101_v56 = vld [vmem:[%s10628_s3 + $0x3c4] sm:$0xf]  ;;  %v6471_v58 = vld [vmem:[%s10628_s3 + $0x3d0] sm:$0xf0] }
 0x284   :  { %3884 = vmatpush.bf16.msrb.mxu1 %v6134_v41  ;;  %v6474_v2 = vor.u32 %v7101_v56, %v6471_v58  ;;  %v7001_v4 = vld [vmem:[%s10628_s3 + $0xa4] sm:$0xf]  ;;  %v6071_v5 = vld [vmem:[%s10628_s3 + $0xb0] sm:$0xf0]  ;;  %vm3001_vm10 = vweird.f32 %v9759_v27 }
 0x285   :  { %v2942_v46 = vadd.f32 %v2941_v8, %v9654_v19  ;;  %v7047_v8 = vld [vmem:[%s10628_s3 + $0x20c] sm:$0xf0]  ;;  %v9788_v59 = vadd.f32 0.0001, %v2985_v22  ;;  %v9820_v60 = vpop.eup %7154  ;;  %v7033_v12 = vld [vmem:[%s10628_s3 + $0x1a4] sm:$0xf]  ;;  %v6074_v41 = vor.u32 %v7001_v4, %v6071_v5  ;;  %v6458_v22 = vor.u32 %v7097_v20, %v6455_v40 }
 0x286   :  { %v2908_v43 = vpop.f32.mrf.mxu2  ;;  %v2921_v44 = vpop.f32.mrf.mxu3  ;;  %3910 = vmatpush.bf16.msrb.mxu3 %v6390_v3  ;;  %v6246_v29 = vor.u32 %v7047_v8, %v6245_v26  ;;  %v6199_v16 = vld [vmem:[%s10628_s3 + $0x1b0] sm:$0xf0]  ;;  %v6330_v3 = vor.u32 %v7065_v13, %v6327_v34  ;;  %v3006_v11 = vmul.f32 %v9820_v60, %v9735_v17  ;;  %v7029_v8 = vld [vmem:[%s10628_s3 + $0x184] sm:$0xf]  ;;  %vm3012_vm0 = vweird.f32 %v9820_v60 }
 0x287   :  { %v2943_v62 = vrot.slane %v2942_v46, 2  ;;  %3872 = vmatpush.bf16.msrb.mxu0 %v5990_v6  ;;  %v6231_v43 = vld [vmem:[%s10628_s3 + $0x1f0] sm:$0xf0]  ;;  %v7073_v44 = vld [vmem:[%s10628_s3 + $0x2e4] sm:$0xf]  ;;  %7156 = vrsqrt.f32 %v9788_v59  ;;  %v6202_v39 = vor.u32 %v7033_v12, %v6199_v16  ;;  %vm3013_vm3 = vmor %vm3011_vm1, %vm3012_vm0  ;;  %vm3021_vm4 = vweird.f32 %v9788_v59 }
 0x288   :  { %3885 = vmatpush.bf16.msrb.mxu1 %v6118_v10  ;;  %3898 = vmatpush.bf16.msrb.mxu2 %v6246_v29  ;;  %v6362_v47 = vor.u32 %v7073_v44, %v6359_v45  ;;  %7158 = vrsqrt.f32 %v9759_v27  ;;  %v6055_v26 = vld [vmem:[%s10628_s3 + $0x90] sm:$0xf0]  ;;  %v7021_v12 = vld [vmem:[%s10628_s3 + $0x144] sm:$0xf] }
 0x289   :  { %v2944_v23 = vadd.f32 %v2943_v62, %v2942_v46  ;;  %v6103_v46 = vld [vmem:[%s10628_s3 + $0xf0] sm:$0xf0]  ;;  %v6234_v62 = vor.u32 %v7041_v37, %v6231_v43  ;;  %v6058_v10 = vor.u32 %v6997_v7, %v6055_v26  ;;  %v7093_v37 = vld [vmem:[%s10628_s3 + $0x384] sm:$0xf]  ;;  %v3007_v43 = vmul.f32 %v9820_v60, %v3006_v11 }
 0x28a   :  { %v6106_v42 = vor.u32 %v7009_v36, %v6103_v46  ;;  %3911 = vmatpush.bf16.msrb.mxu3 %v6374_v35  ;;  %v6183_v29 = vld [vmem:[%s10628_s3 + $0x190] sm:$0xf0]  ;;  %v6314_v46 = vor.u32 %v7061_v30, %v6311_v31  ;;  %v7053_v16 = vld [vmem:[%s10628_s3 + $0x244] sm:$0xf] }
 0x28b   :  { %v2945_v63 = vrot.slane %v2944_v23, 1  ;;  %v6186_v36 = vor.u32 %v7029_v8, %v6183_v29  ;;  %v6295_v52 = vld [vmem:[%s10628_s3 + $0x270] sm:$0xf0]  ;;  %v6985_v40 = vld [vmem:[%s10628_s3 + $0x24] sm:$0xf] }
 0x28c   :  { %3917 = vmatpush.bf16.msra.mxu0 %v6106_v42  ;;  %3930 = vmatpush.bf16.msra.mxu1 %v6234_v62  ;;  %v6439_v42 = vld [vmem:[%s10628_s3 + $0x390] sm:$0xf0]  ;;  %v7049_v26 = vld [vmem:[%s10628_s3 + $0x224] sm:$0xf] }
 0x28d   :  { %v2946_v18 = vadd.f32 %v2945_v63, %v2944_v23  ;;  %3943 = vmatpush.bf16.msra.mxu2 %v6362_v47  ;;  %v6090_v23 = vor.u32 %v7005_v50, %v6087_v51  ;;  %v6346_v63 = vor.u32 %v7069_v15, %v6343_v55  ;;  %v6442_v44 = vor.u32 %v7093_v37, %v6439_v42  ;;  %v6039_v62 = vld [vmem:[%s10628_s3 + $0x70] sm:$0xf0]  ;;  %v7025_v47 = vld [vmem:[%s10628_s3 + $0x164] sm:$0xf] }
 0x28e   :  { %3956 = vmatpush.bf16.msra.mxu3 %v6490_v49  ;;  %v6167_v50 = vld [vmem:[%s10628_s3 + $0x170] sm:$0xf0]  ;;  %v7057_v51 = vld [vmem:[%s10628_s3 + $0x264] sm:$0xf]  ;;  %v3008_v55 = vmul.f32 0.5, %v3007_v43 }
 0x28f   :  { %v9748_v24 = vmul.f32 %v2946_v18, %v8651_v57  ;;  %v6298_v38 = vor.u32 %v7057_v51, %v6295_v52  ;;  %v7089_v15 = vld [vmem:[%s10628_s3 + $0x364] sm:$0xf]  ;;  %v6279_v34 = vld [vmem:[%s10628_s3 + $0x250] sm:$0xf0] }
 0x290   :  { %3918 = vmatpush.bf16.msra.mxu0 %v6090_v23  ;;  %3931 = vmatpush.bf16.msra.mxu1 %v6218_v25  ;;  %v6170_v23 = vor.u32 %v7025_v47, %v6167_v50  ;;  %v6423_v25 = vld [vmem:[%s10628_s3 + $0x370] sm:$0xf0]  ;;  %v7081_v31 = vld [vmem:[%s10628_s3 + $0x324] sm:$0xf] }
 0x291   :  { %v2954_v33 = vsub.f32 %v9654_v19, %v9748_v24  ;;  %3944 = vmatpush.bf16.msra.mxu2 %v6346_v63  ;;  %v6426_v56 = vor.u32 %v7089_v15, %v6423_v25  ;;  %v6989_v63 = vld [vmem:[%s10628_s3 + $0x44] sm:$0xf]  ;;  %v6007_v11 = vld [vmem:[%s10628_s3 + $0x30] sm:$0xf0] }
 0x292   :  { %3957 = vmatpush.bf16.msra.mxu3 %v6474_v2  ;;  %v6023_v2 = vld [vmem:[%s10628_s3 + $0x50] sm:$0xf0]  ;;  %v6010_v30 = vor.u32 %v6985_v40, %v6007_v11  ;;  %v6981_v37 = vld [vmem:[%s10628_s3 + $0x4] sm:$0xf] }
 0x293   :  { %v2958_v28 = vmul.f32 %v2954_v33, %v2954_v33  ;;  %v9868_v33 = vpop.eup %7156  ;;  %v6026_v5 = vor.u32 %v6989_v63, %v6023_v2  ;;  %v6135_v7 = vld [vmem:[%s10628_s3 + $0x130] sm:$0xf0]  ;;  %v7013_v43 = vld [vmem:[%s10628_s3 + $0x104] sm:$0xf] }
 0x294   :  { %3919 = vmatpush.bf16.msra.mxu0 %v6074_v41  ;;  %3932 = vmatpush.bf16.msra.mxu1 %v6202_v39  ;;  %v9886_v0 = vpop.eup %7158  ;;  %v3016_v48 = vmul.f32 %v9868_v33, %v9788_v59  ;;  %v6151_v41 = vld [vmem:[%s10628_s3 + $0x150] sm:$0xf0]  ;;  %vm3022_vm2 = vweird.f32 %v9868_v33 }
 0x295   :  { %v2977_v53 = vrot.slane %v2958_v28, 4  ;;  %3945 = vmatpush.bf16.msra.mxu2 %v6330_v3  ;;  %v2996_v58 = vmul.f32 %v9886_v0, %v9759_v27  ;;  %v6154_v13 = vor.u32 %v7021_v12, %v6151_v41  ;;  %v6407_v39 = vld [vmem:[%s10628_s3 + $0x350] sm:$0xf0]  ;;  %v6282_v3 = vor.u32 %v7053_v16, %v6279_v34  ;;  %vm3023_vm7 = vmor %vm3021_vm4, %vm3022_vm2 }
 0x296   :  { %3958 = vmatpush.bf16.msra.mxu3 %v6458_v22  ;;  %v3017_v4 = vmul.f32 %v9868_v33, %v3016_v48  ;;  %v7017_v22 = vld [vmem:[%s10628_s3 + $0x124] sm:$0xf]  ;;  %v6263_v8 = vld [vmem:[%s10628_s3 + $0x230] sm:$0xf0]  ;;  %vm3002_vm6 = vweird.f32 %v9886_v0 }
 0x297   :  { %v2978_v61 = vadd.f32 %v2977_v53, %v2958_v28  ;;  %v6993_v28 = vld [vmem:[%s10628_s3 + $0x64] sm:$0xf]  ;;  %v5991_v42 = vld [vmem:[%s10628_s3 + $0x10] sm:$0xf0]  ;;  %vm3003_vm11 = vmor %vm3001_vm10, %vm3002_vm6 }
 0x298   :  { %3920 = vmatpush.bf16.msra.mxu0 %v6058_v10  ;;  %v6042_v49 = vor.u32 %v6993_v28, %v6039_v62  ;;  %3933 = vmatpush.bf16.msra.mxu1 %v6186_v36  ;;  %v3009_v10 = vsub.f32 1.5, %v3008_v55  ;;  %v3018_v29 = vmul.f32 0.5, %v3017_v4  ;;  %v6138_v36 = vor.u32 %v7017_v22, %v6135_v7  ;;  %v7045_v28 = vld [vmem:[%s10628_s3 + $0x204] sm:$0xf]  ;;  %v6247_v62 = vld [vmem:[%s10628_s3 + $0x210] sm:$0xf0] }
 0x299   :  { %v2979_v18 = vrot.slane %v2978_v61, 2  ;;  %3946 = vmatpush.bf16.msra.mxu2 %v6314_v46  ;;  %v6266_v46 = vor.u32 %v7049_v26, %v6263_v8  ;;  %v6375_v50 = vld [vmem:[%s10628_s3 + $0x310] sm:$0xf0] }
 0x29a   :  { %3959 = vmatpush.bf16.msra.mxu3 %v6442_v44  ;;  %v3019_v51 = vsub.f32 1.5, %v3018_v29  ;;  %v3010_v15 = vmul.f32 %v9820_v60, %v3009_v10  ;;  %v5986_v29 = vld [vmem:[%s10630_s5 + $0x3] ss:$8 sm:$0xf] }
 0x29b   :  { %v2980_v6 = vadd.f32 %v2979_v18, %v2978_v61  ;;  %v7085_v18 = vld [vmem:[%s10628_s3 + $0x344] sm:$0xf] }
 0x29c   :  { %3921 = vmatpush.bf16.msra.mxu0 %v6042_v49  ;;  %3934 = vmatpush.bf16.msra.mxu1 %v6170_v23  ;;  %v6410_v20 = vor.u32 %v7085_v18, %v6407_v39  ;;  %v7077_v49 = vld [vmem:[%s10628_s3 + $0x304] sm:$0xf]  ;;  %v3014_v2 = vsel %vm3013_vm3, %v9820_v60, %v3010_v15 }
 0x29d   :  { %v2981_v35 = vrot.slane %v2980_v6, 1  ;;  %3947 = vmatpush.bf16.msra.mxu2 %v6298_v38  ;;  %v6250_v38 = vor.u32 %v7045_v28, %v6247_v62  ;;  %v6378_v55 = vor.u32 %v7077_v49, %v6375_v50  ;;  %v3039_v41 = vrot.slane %v3014_v2, 7 }
 0x29e   :  { %3960 = vmatpush.bf16.msra.mxu3 %v6426_v56 }
 0x29f   :  { %v2982_v45 = vadd.f32 %v2981_v35, %v2980_v6  ;;  %v2997_v6 = vmul.f32 %v9886_v0, %v2996_v58  ;;  %v6391_v35 = vld [vmem:[%s10628_s3 + $0x330] sm:$0xf0]  ;;  %v3020_v58 = vmul.f32 %v9868_v33, %v3019_v51 }
 0x2a0   :  { %3922 = vmatpush.bf16.msra.mxu0 %v6026_v5  ;;  %3935 = vmatpush.bf16.msra.mxu1 %v6154_v13  ;;  %v6394_v44 = vor.u32 %v7081_v31, %v6391_v35  ;;  %v5985_v13 = vld [vmem:[%s10630_s5 + $0x2] ss:$8 sm:$0xf] }
 0x2a1   :  { %v2986_v53 = vmul.f32 %v2982_v45, %v8651_v57  ;;  %3948 = vmatpush.bf16.msra.mxu2 %v6282_v3  ;;  %v6119_v45 = vld [vmem:[%s10628_s3 + $0x110] sm:$0xf0]  ;;  %v2998_v48 = vmul.f32 0.5, %v2997_v6  ;;  %v3024_v5 = vsel %vm3023_vm7, %v9868_v33, %v3020_v58  ;;  %v6093_v58 = vld [vmem:[%s10628_s3 + $0xc8] sm:$0xf] }
 0x2a2   :  { %3961 = vmatpush.bf16.msra.mxu3 %v6410_v20  ;;  %v6122_v23 = vor.u32 %v7013_v43, %v6119_v45  ;;  %v3040_v59 = vrot.slane %v3024_v5, 6  ;;  %v6109_v43 = vld [vmem:[%s10628_s3 + $0xe8] sm:$0xf]  ;;  %v7040_v5 = vld [vmem:[%s10628_s3 + $0x1d4] sm:$0xf0] }
 0x2a3   :  { %v9908_v61 = vadd.f32 0.0001, %v2986_v53  ;;  %v5994_v53 = vor.u32 %v6981_v37, %v5991_v42  ;;  %v2999_v56 = vsub.f32 1.5, %v2998_v48  ;;  %v6493_v48 = vld [vmem:[%s10628_s3 + $0x3e8] sm:$0xf] }
 0x2a4   :  { %3923 = vmatpush.bf16.msra.mxu0 %v6010_v30  ;;  %3936 = vmatpush.bf16.msra.mxu1 %v6138_v36 }
 0x2a5   :  { %7160 = vrsqrt.f32 %v9908_v61  ;;  %3949 = vmatpush.bf16.msra.mxu2 %v6266_v46  ;;  %v3000_v17 = vmul.f32 %v9886_v0, %v2999_v56  ;;  %vm3031_vm8 = vweird.f32 %v9908_v61 }
 0x2a6   :  { %3962 = vmatpush.bf16.msra.mxu3 %v6394_v44 }
 0x2a7   :  { %v3004_v34 = vsel %vm3003_vm11, %v9886_v0, %v3000_v17  ;;  %v6221_v17 = vld [vmem:[%s10628_s3 + $0x1c8] sm:$0xf] }
 0x2a8   :  { %3924 = vmatpush.bf16.msra.mxu0 %v5994_v53  ;;  %3937 = vmatpush.bf16.msra.mxu1 %v6122_v23  ;;  %v3042_v18 = vsel %vm1889_vm12, %v3004_v34, %v3039_v41  ;;  %v7108_v53 = vld [vmem:[%s10628_s3 + $0x3f4] sm:$0xf0]  ;;  %v6077_v34 = vld [vmem:[%s10628_s3 + $0xa8] sm:$0xf] }
 0x2a9   :  { %3950 = vmatpush.bf16.msra.mxu2 %v6250_v38  ;;  %v7072_v41 = vld [vmem:[%s10628_s3 + $0x2d4] sm:$0xf0] }
 0x2aa   :  { %3963 = vmatpush.bf16.msra.mxu3 %v6378_v55 }
 0x2ab   :  { %v7161_v47 = vpop.eup %7160 }
 0x2ac   :  { %v3026_v52 = vmul.f32 %v7161_v47, %v9908_v61  ;;  %vm3032_vm5 = vweird.f32 %v7161_v47 }
 0x2ad   :  { %vm3033_vm9 = vmor %vm3031_vm8, %vm3032_vm5 }
 0x2ae   :  { %v3027_v25 = vmul.f32 %v7161_v47, %v3026_v52 }
 0x2b0   :  { %v3028_v63 = vmul.f32 0.5, %v3027_v25 }
 0x2b2   :  { %v3029_v4 = vsub.f32 1.5, %v3028_v63  ;;  %v7008_v63 = vld [vmem:[%s10628_s3 + $0xd4] sm:$0xf0] }
 0x2b4   :  { %v3030_v12 = vmul.f32 %v7161_v47, %v3029_v4  ;;  %v6494_v4 = vor.u32 %v7108_v53, %v6493_v48  ;;  %v6413_v53 = vld [vmem:[%s10628_s3 + $0x348] sm:$0xf] }
 0x2b6   :  { %v3034_v60 = vsel %vm3033_vm9, %v7161_v47, %v3030_v12  ;;  %v7076_v47 = vld [vmem:[%s10628_s3 + $0x2f4] sm:$0xf0]  ;;  %v6349_v12 = vld [vmem:[%s10628_s3 + $0x2c8] sm:$0xf] }
 0x2b7   :  { %v3041_v16 = vrot.slane %v3034_v60, 5  ;;  %v6477_v60 = vld [vmem:[%s10628_s3 + $0x3c8] sm:$0xf] }
 0x2b9   :  { %v3043_v33 = vsel %vm1891_vm13, %v3040_v59, %v3041_v16  ;;  %v7104_v59 = vld [vmem:[%s10628_s3 + $0x3d4] sm:$0xf0]  ;;  %v6094_v16 = vor.u32 %v7008_v63, %v6093_v58  ;;  %v6013_v63 = vld [vmem:[%s10628_s3 + $0x28] sm:$0xf] }
 0x2ba   :  { %v3044_v61 = vsel %vm1893_vm15, %v3042_v18, %v3043_v33  ;;  %v7004_v18 = vld [vmem:[%s10628_s3 + $0xb4] sm:$0xf0]  ;;  %v6350_v33 = vor.u32 %v7072_v41, %v6349_v12  ;;  %v6269_v41 = vld [vmem:[%s10628_s3 + $0x228] sm:$0xf] }
 0x2bb   :  { %v3046_v39 = vmul.f32 %v5985_v13, %v3044_v61  ;;  %v6222_v13 = vor.u32 %v7040_v5, %v6221_v17  ;;  %v6478_v61 = vor.u32 %v7104_v59, %v6477_v60  ;;  %v6141_v5 = vld [vmem:[%s10628_s3 + $0x128] sm:$0xf]  ;;  %v7020_v12 = vld [vmem:[%s10628_s3 + $0x134] sm:$0xf0] }
 0x2bc   :  { %v7052_v60 = vld [vmem:[%s10628_s3 + $0x234] sm:$0xf0]  ;;  %v6397_v59 = vld [vmem:[%s10628_s3 + $0x328] sm:$0xf] }
 0x2bd   :  { %v3050_v3 = vperm.slane %v3046_v39, 2  ;;  %v3051_v20 = vperm.slane %v3046_v39, 3  ;;  %v3049_v27 = vperm.slane %v3046_v39, 1  ;;  %v3048_v40 = vperm.slane %v3046_v39, 0  ;;  %v6205_v39 = vld [vmem:[%s10628_s3 + $0x1a8] sm:$0xf] }
 0x2bf   :  { %v3058_v11 = vmul.f32 %v3050_v3, %v9557_v9  ;;  %v3059_v22 = vmul.f32 %v3051_v20, %v9748_v24  ;;  %v3057_v6 = vmul.f32 %v3049_v27, %v9548_v14  ;;  %v3056_v0 = vmul.f32 %v3048_v40, %v9545_v54 }
 0x2c0   :  { %v3075_v24 = vmul.f32 %v3051_v20, %v9654_v19  ;;  %v3072_v14 = vmul.f32 %v3048_v40, %v9534_v21  ;;  %v3073_v35 = vmul.f32 %v3049_v27, %v9538_v32  ;;  %v3074_v54 = vmul.f32 %v3050_v3, %v9542_v1  ;;  %v7012_v21 = vld [vmem:[%s10628_s3 + $0xf4] sm:$0xf0]  ;;  %v6237_v32 = vld [vmem:[%s10628_s3 + $0x1e8] sm:$0xf] }
 0x2c1   :  { %v3065_v7 = vrot.slane %v3058_v11, 6  ;;  %v3066_v26 = vrot.slane %v3059_v22, 5  ;;  %v3064_v8 = vrot.slane %v3057_v6, 7  ;;  %v7044_v1 = vld [vmem:[%s10628_s3 + $0x1f4] sm:$0xf0]  ;;  %v6110_v23 = vor.u32 %v7012_v21, %v6109_v43 }
 0x2c2   :  { %v6365_v19 = vld [vmem:[%s10628_s3 + $0x2e8] sm:$0xf]  ;;  %v6238_v38 = vor.u32 %v7044_v1, %v6237_v32  ;;  %v7036_v3 = vld [vmem:[%s10628_s3 + $0x1b4] sm:$0xf0]  ;;  %v6078_v22 = vor.u32 %v7004_v18, %v6077_v34  ;;  %v6142_v18 = vor.u32 %v7020_v12, %v6141_v5  ;;  %v7030_v12 = vld [vmem:[%s10628_s3 + $0x18c] sm:$0xf] }
 0x2c3   :  { %v3068_v10 = vsel %vm1891_vm13, %v3065_v7, %v3066_v26  ;;  %v3067_v30 = vsel %vm1889_vm12, %v3056_v0, %v3064_v8  ;;  %v6366_v2 = vor.u32 %v7076_v47, %v6365_v19  ;;  %v6333_v20 = vld [vmem:[%s10628_s3 + $0x2a8] sm:$0xf]  ;;  %v7068_v27 = vld [vmem:[%s10628_s3 + $0x2b4] sm:$0xf0]  ;;  %v6206_v6 = vor.u32 %v7036_v3, %v6205_v39 }
 0x2c4   :  { %v3069_v31 = vsel %vm1893_vm15, %v3067_v30, %v3068_v10  ;;  %v6461_v40 = vld [vmem:[%s10628_s3 + $0x3a8] sm:$0xf]  ;;  %v7100_v11 = vld [vmem:[%s10628_s3 + $0x3b4] sm:$0xf0]  ;;  %v6334_v0 = vor.u32 %v7068_v27, %v6333_v20  ;;  %v6270_v3 = vor.u32 %v7052_v60, %v6269_v41  ;;  %v6191_v41 = vld [vmem:[%s10628_s3 + $0x198] sm:$0xf0] }
 0x2c5   :  { %v3071_v9 = vsub.f32 %v5986_v29, %v3069_v31  ;;  %v6061_v7 = vld [vmem:[%s10628_s3 + $0x88] sm:$0xf]  ;;  %v7000_v26 = vld [vmem:[%s10628_s3 + $0x94] sm:$0xf0]  ;;  %v6462_v8 = vor.u32 %v7100_v11, %v6461_v40  ;;  %v7062_v60 = vld [vmem:[%s10628_s3 + $0x28c] sm:$0xf] }
 0x2c6   :  { %v6189_v10 = vld [vmem:[%s10628_s3 + $0x188] sm:$0xf]  ;;  %v7032_v29 = vld [vmem:[%s10628_s3 + $0x194] sm:$0xf0] }
 0x2c7   :  { %v3077_v36 = vperm.slane %v3071_v9, 0  ;;  %v3078_v46 = vperm.slane %v3071_v9, 1  ;;  %v3079_v37 = vperm.slane %v3071_v9, 2  ;;  %v3080_v42 = vperm.slane %v3071_v9, 3  ;;  %v6317_v30 = vld [vmem:[%s10628_s3 + $0x288] sm:$0xf] }
 0x2c8   :  { %v7064_v31 = vld [vmem:[%s10628_s3 + $0x294] sm:$0xf0]  ;;  %v6445_v9 = vld [vmem:[%s10628_s3 + $0x388] sm:$0xf] }
 0x2c9   :  { %v3085_v44 = vadd.f32 %v3077_v36, %v3072_v14  ;;  %v3086_v45 = vadd.f32 %v3078_v46, %v3073_v35  ;;  %v3087_v28 = vadd.f32 %v3079_v37, %v3074_v54  ;;  %v3088_v62 = vadd.f32 %v3080_v42, %v3075_v24  ;;  %v7096_v24 = vld [vmem:[%s10628_s3 + $0x394] sm:$0xf0]  ;;  %v6045_v54 = vld [vmem:[%s10628_s3 + $0x68] sm:$0xf] }
 0x2ca   :  { %v6062_v14 = vor.u32 %v7000_v26, %v6061_v7  ;;  %v6190_v35 = vor.u32 %v7032_v29, %v6189_v10  ;;  %v6996_v36 = vld [vmem:[%s10628_s3 + $0x74] sm:$0xf0]  ;;  %v6318_v46 = vor.u32 %v7064_v31, %v6317_v30  ;;  %v6446_v37 = vor.u32 %v7096_v24, %v6445_v9  ;;  %v6173_v42 = vld [vmem:[%s10628_s3 + $0x168] sm:$0xf]  ;;  %v6111_v7 = vld [vmem:[%s10628_s3 + $0xf8] sm:$0xf0] }
 0x2cb   :  { %v3089_v49 = vmax.f32 %v3085_v44, 0.0  ;;  %v3090_v50 = vmax.f32 %v3086_v45, 0.0  ;;  %v3091_v51 = vmax.f32 %v3087_v28, 0.0  ;;  %v3092_v52 = vmax.f32 %v3088_v62, 0.0  ;;  %v7028_v43 = vld [vmem:[%s10628_s3 + $0x174] sm:$0xf0] }
 0x2cc   :  { %v6301_v44 = vld [vmem:[%s10628_s3 + $0x268] sm:$0xf]  ;;  %v7060_v45 = vld [vmem:[%s10628_s3 + $0x274] sm:$0xf0]  ;;  %v6046_v21 = vor.u32 %v6996_v36, %v6045_v54  ;;  %v6174_v32 = vor.u32 %v7028_v43, %v6173_v42  ;;  %v7042_v26 = vld [vmem:[%s10628_s3 + $0x1ec] sm:$0xf] }
 0x2cd   :  { %v10043_v15 = vpack.c.bf16 %v3089_v49, %v3089_v49  ;;  %v10045_v25 = vpack.c.bf16 %v3090_v50, %v3090_v50  ;;  %v10047_v55 = vpack.c.bf16 %v3091_v51, %v3091_v51  ;;  %v10049_v56 = vpack.c.bf16 %v3092_v52, %v3092_v52  ;;  %v6429_v28 = vld [vmem:[%s10628_s3 + $0x368] sm:$0xf]  ;;  %v7092_v62 = vld [vmem:[%s10628_s3 + $0x374] sm:$0xf0]  ;;  %v6367_v30 = vld [vmem:[%s10628_s3 + $0x2f8] sm:$0xf0] }
 0x2ce   :  { %v6029_v1 = vld [vmem:[%s10628_s3 + $0x48] sm:$0xf]  ;;  %v6992_v19 = vld [vmem:[%s10628_s3 + $0x54] sm:$0xf0]  ;;  %v6302_v47 = vor.u32 %v7060_v45, %v6301_v44  ;;  %v6430_v48 = vor.u32 %v7092_v62, %v6429_v28  ;;  %v7106_v31 = vld [vmem:[%s10628_s3 + $0x3ec] sm:$0xf] }
 0x2cf   :  { %3873 = vmatmul.bf16.vlgmr.msrb.gmra.mxu0 %v10043_v15  ;;  %3886 = vmatmul.bf16.vlgmr.msrb.gmra.mxu1 %v10045_v25  ;;  %v6157_v49 = vld [vmem:[%s10628_s3 + $0x148] sm:$0xf]  ;;  %v7024_v50 = vld [vmem:[%s10628_s3 + $0x154] sm:$0xf0]  ;;  %v6495_v9 = vld [vmem:[%s10628_s3 + $0x3f8] sm:$0xf0] }
 0x2d0   :  { %3899 = vmatmul.bf16.vlgmr.msrb.gmra.mxu2 %v10047_v55  ;;  %3912 = vmatmul.bf16.vlgmr.msrb.gmra.mxu3 %v10049_v56  ;;  %v6285_v51 = vld [vmem:[%s10628_s3 + $0x248] sm:$0xf]  ;;  %v7056_v52 = vld [vmem:[%s10628_s3 + $0x254] sm:$0xf0]  ;;  %v6158_v58 = vor.u32 %v7024_v50, %v6157_v49  ;;  %v7006_v36 = vld [vmem:[%s10628_s3 + $0xcc] sm:$0xf]  ;;  %v6498_v42 = vor.u32 %v7106_v31, %v6495_v9 }
 0x2d1   :  { %3969 = vmatpush.bf16.msrb.mxu0 %v6110_v23  ;;  %3982 = vmatpush.bf16.msrb.mxu1 %v6238_v38  ;;  %v7088_v23 = vld [vmem:[%s10628_s3 + $0x354] sm:$0xf0]  ;;  %v6030_v38 = vor.u32 %v6992_v19, %v6029_v1  ;;  %v6253_v27 = vld [vmem:[%s10628_s3 + $0x208] sm:$0xf]  ;;  %v7038_v43 = vld [vmem:[%s10628_s3 + $0x1cc] sm:$0xf] }
 0x2d2   :  { %3995 = vmatpush.bf16.msrb.mxu2 %v6366_v2  ;;  %4008 = vmatpush.bf16.msrb.mxu3 %v6494_v4  ;;  %v6988_v2 = vld [vmem:[%s10628_s3 + $0x34] sm:$0xf0]  ;;  %v6286_v4 = vor.u32 %v7056_v52, %v6285_v51  ;;  %v6414_v17 = vor.u32 %v7088_v23, %v6413_v53  ;;  %v6381_v11 = vld [vmem:[%s10628_s3 + $0x308] sm:$0xf]  ;;  %v6223_v44 = vld [vmem:[%s10628_s3 + $0x1d8] sm:$0xf0] }
 0x2d3   :  { %v6014_v34 = vor.u32 %v6988_v2, %v6013_v63  ;;  %v7016_v39 = vld [vmem:[%s10628_s3 + $0x114] sm:$0xf0]  ;;  %v7070_v45 = vld [vmem:[%s10628_s3 + $0x2cc] sm:$0xf]  ;;  %v6351_v28 = vld [vmem:[%s10628_s3 + $0x2d8] sm:$0xf0]  ;;  %v6226_v1 = vor.u32 %v7038_v43, %v6223_v44 }
 0x2d4   :  { %v7048_v40 = vld [vmem:[%s10628_s3 + $0x214] sm:$0xf0]  ;;  %v7102_v62 = vld [vmem:[%s10628_s3 + $0x3cc] sm:$0xf]  ;;  %v6207_v51 = vld [vmem:[%s10628_s3 + $0x1b8] sm:$0xf0] }
 0x2d5   :  { %3970 = vmatpush.bf16.msrb.mxu0 %v6094_v16  ;;  %3983 = vmatpush.bf16.msrb.mxu1 %v6222_v13  ;;  %v7084_v16 = vld [vmem:[%s10628_s3 + $0x334] sm:$0xf0]  ;;  %v5997_v13 = vld [vmem:[%s10628_s3 + $0x8] sm:$0xf]  ;;  %v6254_v24 = vor.u32 %v7048_v40, %v6253_v27  ;;  %v7002_v19 = vld [vmem:[%s10628_s3 + $0xac] sm:$0xf] }
 0x2d6   :  { %3996 = vmatpush.bf16.msrb.mxu2 %v6350_v33  ;;  %4009 = vmatpush.bf16.msrb.mxu3 %v6478_v61  ;;  %v6984_v33 = vld [vmem:[%s10628_s3 + $0x14] sm:$0xf0]  ;;  %v6125_v61 = vld [vmem:[%s10628_s3 + $0x108] sm:$0xf]  ;;  %v6398_v20 = vor.u32 %v7084_v16, %v6397_v59  ;;  %v7034_v50 = vld [vmem:[%s10628_s3 + $0x1ac] sm:$0xf] }
 0x2d7   :  { %v5998_v10 = vor.u32 %v6984_v33, %v5997_v13  ;;  %v6126_v29 = vor.u32 %v7016_v39, %v6125_v61  ;;  %v7066_v52 = vld [vmem:[%s10628_s3 + $0x2ac] sm:$0xf]  ;;  %v6335_v53 = vld [vmem:[%s10628_s3 + $0x2b8] sm:$0xf0]  ;;  %v6210_v63 = vor.u32 %v7034_v50, %v6207_v51 }
 0x2d8   :  { %v7098_v23 = vld [vmem:[%s10628_s3 + $0x3ac] sm:$0xf]  ;;  %v6319_v59 = vld [vmem:[%s10628_s3 + $0x298] sm:$0xf0] }
 0x2d9   :  { %3971 = vmatpush.bf16.msrb.mxu0 %v6078_v22  ;;  %3984 = vmatpush.bf16.msrb.mxu1 %v6206_v6  ;;  %v7080_v22 = vld [vmem:[%s10628_s3 + $0x314] sm:$0xf0]  ;;  %v7010_v6 = vld [vmem:[%s10628_s3 + $0xec] sm:$0xf]  ;;  %v6447_v13 = vld [vmem:[%s10628_s3 + $0x398] sm:$0xf0]  ;;  %v6322_v39 = vor.u32 %v7062_v60, %v6319_v59 }
 0x2da   :  { %3997 = vmatpush.bf16.msrb.mxu2 %v6334_v0  ;;  %4010 = vmatpush.bf16.msrb.mxu3 %v6462_v8  ;;  %v6239_v0 = vld [vmem:[%s10628_s3 + $0x1f8] sm:$0xf0]  ;;  %v7074_v8 = vld [vmem:[%s10628_s3 + $0x2ec] sm:$0xf] }
 0x2db   :  { %v6242_v54 = vor.u32 %v7042_v26, %v6239_v0  ;;  %v6998_v2 = vld [vmem:[%s10628_s3 + $0x8c] sm:$0xf]  ;;  %v6047_v61 = vld [vmem:[%s10628_s3 + $0x78] sm:$0xf0] }
 0x2dc   :  { %v7094_v16 = vld [vmem:[%s10628_s3 + $0x38c] sm:$0xf]  ;;  %v6175_v27 = vld [vmem:[%s10628_s3 + $0x178] sm:$0xf0] }
 0x2dd   :  { %3972 = vmatpush.bf16.msrb.mxu0 %v6062_v14  ;;  %3985 = vmatpush.bf16.msrb.mxu1 %v6190_v35  ;;  %v6382_v14 = vor.u32 %v7080_v22, %v6381_v11  ;;  %v6114_v35 = vor.u32 %v7010_v6, %v6111_v7  ;;  %v6994_v33 = vld [vmem:[%s10628_s3 + $0x6c] sm:$0xf]  ;;  %v6303_v11 = vld [vmem:[%s10628_s3 + $0x278] sm:$0xf0] }
 0x2de   :  { %3998 = vmatpush.bf16.msrb.mxu2 %v6318_v46  ;;  %4011 = vmatpush.bf16.msrb.mxu3 %v6446_v37  ;;  %v6095_v46 = vld [vmem:[%s10628_s3 + $0xd8] sm:$0xf0]  ;;  %v6370_v37 = vor.u32 %v7074_v8, %v6367_v30  ;;  %v7058_v40 = vld [vmem:[%s10628_s3 + $0x26c] sm:$0xf]  ;;  %v6050_v7 = vor.u32 %v6994_v33, %v6047_v61 }
 0x2df   :  { %3925 = vmatmul.bf16.vlgmr.msra.gmra.mxu0 %v10043_v15  ;;  %3938 = vmatmul.bf16.vlgmr.msra.gmra.mxu1 %v10045_v25  ;;  %v7090_v22 = vld [vmem:[%s10628_s3 + $0x36c] sm:$0xf]  ;;  %v6431_v6 = vld [vmem:[%s10628_s3 + $0x378] sm:$0xf0] }
 0x2e0   :  { %3951 = vmatmul.bf16.vlgmr.msra.gmra.mxu2 %v10047_v55  ;;  %3964 = vmatmul.bf16.vlgmr.msra.gmra.mxu3 %v10049_v56  ;;  %v6990_v0 = vld [vmem:[%s10628_s3 + $0x4c] sm:$0xf]  ;;  %v6031_v8 = vld [vmem:[%s10628_s3 + $0x58] sm:$0xf0] }
 0x2e1   :  { %3973 = vmatpush.bf16.msrb.mxu0 %v6046_v21  ;;  %3986 = vmatpush.bf16.msrb.mxu1 %v6174_v32  ;;  %v6479_v21 = vld [vmem:[%s10628_s3 + $0x3d8] sm:$0xf0]  ;;  %v6098_v32 = vor.u32 %v7006_v36, %v6095_v46  ;;  %v7022_v30 = vld [vmem:[%s10628_s3 + $0x14c] sm:$0xf] }
 0x2e2   :  { %3999 = vmatpush.bf16.msrb.mxu2 %v6302_v47  ;;  %4012 = vmatpush.bf16.msrb.mxu3 %v6430_v48  ;;  %v6079_v47 = vld [vmem:[%s10628_s3 + $0xb8] sm:$0xf0]  ;;  %v6354_v48 = vor.u32 %v7070_v45, %v6351_v28  ;;  %v6482_v49 = vor.u32 %v7102_v62, %v6479_v21  ;;  %v7054_v9 = vld [vmem:[%s10628_s3 + $0x24c] sm:$0xf] }
 0x2e3   :  { %v6159_v31 = vld [vmem:[%s10628_s3 + $0x158] sm:$0xf0]  ;;  %v6986_v46 = vld [vmem:[%s10628_s3 + $0x2c] sm:$0xf] }
 0x2e4   :  { %v6162_v36 = vor.u32 %v7022_v30, %v6159_v31  ;;  %v7018_v44 = vld [vmem:[%s10628_s3 + $0x12c] sm:$0xf]  ;;  %v6143_v45 = vld [vmem:[%s10628_s3 + $0x138] sm:$0xf0] }
 0x2e5   :  { %3974 = vmatpush.bf16.msrb.mxu0 %v6030_v38  ;;  %3987 = vmatpush.bf16.msrb.mxu1 %v6158_v58  ;;  %v6463_v38 = vld [vmem:[%s10628_s3 + $0x3b8] sm:$0xf0]  ;;  %v6082_v58 = vor.u32 %v7002_v19, %v6079_v47  ;;  %v7050_v28 = vld [vmem:[%s10628_s3 + $0x22c] sm:$0xf]  ;;  %v6146_v19 = vor.u32 %v7018_v44, %v6143_v45 }
 0x2e6   :  { %4000 = vmatpush.bf16.msrb.mxu2 %v6286_v4  ;;  %4013 = vmatpush.bf16.msrb.mxu3 %v6414_v17  ;;  %v6063_v4 = vld [vmem:[%s10628_s3 + $0x98] sm:$0xf0]  ;;  %v6338_v17 = vor.u32 %v7066_v52, %v6335_v53  ;;  %v6466_v5 = vor.u32 %v7098_v23, %v6463_v38  ;;  %v7082_v21 = vld [vmem:[%s10628_s3 + $0x32c] sm:$0xf] }
 0x2e7   :  { %v6271_v62 = vld [vmem:[%s10628_s3 + $0x238] sm:$0xf0]  ;;  %v6982_v47 = vld [vmem:[%s10628_s3 + $0xc] sm:$0xf] }
 0x2e8   :  { %v7014_v51 = vld [vmem:[%s10628_s3 + $0x10c] sm:$0xf]  ;;  %v6127_v52 = vld [vmem:[%s10628_s3 + $0x118] sm:$0xf0] }
 0x2e9   :  { %3975 = vmatpush.bf16.msrb.mxu0 %v6014_v34  ;;  %3988 = vmatpush.bf16.msrb.mxu1 %v6142_v18  ;;  %v6066_v34 = vor.u32 %v6998_v2, %v6063_v4  ;;  %v6194_v18 = vor.u32 %v7030_v12, %v6191_v41  ;;  %v7046_v53 = vld [vmem:[%s10628_s3 + $0x20c] sm:$0xf]  ;;  %v6255_v23 = vld [vmem:[%s10628_s3 + $0x218] sm:$0xf0]  ;;  %v6130_v2 = vor.u32 %v7014_v51, %v6127_v52 }
 0x2ea   :  { %4001 = vmatpush.bf16.msrb.mxu2 %v6270_v3  ;;  %4014 = vmatpush.bf16.msrb.mxu3 %v6398_v20  ;;  %v6450_v3 = vor.u32 %v7094_v16, %v6447_v13  ;;  %v7026_v20 = vld [vmem:[%s10628_s3 + $0x16c] sm:$0xf]  ;;  %v6258_v4 = vor.u32 %v7046_v53, %v6255_v23 }
 0x2eb   :  { %v6178_v26 = vor.u32 %v7026_v20, %v6175_v27  ;;  %v7078_v38 = vld [vmem:[%s10628_s3 + $0x30c] sm:$0xf] }
 0x2ed   :  { %3976 = vmatpush.bf16.msrb.mxu0 %v5998_v10  ;;  %3989 = vmatpush.bf16.msrb.mxu1 %v6126_v29  ;;  %v6306_v10 = vor.u32 %v7058_v40, %v6303_v11  ;;  %v6434_v29 = vor.u32 %v7090_v22, %v6431_v6 }
 0x2ee   :  { %4002 = vmatpush.bf16.msrb.mxu2 %v6254_v24  ;;  %4015 = vmatpush.bf16.msrb.mxu3 %v6382_v14  ;;  %v6287_v24 = vld [vmem:[%s10628_s3 + $0x258] sm:$0xf0]  ;;  %v7086_v14 = vld [vmem:[%s10628_s3 + $0x34c] sm:$0xf] }
 0x2f0   :  { %3977 = vmatmul.bf16.vlgmr.msrb.gmra.mxu0 %v10043_v15  ;;  %3990 = vmatmul.bf16.vlgmr.msrb.gmra.mxu1 %v10045_v25 }
 0x2f1   :  { %4021 = vmatpush.bf16.msra.mxu0 %v6114_v35  ;;  %4034 = vmatpush.bf16.msra.mxu1 %v6242_v54  ;;  %v6415_v35 = vld [vmem:[%s10628_s3 + $0x358] sm:$0xf0]  ;;  %v6034_v54 = vor.u32 %v6990_v0, %v6031_v8 }
 0x2f2   :  { %4047 = vmatpush.bf16.msra.mxu2 %v6370_v37  ;;  %4060 = vmatpush.bf16.msra.mxu3 %v6498_v42  ;;  %v6015_v37 = vld [vmem:[%s10628_s3 + $0x38] sm:$0xf0]  ;;  %v6290_v42 = vor.u32 %v7054_v9, %v6287_v24  ;;  %v6418_v43 = vor.u32 %v7086_v14, %v6415_v35 }
 0x2f3   :  { %4003 = vmatmul.bf16.vlgmr.msrb.gmra.mxu2 %v10047_v55  ;;  %4016 = vmatmul.bf16.vlgmr.msrb.gmra.mxu3 %v10049_v56 }
 0x2f5   :  { %4022 = vmatpush.bf16.msra.mxu0 %v6098_v32  ;;  %4035 = vmatpush.bf16.msra.mxu1 %v6226_v1  ;;  %v6399_v32 = vld [vmem:[%s10628_s3 + $0x338] sm:$0xf0]  ;;  %v6018_v1 = vor.u32 %v6986_v46, %v6015_v37 }
 0x2f6   :  { %4048 = vmatpush.bf16.msra.mxu2 %v6354_v48  ;;  %4061 = vmatpush.bf16.msra.mxu3 %v6482_v49  ;;  %v5999_v48 = vld [vmem:[%s10628_s3 + $0x18] sm:$0xf0]  ;;  %v6274_v49 = vor.u32 %v7050_v28, %v6271_v62  ;;  %v6402_v50 = vor.u32 %v7082_v21, %v6399_v32 }
 0x2f9   :  { %4023 = vmatpush.bf16.msra.mxu0 %v6082_v58  ;;  %4036 = vmatpush.bf16.msra.mxu1 %v6210_v63  ;;  %v6383_v58 = vld [vmem:[%s10628_s3 + $0x318] sm:$0xf0]  ;;  %v6002_v63 = vor.u32 %v6982_v47, %v5999_v48 }
 0x2fa   :  { %4049 = vmatpush.bf16.msra.mxu2 %v6338_v17  ;;  %4062 = vmatpush.bf16.msra.mxu3 %v6466_v5  ;;  %v6386_v17 = vor.u32 %v7078_v38, %v6383_v58 }
 0x2fd   :  { %4024 = vmatpush.bf16.msra.mxu0 %v6066_v34  ;;  %4037 = vmatpush.bf16.msra.mxu1 %v6194_v18 }
 0x2fe   :  { %4050 = vmatpush.bf16.msra.mxu2 %v6322_v39  ;;  %4063 = vmatpush.bf16.msra.mxu3 %v6450_v3 }
 0x301   :  { %4025 = vmatpush.bf16.msra.mxu0 %v6050_v7  ;;  %4038 = vmatpush.bf16.msra.mxu1 %v6178_v26 }
 0x302   :  { %4051 = vmatpush.bf16.msra.mxu2 %v6306_v10  ;;  %4064 = vmatpush.bf16.msra.mxu3 %v6434_v29 }
 0x305   :  { %4026 = vmatpush.bf16.msra.mxu0 %v6034_v54  ;;  %4039 = vmatpush.bf16.msra.mxu1 %v6162_v36 }
 0x306   :  { %4052 = vmatpush.bf16.msra.mxu2 %v6290_v42  ;;  %4065 = vmatpush.bf16.msra.mxu3 %v6418_v43 }
 0x309   :  { %4027 = vmatpush.bf16.msra.mxu0 %v6018_v1  ;;  %4040 = vmatpush.bf16.msra.mxu1 %v6146_v19 }
 0x30a   :  { %4053 = vmatpush.bf16.msra.mxu2 %v6274_v49  ;;  %4066 = vmatpush.bf16.msra.mxu3 %v6402_v50 }
 0x30d   :  { %4028 = vmatpush.bf16.msra.mxu0 %v6002_v63  ;;  %4041 = vmatpush.bf16.msra.mxu1 %v6130_v2 }
 0x30e   :  { %4054 = vmatpush.bf16.msra.mxu2 %v6258_v4  ;;  %4067 = vmatpush.bf16.msra.mxu3 %v6386_v17 }
 0x310   :  { %4029 = vmatmul.bf16.vlgmr.msra.gmra.mxu0 %v10043_v15  ;;  %4042 = vmatmul.bf16.vlgmr.msra.gmra.mxu1 %v10045_v25 }
 0x311   :  { %4055 = vmatmul.bf16.vlgmr.msra.gmra.mxu2 %v10047_v55  ;;  %4068 = vmatmul.bf16.vlgmr.msra.gmra.mxu3 %v10049_v56 }
 0x34c   :  { %v3874_v5 = vpop.f32.mrf.mxu0  ;;  %v3887_v12 = vpop.f32.mrf.mxu1 }
 0x34d   :  { %v3888_v41 = vadd.f32 %v3887_v12, %v3874_v5 }
 0x353   :  { %v3900_v60 = vpop.f32.mrf.mxu2  ;;  %v3913_v59 = vpop.f32.mrf.mxu3 }
 0x354   :  { %v3901_v16 = vadd.f32 %v3900_v60, %v3888_v41  ;;  %v3876_v13 = vpop.f32.mrf.mxu0  ;;  %v3889_v34 = vpop.f32.mrf.mxu1 }
 0x356   :  { %v10427_v18 = vadd.f32 %v3913_v59, %v3901_v16 }
 0x358   :  { %v4073_v22 = vrot.slane %v10427_v18, 4 }
 0x35a   :  { %v4074_v8 = vadd.f32 %v4073_v22, %v10427_v18 }
 0x35b   :  { %v3902_v33 = vpop.f32.mrf.mxu2  ;;  %v3915_v61 = vpop.f32.mrf.mxu3 }
 0x35c   :  { %v3926_v39 = vpop.f32.mrf.mxu0  ;;  %v3939_v15 = vpop.f32.mrf.mxu1  ;;  %v4075_v31 = vrot.slane %v4074_v8, 2 }
 0x35d   :  { %v3940_v3 = vadd.f32 %v3939_v15, %v3926_v39 }
 0x35e   :  { %v4076_v54 = vadd.f32 %v4075_v31, %v4074_v8 }
 0x360   :  { %v4077_v44 = vrot.slane %v4076_v54, 1 }
 0x362   :  { %v4078_v1 = vadd.f32 %v4077_v44, %v4076_v54  ;;  %v7140_v44 = vld [vmem:[%s10629_s4 + $0xf8] sm:$0xff] }
 0x363   :  { %v3952_v25 = vpop.f32.mrf.mxu2  ;;  %v3965_v20 = vpop.f32.mrf.mxu3  ;;  %4546 = vmatpush.bf16.msrb.mxu3 %v7140_v44 }
 0x364   :  { %v3953_v55 = vadd.f32 %v3952_v25, %v3940_v3  ;;  %v3928_v27 = vpop.f32.mrf.mxu0  ;;  %v3941_v56 = vpop.f32.mrf.mxu1  ;;  %v10445_v49 = vmul.f32 %v4078_v1, %v8651_v57 }
 0x366   :  { %v10429_v40 = vadd.f32 %v3965_v20, %v3953_v55  ;;  %v4101_v53 = vsub.f32 %v10427_v18, %v10445_v49 }
 0x368   :  { %v4079_v11 = vrot.slane %v10429_v40, 4  ;;  %v4105_v63 = vmul.f32 %v4101_v53, %v4101_v53 }
 0x36a   :  { %v4080_v6 = vadd.f32 %v4079_v11, %v10429_v40  ;;  %v4109_v41 = vrot.slane %v4105_v63, 4 }
 0x36b   :  { %v3954_v7 = vpop.f32.mrf.mxu2  ;;  %v3967_v26 = vpop.f32.mrf.mxu3 }
 0x36c   :  { %v4081_v0 = vrot.slane %v4080_v6, 2  ;;  %v4110_v13 = vadd.f32 %v4109_v41, %v4105_v63  ;;  %v7130_v63 = vld [vmem:[%s10629_s4 + $0xa8] sm:$0xff]  ;;  %v7121_v41 = vld [vmem:[%s10629_s4 + $0x60] sm:$0xff] }
 0x36d   :  { %v3978_v10 = vpop.f32.mrf.mxu0  ;;  %v3991_v29 = vpop.f32.mrf.mxu1 }
 0x36e   :  { %v4082_v30 = vadd.f32 %v4081_v0, %v4080_v6  ;;  %v3992_v9 = vadd.f32 %v3991_v29, %v3978_v10  ;;  %v4111_v55 = vrot.slane %v4110_v13, 2 }
 0x370   :  { %v4083_v24 = vrot.slane %v4082_v30, 1  ;;  %v4112_v6 = vadd.f32 %v4111_v55, %v4110_v13  ;;  %v7136_v55 = vld [vmem:[%s10629_s4 + $0xd8] sm:$0xff] }
 0x372   :  { %v4084_v43 = vadd.f32 %v4083_v24, %v4082_v30  ;;  %v4113_v30 = vrot.slane %v4112_v6, 1 }
 0x374   :  { %v10440_v62 = vmul.f32 %v4084_v43, %v8651_v57  ;;  %v7132_v43 = vld [vmem:[%s10629_s4 + $0xb8] sm:$0xff] }
 0x375   :  { %v3980_v46 = vpop.f32.mrf.mxu0  ;;  %v3993_v37 = vpop.f32.mrf.mxu1  ;;  %4533 = vmatpush.bf16.msrb.mxu2 %v7132_v43  ;;  %v7125_v43 = vld [vmem:[%s10629_s4 + $0x80] sm:$0xff] }
 0x376   :  { %v4004_v14 = vpop.f32.mrf.mxu2  ;;  %v4017_v35 = vpop.f32.mrf.mxu3  ;;  %v4102_v48 = vsub.f32 %v10429_v40, %v10440_v62  ;;  %v7116_v46 = vld [vmem:[%s10629_s4 + $0x38] sm:$0xff] }
 0x377   :  { %v4005_v36 = vadd.f32 %v4004_v14, %v3992_v9  ;;  %v7124_v37 = vld [vmem:[%s10629_s4 + $0x78] sm:$0xff]  ;;  %4507 = vmatpush.bf16.msrb.mxu0 %v7116_v46  ;;  %v7109_v46 = vld [vmem:[%s10629_s4] sm:$0xff] }
 0x378   :  { %v4106_v52 = vmul.f32 %v4102_v48, %v4102_v48  ;;  %4520 = vmatpush.bf16.msrb.mxu1 %v7124_v37  ;;  %v7131_v48 = vld [vmem:[%s10629_s4 + $0xb0] sm:$0xff]  ;;  %v7117_v37 = vld [vmem:[%s10629_s4 + $0x40] sm:$0xff] }
 0x379   :  { %v10435_v42 = vadd.f32 %v4017_v35, %v4005_v36  ;;  %v4114_v35 = vadd.f32 %v4113_v30, %v4112_v6  ;;  %4534 = vmatpush.bf16.msrb.mxu2 %v7131_v48  ;;  %v7111_v6 = vld [vmem:[%s10629_s4 + $0x10] sm:$0xff]  ;;  %v7118_v30 = vld [vmem:[%s10629_s4 + $0x48] sm:$0xff] }
 0x37a   :  { %v4115_v58 = vrot.slane %v4106_v52, 4 }
 0x37b   :  { %v4085_v45 = vrot.slane %v10435_v42, 4 }
 0x37c   :  { %v4116_v12 = vadd.f32 %v4115_v58, %v4106_v52  ;;  %v7122_v58 = vld [vmem:[%s10629_s4 + $0x68] sm:$0xff] }
 0x37d   :  { %v4086_v28 = vadd.f32 %v4085_v45, %v10435_v42  ;;  %4535 = vmatpush.bf16.msrb.mxu2 %v7130_v63 }
 0x37e   :  { %v4006_v21 = vpop.f32.mrf.mxu2  ;;  %v4019_v32 = vpop.f32.mrf.mxu3  ;;  %v4117_v59 = vrot.slane %v4116_v12, 2 }
 0x37f   :  { %v4087_v19 = vrot.slane %v4086_v28, 2  ;;  %v4133_v21 = vmul.f32 %v4114_v35, %v8651_v57 }
 0x380   :  { %v4118_v25 = vadd.f32 %v4117_v59, %v4116_v12  ;;  %v7113_v12 = vld [vmem:[%s10629_s4 + $0x20] sm:$0xff] }
 0x381   :  { %v4088_v47 = vadd.f32 %v4087_v19, %v4086_v28  ;;  %v7115_v19 = vld [vmem:[%s10629_s4 + $0x30] sm:$0xff]  ;;  %v10495_v52 = vadd.f32 0.0001, %v4133_v21  ;;  %v7137_v59 = vld [vmem:[%s10629_s4 + $0xe0] sm:$0xff] }
 0x382   :  { %v4119_v11 = vrot.slane %v4118_v25, 1  ;;  %4508 = vmatpush.bf16.msrb.mxu0 %v7115_v19  ;;  %v7133_v21 = vld [vmem:[%s10629_s4 + $0xc0] sm:$0xff] }
 0x383   :  { %v4089_v50 = vrot.slane %v4088_v47, 1  ;;  %vm4151_vm9 = vweird.f32 %v10495_v52 }
 0x384   :  { %v4120_v10 = vadd.f32 %v4119_v11, %v4118_v25 }
 0x385   :  { %v4090_v51 = vadd.f32 %v4089_v50, %v4088_v47  ;;  %v7123_v47 = vld [vmem:[%s10629_s4 + $0x70] sm:$0xff] }
 0x386   :  { %v4134_v24 = vmul.f32 %v4120_v10, %v8651_v57  ;;  %v7139_v50 = vld [vmem:[%s10629_s4 + $0xf0] sm:$0xff]  ;;  %4521 = vmatpush.bf16.msrb.mxu1 %v7123_v47 }
 0x387   :  { %v10450_v23 = vmul.f32 %v4090_v51, %v8651_v57  ;;  %4547 = vmatpush.bf16.msrb.mxu3 %v7139_v50 }
 0x388   :  { %v10475_v45 = vadd.f32 0.0001, %v4134_v24  ;;  %v7134_v24 = vld [vmem:[%s10629_s4 + $0xc8] sm:$0xff] }
 0x389   :  { %v4103_v38 = vsub.f32 %v10435_v42, %v10450_v23 }
 0x38a   :  { %7162 = vrsqrt.f32 %v10475_v45  ;;  %4522 = vmatpush.bf16.msrb.mxu1 %v7122_v58  ;;  %vm4161_vm0 = vweird.f32 %v10475_v45 }
 0x38b   :  { %v4107_v2 = vmul.f32 %v4103_v38, %v4103_v38  ;;  %v7114_v38 = vld [vmem:[%s10629_s4 + $0x28] sm:$0xff] }
 0x38c   :  { %4509 = vmatpush.bf16.msrb.mxu0 %v7114_v38 }
 0x38d   :  { %v4030_v4 = vpop.f32.mrf.mxu0  ;;  %v4043_v17 = vpop.f32.mrf.mxu1  ;;  %v4121_v5 = vrot.slane %v4107_v2, 4 }
 0x38e   :  { %v4044_v16 = vadd.f32 %v4043_v17, %v4030_v4  ;;  %4523 = vmatpush.bf16.msrb.mxu1 %v7121_v41 }
 0x38f   :  { %v4122_v60 = vadd.f32 %v4121_v5, %v4107_v2  ;;  %v7138_v2 = vld [vmem:[%s10629_s4 + $0xe8] sm:$0xff] }
 0x390   :  { %4548 = vmatpush.bf16.msrb.mxu3 %v7138_v2  ;;  %v10511_v17 = vpop.eup %7162  ;;  %4510 = vmatpush.bf16.msrb.mxu0 %v7113_v12 }
 0x391   :  { %v4123_v61 = vrot.slane %v4122_v60, 2  ;;  %vm4162_vm14 = vweird.f32 %v10511_v17 }
 0x392   :  { %vm4163_vm2 = vmor %vm4161_vm0, %vm4162_vm14 }
 0x393   :  { %v4124_v27 = vadd.f32 %v4123_v61, %v4122_v60  ;;  %v7129_v60 = vld [vmem:[%s10629_s4 + $0xa0] sm:$0xff]  ;;  %v7112_v61 = vld [vmem:[%s10629_s4 + $0x18] sm:$0xff] }
 0x394   :  { %v4056_v34 = vpop.f32.mrf.mxu2  ;;  %v4069_v33 = vpop.f32.mrf.mxu3  ;;  %4536 = vmatpush.bf16.msrb.mxu2 %v7129_v60  ;;  %4549 = vmatpush.bf16.msrb.mxu3 %v7137_v59 }
 0x395   :  { %v4057_v39 = vadd.f32 %v4056_v34, %v4044_v16  ;;  %v4032_v15 = vpop.f32.mrf.mxu0  ;;  %v4045_v3 = vpop.f32.mrf.mxu1  ;;  %v4125_v0 = vrot.slane %v4124_v27, 1  ;;  %v4156_v34 = vmul.f32 %v10511_v17, %v10475_v45  ;;  %4511 = vmatpush.bf16.msrb.mxu0 %v7112_v61 }
 0x396   :  { %v7128_v15 = vld [vmem:[%s10629_s4 + $0x98] sm:$0xff] }
 0x397   :  { %v10454_v20 = vadd.f32 %v4069_v33, %v4057_v39  ;;  %v4126_v31 = vadd.f32 %v4125_v0, %v4124_v27  ;;  %v7120_v39 = vld [vmem:[%s10629_s4 + $0x58] sm:$0xff]  ;;  %v7135_v0 = vld [vmem:[%s10629_s4 + $0xd0] sm:$0xff] }
 0x398   :  { %4524 = vmatpush.bf16.msrb.mxu1 %v7120_v39  ;;  %4537 = vmatpush.bf16.msrb.mxu2 %v7128_v15 }
 0x399   :  { %v4091_v56 = vrot.slane %v10454_v20, 4  ;;  %v4135_v54 = vmul.f32 %v4126_v31, %v8651_v57  ;;  %4550 = vmatpush.bf16.msrb.mxu3 %v7136_v55  ;;  %4512 = vmatpush.bf16.msrb.mxu0 %v7111_v6  ;;  %v7126_v31 = vld [vmem:[%s10629_s4 + $0x88] sm:$0xff] }
 0x39b   :  { %v4092_v22 = vadd.f32 %v4091_v56, %v10454_v20  ;;  %v10480_v32 = vadd.f32 0.0001, %v4135_v54  ;;  %v4157_v56 = vmul.f32 %v10511_v17, %v4156_v34 }
 0x39c   :  { %v4058_v7 = vpop.f32.mrf.mxu2  ;;  %v4071_v26 = vpop.f32.mrf.mxu3 }
 0x39d   :  { %v4093_v8 = vrot.slane %v4092_v22, 2  ;;  %7164 = vrsqrt.f32 %v10480_v32  ;;  %v7119_v7 = vld [vmem:[%s10629_s4 + $0x50] sm:$0xff]  ;;  %4551 = vmatpush.bf16.msrb.mxu3 %v7135_v0  ;;  %vm4171_vm3 = vweird.f32 %v10480_v32 }
 0x39e   :  { %7166 = vrsqrt.f32 %v10495_v52  ;;  %4525 = vmatpush.bf16.msrb.mxu1 %v7119_v7 }
 0x39f   :  { %v4094_v29 = vadd.f32 %v4093_v8, %v4092_v22  ;;  %v4158_v8 = vmul.f32 0.5, %v4157_v56 }
 0x3a1   :  { %v4095_v9 = vrot.slane %v4094_v29, 1  ;;  %4552 = vmatpush.bf16.msrb.mxu3 %v7134_v24 }
 0x3a2   :  { %4526 = vmatpush.bf16.msrb.mxu1 %v7118_v30 }
 0x3a3   :  { %v4096_v14 = vadd.f32 %v4095_v9, %v4094_v29  ;;  %v10525_v16 = vpop.eup %7164  ;;  %v7110_v29 = vld [vmem:[%s10629_s4 + $0x8] sm:$0xff] }
 0x3a4   :  { %v10538_v3 = vpop.eup %7166  ;;  %v4166_v25 = vmul.f32 %v10525_v16, %v10480_v32  ;;  %4513 = vmatpush.bf16.msrb.mxu0 %v7110_v29  ;;  %vm4172_vm1 = vweird.f32 %v10525_v16  ;;  %v6499_v32 = vld [vmem:[%s10630_s5 + $0x4] ss:$8 sm:$0xf] }
 0x3a5   :  { %v10461_v36 = vmul.f32 %v4096_v14, %v8651_v57  ;;  %v4146_v11 = vmul.f32 %v10538_v3, %v10495_v52  ;;  %v4159_v14 = vsub.f32 1.5, %v4158_v8  ;;  %4553 = vmatpush.bf16.msrb.mxu3 %v7133_v21  ;;  %vm4152_vm5 = vweird.f32 %v10538_v3  ;;  %vm4173_vm6 = vmor %vm4171_vm3, %vm4172_vm1 }
 0x3a6   :  { %v4167_v26 = vmul.f32 %v10525_v16, %v4166_v25  ;;  %4527 = vmatpush.bf16.msrb.mxu1 %v7117_v37  ;;  %vm4153_vm10 = vmor %vm4151_vm9, %vm4152_vm5 }
 0x3a7   :  { %v4104_v28 = vsub.f32 %v10454_v20, %v10461_v36  ;;  %v4147_v10 = vmul.f32 %v10538_v3, %v4146_v11 }
 0x3a8   :  { %v4168_v9 = vmul.f32 0.5, %v4167_v26  ;;  %4514 = vmatpush.bf16.msrb.mxu0 %v7109_v46 }
 0x3a9   :  { %v4108_v1 = vmul.f32 %v4104_v28, %v4104_v28  ;;  %v4148_v54 = vmul.f32 0.5, %v4147_v10 }
 0x3aa   :  { %v4169_v44 = vsub.f32 1.5, %v4168_v9 }
 0x3ab   :  { %v4127_v51 = vrot.slane %v4108_v1, 4  ;;  %v4149_v47 = vsub.f32 1.5, %v4148_v54 }
 0x3ac   :  { %v4170_v48 = vmul.f32 %v10525_v16, %v4169_v44 }
 0x3ad   :  { %v4128_v53 = vadd.f32 %v4127_v51, %v4108_v1  ;;  %v4160_v1 = vmul.f32 %v10511_v17, %v4159_v14  ;;  %v4150_v38 = vmul.f32 %v10538_v3, %v4149_v47 }
 0x3ae   :  { %v4174_v58 = vsel %vm4173_vm6, %v10525_v16, %v4170_v48 }
 0x3af   :  { %v4129_v4 = vrot.slane %v4128_v53, 2  ;;  %v4164_v51 = vsel %vm4163_vm2, %v10511_v17, %v4160_v1 }
 0x3b0   :  { %v4189_v63 = vrot.slane %v4164_v51, 7 }
 0x3b1   :  { %v4130_v5 = vadd.f32 %v4129_v4, %v4128_v53  ;;  %v4190_v4 = vrot.slane %v4174_v58, 6 }
 0x3b3   :  { %v4131_v13 = vrot.slane %v4130_v5, 1 }
 0x3b5   :  { %v4132_v33 = vadd.f32 %v4131_v13, %v4130_v5  ;;  %v4154_v5 = vsel %vm4153_vm10, %v10538_v3, %v4150_v38 }
 0x3b6   :  { %v4192_v12 = vsel %vm1889_vm12, %v4154_v5, %v4189_v63 }
 0x3b7   :  { %v4136_v27 = vmul.f32 %v4132_v33, %v8651_v57  ;;  %v7127_v57 = vld [vmem:[%s10629_s4 + $0x90] sm:$0xff] }
 0x3b8   :  { %4538 = vmatpush.bf16.msrb.mxu2 %v7127_v57 }
 0x3b9   :  { %v4144_v22 = vadd.f32 0.0001, %v4136_v27  ;;  %v6500_v27 = vld [vmem:[%s10630_s5 + $0x5] ss:$8 sm:$0xf] }
 0x3bb   :  { %7168 = vrsqrt.f32 %v4144_v22  ;;  %vm4181_vm7 = vweird.f32 %v4144_v22 }
 0x3bc   :  { %4539 = vmatpush.bf16.msrb.mxu2 %v7126_v31 }
 0x3c0   :  { %4540 = vmatpush.bf16.msrb.mxu2 %v7125_v43 }
 0x3c1   :  { %v7169_v35 = vpop.eup %7168 }
 0x3c2   :  { %v4176_v28 = vmul.f32 %v7169_v35, %v4144_v22  ;;  %vm4182_vm4 = vweird.f32 %v7169_v35 }
 0x3c3   :  { %vm4183_vm8 = vmor %vm4181_vm7, %vm4182_vm4 }
 0x3c4   :  { %v4177_v19 = vmul.f32 %v7169_v35, %v4176_v28 }
 0x3c6   :  { %v4178_v50 = vmul.f32 0.5, %v4177_v19 }
 0x3c8   :  { %v4179_v53 = vsub.f32 1.5, %v4178_v50 }
 0x3ca   :  { %v4180_v45 = vmul.f32 %v7169_v35, %v4179_v53 }
 0x3cc   :  { %v4184_v2 = vsel %vm4183_vm8, %v7169_v35, %v4180_v45 }
 0x3cd   :  { %v4191_v17 = vrot.slane %v4184_v2, 5 }
 0x3cf   :  { %v4193_v41 = vsel %vm1891_vm13, %v4190_v4, %v4191_v17 }
 0x3d0   :  { %v4194_v60 = vsel %vm1893_vm15, %v4192_v12, %v4193_v41 }
 0x3d1   :  { %v4196_v59 = vmul.f32 %v6499_v32, %v4194_v60 }
 0x3d3   :  { %v4198_v16 = vperm.slane %v4196_v59, 0  ;;  %v4199_v13 = vperm.slane %v4196_v59, 1  ;;  %v4200_v52 = vperm.slane %v4196_v59, 2  ;;  %v4201_v34 = vperm.slane %v4196_v59, 3 }
 0x3d5   :  { %v4207_v33 = vmul.f32 %v4199_v13, %v10440_v62  ;;  %v4208_v61 = vmul.f32 %v4200_v52, %v10450_v23  ;;  %v4209_v39 = vmul.f32 %v4201_v34, %v10461_v36  ;;  %v4206_v15 = vmul.f32 %v4198_v16, %v10445_v49 }
 0x3d6   :  { %v4225_v23 = vmul.f32 %v4201_v34, %v10454_v20  ;;  %v4222_v36 = vmul.f32 %v4198_v16, %v10427_v18  ;;  %v4223_v49 = vmul.f32 %v4199_v13, %v10429_v40  ;;  %v4224_v6 = vmul.f32 %v4200_v52, %v10435_v42  ;;  %v7143_v40 = vld [vmem:[%s10631_s6] ss:$0 sm:$0xff] }
 0x3d7   :  { %v4214_v3 = vrot.slane %v4207_v33, 7  ;;  %v4215_v25 = vrot.slane %v4208_v61, 6  ;;  %v4216_v55 = vrot.slane %v4209_v39, 5 }
 0x3d9   :  { %v4217_v56 = vsel %vm1889_vm12, %v4206_v15, %v4214_v3  ;;  %v4218_v11 = vsel %vm1891_vm13, %v4215_v25, %v4216_v55 }
 0x3da   :  { %v4219_v22 = vsel %vm1893_vm15, %v4217_v56, %v4218_v11 }
 0x3db   :  { %v4221_v62 = vsub.f32 %v6500_v27, %v4219_v22 }
 0x3dd   :  { %v4230_v7 = vperm.slane %v4221_v62, 3  ;;  %v4227_v57 = vperm.slane %v4221_v62, 0  ;;  %v4228_v26 = vperm.slane %v4221_v62, 1  ;;  %v4229_v0 = vperm.slane %v4221_v62, 2 }
 0x3df   :  { %v4238_v8 = vadd.f32 %v4230_v7, %v4225_v23  ;;  %v4235_v10 = vadd.f32 %v4227_v57, %v4222_v36  ;;  %v4236_v29 = vadd.f32 %v4228_v26, %v4223_v49  ;;  %v4237_v30 = vadd.f32 %v4229_v0, %v4224_v6 }
 0x3e1   :  { %v4242_v31 = vmax.f32 %v4238_v8, 0.0  ;;  %v4239_v9 = vmax.f32 %v4235_v10, 0.0  ;;  %v4240_v24 = vmax.f32 %v4236_v29, 0.0  ;;  %v4241_v14 = vmax.f32 %v4237_v30, 0.0 }
 0x3e3   :  { %v4246_v35 = vpack.c.bf16 %v4242_v31, %v4242_v31  ;;  %v4243_v20 = vpack.c.bf16 %v4239_v9, %v4239_v9  ;;  %v4244_v54 = vpack.c.bf16 %v4240_v24, %v4240_v24  ;;  %v4245_v18 = vpack.c.bf16 %v4241_v14, %v4241_v14 }
 0x3e5   :  { %4515 = vmatmul.bf16.vlgmr.msrb.gmra.mxu0 %v4243_v20  ;;  %4528 = vmatmul.bf16.vlgmr.msrb.gmra.mxu1 %v4244_v54 }
 0x3e6   :  { %4541 = vmatmul.bf16.vlgmr.msrb.gmra.mxu2 %v4245_v18  ;;  %4554 = vmatmul.bf16.vlgmr.msrb.gmra.mxu3 %v4246_v35 }
 0x462   :  { %v4516_v42 = vpop.f32.mrf.mxu0  ;;  %v4529_v46 = vpop.f32.mrf.mxu1 }
 0x463   :  { %v4517_v37 = vadd.f32 %v7143_v40, %v4516_v42 }
 0x465   :  { %v4530_v43 = vadd.f32 %v4529_v46, %v4517_v37 }
 0x469   :  { %v4542_v44 = vpop.f32.mrf.mxu2  ;;  %v4555_v28 = vpop.f32.mrf.mxu3 }
 0x46a   :  { %v4543_v21 = vadd.f32 %v4542_v44, %v4530_v43  ;;  %v4518_v1 = vpop.f32.mrf.mxu0  ;;  %v4531_v19 = vpop.f32.mrf.mxu1 }
 0x46c   :  { %v4556_v47 = vadd.f32 %v4555_v28, %v4543_v21 }
 0x46e   :  { %4559 = vst [vmem:[#allocation2] sm:$0xff] %v4556_v47 }
 0x46f   :  { %4570 = dma.vmem_to_hbm [thread:$0]  %s4566_s1, 128, %s4568_s29, [#allocation3]  }
 0x471   :  { %v4544_v48 = vpop.f32.mrf.mxu2  ;;  %v4557_v50 = vpop.f32.mrf.mxu3 }
 0x472   :  { %7194 = dma.done.wait [#allocation3], 128  }
 0x473   :  { %7195 = vsyncadd [#allocation3], 4294967168 }
 0x474   :  { %4575 = vsyncpa [#allocation3], 1 }

</bundles_post_ra>
